<compile_context>
chip_gen: v7x
topology: tpu7x:2x2x1
jax: 0.10.0
libtpu: 0.0.40
codegen_flags: <defaults>
</compile_context>

<pallas_src>
import jax
import jax.numpy as jnp
from jax import lax
from jax.experimental import pallas as pl
from jax.experimental.pallas import tpu as pltpu


# --------------------------------------------------------------------------- #
# Kernel factory.
# --------------------------------------------------------------------------- #
def _make_sk_kernel(H, W, CIN, COUT, NB, B_TILE, DMAX):
    HW = H * W
    ROWS = B_TILE * HW
    TAPS = [(ky, kx) for ky in range(3) for kx in range(3)]

    def kernel(x_ref, w_ref, b_ref, wfc1_ref, bfc1_ref, wfc2_ref,
               out_ref, conv_sc, patch_sc):
        # x_ref   : (B_TILE, H+2*DMAX, W+2*DMAX, CIN) bf16, padded once with DMAX
        # w_ref   : (NB, 9*CIN, COUT) bf16   im2col conv weights, BN scale folded in
        # b_ref   : (NB, 1, COUT)     f32    folded BN bias
        # wfc1_ref: (COUT, D) f32 (fc BN scale folded)     bfc1_ref: (1, D) f32
        # wfc2_ref: (D, NB*COUT) f32
        # out_ref : (B_TILE, NB*HW*COUT) f32  branch-major, lane-dense output slab
        # conv_sc : VMEM (NB, B_TILE, HW, COUT) f32  post-ReLU branch outputs
        #           (note: lane-padded when COUT < 128; fine for these sizes)
        # patch_sc: VMEM (ROWS, 9*CIN) bf16          im2col staging buffer

        p_acc = jnp.zeros((B_TILE, COUT), jnp.float32)    # fused global-avg-pool acc

        for i in range(NB):
            dil = i + 1
            off = DMAX - dil
            # ---- im2col: stage the 9 dilated taps via static Ref slices ------
            for t, (ky, kx) in enumerate(TAPS):
                oy = off + ky * dil
                ox = off + kx * dil
                win = x_ref[:, oy:oy + H, ox:ox + W, :]          # (B_TILE,H,W,CIN) bf16
                patch_sc[:, t * CIN:(t + 1) * CIN] = win.reshape(ROWS, CIN)
            # ---- one MXU matmul per branch (bf16 operands, f32 accumulation) -
            acc = jnp.dot(patch_sc[...], w_ref[i],
                          preferred_element_type=jnp.float32)    # (ROWS, COUT)
            y = jnp.maximum(acc + b_ref[i], 0.0)                 # BN bias + ReLU
            y = y.reshape(B_TILE, HW, COUT)
            conv_sc[i] = y
            p_acc = p_acc + jnp.sum(y, axis=1)                   # pool partial sum

        # ---- squeeze/excite MLP on the pooled vector (tiny, keep f32) --------
        p = p_acc * (1.0 / HW)                                   # (B_TILE, COUT)
        h = jnp.maximum(
            jnp.dot(p, wfc1_ref[...], preferred_element_type=jnp.float32)
            + bfc1_ref[...], 0.0)                                # (B_TILE, D)
        logits = jnp.dot(h, wfc2_ref[...],
                         preferred_element_type=jnp.float32)     # (B_TILE, NB*COUT)

        # ---- softmax across the branch axis (max-subtracted, EUP reciprocal) -
        lg = [logits[:, i * COUT:(i + 1) * COUT] for i in range(NB)]
        m = lg[0]
        for i in range(1, NB):
            m = jnp.maximum(m, lg[i])
        ex = [jnp.exp(l - m) for l in lg]
        den = ex[0]
        for i in range(1, NB):
            den = den + ex[i]
        inv = pl.reciprocal(den, approx=True)                    # (B_TILE, COUT)

        # ---- rescale branches; each writes a 128-aligned lane-dense slice ----
        for i in range(NB):
            attn = ex[i] * inv                                   # (B_TILE, COUT)
            scaled = conv_sc[i] * attn[:, None, :]               # (B_TILE, HW, COUT)
            out_ref[:, i * HW * COUT:(i + 1) * HW * COUT] = (
                scaled.reshape(B_TILE, HW * COUT).astype(out_ref.dtype))

    return kernel


# --------------------------------------------------------------------------- #
# Generation-aware VMEM budget & batch-tile selection.
# --------------------------------------------------------------------------- #
def _vmem_budget_bytes():
    # Physical VMEM minus headroom, capped: ~48 MiB on v7x (64 MiB physical),
    # up to 96 MiB on v5e/v6e (128 MiB physical).
    cap = 64 * 1024 * 1024
    try:
        cap = int(pltpu.get_tpu_info().vmem_capacity_bytes)
    except Exception:
        pass
    return max(16 * 1024 * 1024, min(cap - 16 * 1024 * 1024, 96 * 1024 * 1024))


def _pick_b_tile(B, rows_per_sample, per_sample_bytes, const_bytes, budget):
    # Valid tiles: divisors of B that are multiples of 8 OR the whole batch,
    # so the output block's sublane dim satisfies the (8,128) block rule.
    cands = [c for c in range(1, B + 1)
             if B % c == 0 and (c % 8 == 0 or c == B)]
    fits = [c for c in cands if const_bytes + c * per_sample_bytes <= budget]
    if not fits:
        fits = [min(cands)]
    target_rows = 512   # fill the MXU M dim on 256-wide MXUs; fine on v5e too

    def rank(c):
        steps = B // c
        # prefer >=2 grid steps (megacore sharding + DMA prefetch/writeback
        # overlap), then rows near target, then the larger tile
        return (0 if steps >= 2 else 1, abs(c * rows_per_sample - target_rows), -c)

    return min(fits, key=rank)


# --------------------------------------------------------------------------- #
# Wrapper: NCHW glue, bf16 single max-pad, weight folding, pallas_call.
# --------------------------------------------------------------------------- #
def sk_forward(x_nchw, params):
    B, CIN, H, W = x_nchw.shape
    NB = params["num_branch"]
    COUT = params["out_chs"]
    D = params["wfc1"].shape[1]
    HW = H * W

    dilations = tuple(range(1, NB + 1))
    DMAX = max(dilations)                       # padding tracks max dilation
    Hp, Wp = H + 2 * DMAX, W + 2 * DMAX

    # ---- VMEM-aware batch tiling --------------------------------------------
    budget = _vmem_budget_bytes()
    lane_pad = lambda c: ((c + 127) // 128) * 128
    per_sample = (2 * Hp * Wp * lane_pad(CIN) * 2          # bf16 input, 2 bufs
                  + 2 * lane_pad(NB * HW * COUT) * 4       # f32 out slab, 2 bufs
                  + NB * HW * lane_pad(COUT) * 4           # conv_sc (f32)
                  + HW * lane_pad(9 * CIN) * 2)            # patch_sc (bf16)
    const_bytes = 2 * (NB * 9 * CIN * lane_pad(COUT) * 2   # conv weights
                       + NB * lane_pad(COUT) * 4           # biases
                       + COUT * lane_pad(D) * 4            # wfc1
                       + lane_pad(D) * 4                   # bfc1
                       + D * lane_pad(NB * COUT) * 4)      # wfc2
    B_TILE = _pick_b_tile(B, HW, per_sample, const_bytes, budget)
    ROWS = B_TILE * HW
    # TODO(synk): for tiny B (a single grid step, as in this test) a spatial
    # grid axis over H with halo would give v7x's second TensorCore work and
    # let the block DMA pipeline; not implemented here.

    # ---- input: cast to bf16 FIRST, then relayout + pad once ----------------
    # TODO(synk): accept/return NHWC at the module boundary to drop these
    # un-hidden XLA relayouts entirely.
    x = jnp.transpose(x_nchw.astype(jnp.bfloat16), (0, 2, 3, 1))       # NHWC bf16
    xp = jnp.pad(x, ((0, 0), (DMAX, DMAX), (DMAX, DMAX), (0, 0)))      # pad once

    # ---- weights: fold BN scale, im2col reshape, cast to bf16 ---------------
    w_all = jnp.stack([
        (params["w"][i] * params["bn_scale"][i]).reshape(9 * CIN, COUT)
        for i in range(NB)]).astype(jnp.bfloat16)                      # (NB,9CIN,COUT)
    b_all = jnp.stack(params["bn_bias"])                               # (NB,1,COUT) f32
    wfc1_f = params["wfc1"] * params["fc_bn_scale"]                    # fold fc BN scale
    bfc1 = params["fc_bn_bias"]
    wfc2 = params["wfc2"]

    kernel = _make_sk_kernel(H, W, CIN, COUT, NB, B_TILE, DMAX)

    # Note: constant operands could be single-buffered (pl.Buffered(1)) to save
    # VMEM on v7x; omitted here since they are tiny for these shapes.
    out_flat = pl.pallas_call(
        kernel,
        out_shape=jax.ShapeDtypeStruct((B, NB * HW * COUT), jnp.float32),
        grid=(B // B_TILE,),
        in_specs=[
            pl.BlockSpec((B_TILE, Hp, Wp, CIN), lambda b: (b, 0, 0, 0)),
            pl.BlockSpec((NB, 9 * CIN, COUT), lambda b: (0, 0, 0)),
            pl.BlockSpec((NB, 1, COUT), lambda b: (0, 0, 0)),
            pl.BlockSpec((COUT, D), lambda b: (0, 0)),
            pl.BlockSpec((1, D), lambda b: (0, 0)),
            pl.BlockSpec((D, NB * COUT), lambda b: (0, 0)),
        ],
        out_specs=pl.BlockSpec((B_TILE, NB * HW * COUT), lambda b: (b, 0)),
        scratch_shapes=[
            pltpu.VMEM((NB, B_TILE, HW, COUT), jnp.float32),   # branch outputs
            pltpu.VMEM((ROWS, 9 * CIN), jnp.bfloat16),         # im2col staging
        ],
        compiler_params=pltpu.CompilerParams(
            dimension_semantics=("parallel",),                 # batch tiles independent
            vmem_limit_bytes=budget),
    )(xp, w_all, b_all, wfc1_f, bfc1, wfc2)

    # branch-major flat slab -> (B, NB, H, W, COUT) -> NCHW with channels
    # ordered [branch0 COUT, branch1 COUT, ...] like torch.cat(V, dim=1).
    out = out_flat.reshape(B, NB, H, W, COUT)
    out = jnp.transpose(out, (0, 1, 4, 2, 3)).reshape(B, NB * COUT, H, W)
    return out


# --------------------------------------------------------------------------- #
# Deterministic parameter initialization (synthetic; BN folded to scale/bias).
# --------------------------------------------------------------------------- #
def init_sk_params(key, in_chs, out_chs, reduction_dim=16, num_branch=2,
                   max_l=32, eps=1e-5):
    d = max(in_chs // reduction_dim, max_l)
    cin = 2 * in_chs
    ks = iter(jax.random.split(key, 8 * num_branch + 10))

    w, bn_scale, bn_bias = [], [], []
    for _ in range(num_branch):
        wi = jax.random.normal(next(ks), (3, 3, cin, out_chs), jnp.float32) * 0.1
        gamma = jax.random.uniform(next(ks), (out_chs,), jnp.float32, 0.5, 1.5)
        beta = jax.random.normal(next(ks), (out_chs,), jnp.float32) * 0.1
        mean = jax.random.normal(next(ks), (out_chs,), jnp.float32) * 0.1
        var = jax.random.uniform(next(ks), (out_chs,), jnp.float32, 0.5, 1.5)
        s = gamma / jnp.sqrt(var + eps)
        t = beta - mean * s
        w.append(wi)
        bn_scale.append(s.reshape(1, out_chs))
        bn_bias.append(t.reshape(1, out_chs))

    wfc1 = jax.random.normal(next(ks), (out_chs, d), jnp.float32) * 0.1
    gamma1 = jax.random.uniform(next(ks), (d,), jnp.float32, 0.5, 1.5)
    beta1 = jax.random.normal(next(ks), (d,), jnp.float32) * 0.1
    mean1 = jax.random.normal(next(ks), (d,), jnp.float32) * 0.1
    var1 = jax.random.uniform(next(ks), (d,), jnp.float32, 0.5, 1.5)
    s1 = gamma1 / jnp.sqrt(var1 + eps)
    t1 = beta1 - mean1 * s1
    wfc2 = jax.random.normal(next(ks), (d, out_chs * num_branch), jnp.float32) * 0.1

    return dict(num_branch=num_branch, out_chs=out_chs,
                w=w, bn_scale=bn_scale, bn_bias=bn_bias,
                wfc1=wfc1, fc_bn_scale=s1.reshape(1, d), fc_bn_bias=t1.reshape(1, d),
                wfc2=wfc2)


# --------------------------------------------------------------------------- #
# Pure-JAX reference (same math, lax.conv, f32 HIGHEST) for the correctness check.
# --------------------------------------------------------------------------- #
def sk_reference(x_nchw, params):
    x = jnp.transpose(x_nchw, (0, 2, 3, 1)).astype(jnp.float32)
    NB, COUT = params["num_branch"], params["out_chs"]
    convs = []
    for i in range(NB):
        dil = i + 1
        y = lax.conv_general_dilated(
            x, params["w"][i], window_strides=(1, 1),
            padding=((dil, dil), (dil, dil)), rhs_dilation=(dil, dil),
            dimension_numbers=("NHWC", "HWIO", "NHWC"),
            precision=lax.Precision.HIGHEST)
        convs.append(jnp.maximum(y * params["bn_scale"][i] + params["bn_bias"][i], 0.0))
    U = convs[0]
    for i in range(1, NB):
        U = U + convs[i]
    p = jnp.mean(U, axis=(1, 2))                                   # (B, COUT)
    h = jnp.maximum(p @ params["wfc1"] * params["fc_bn_scale"] + params["fc_bn_bias"], 0.0)
    lg = (h @ params["wfc2"]).reshape(-1, NB, COUT)
    a = jax.nn.softmax(lg, axis=1)
    scaled = [convs[i] * a[:, i][:, None, None, :] for i in range(NB)]
    out = jnp.concatenate(scaled, axis=-1)
    return jnp.transpose(out, (0, 3, 1, 2))


if __name__ == "__main__":
    key = jax.random.PRNGKey(0)
    k_x, k_p = jax.random.split(key)

    in_chs, out_chs = 8, 8          # SKModule(in_chs=8, out_chs=8): conv input has 2*in_chs channels
    B, H, W = 2, 8, 8
    x = jax.random.normal(k_x, (B, 2 * in_chs, H, W), jnp.float32)  # NCHW, like PyTorch

    params = init_sk_params(k_p, in_chs, out_chs)

    out = jax.block_until_ready(sk_forward(x, params))
    ref = jax.block_until_ready(sk_reference(x, params))

    assert out.shape == (B, params["num_branch"] * out_chs, H, W)
    # NOTE: bf16 input/weights vs f32 HIGHEST reference; error grows ~sqrt(9*CIN),
    # comfortably inside 2e-2 at these shapes/scales.
    err = float(jnp.max(jnp.abs(out - ref)))
    assert jnp.allclose(out, ref, rtol=2e-2, atol=2e-2), err
    print("KERNEL_OK")
</pallas_src>

<mosaic_0001>
module attributes {stable_mosaic.version = 11 : i64} {
  func.func @kernel(%arg0: i32, %arg1: memref<2x12x12x16xbf16, #tpu.memory_space<vmem>>, %arg2: memref<2x144x8xbf16, #tpu.memory_space<vmem>>, %arg3: memref<2x1x8xf32, #tpu.memory_space<vmem>>, %arg4: memref<8x32xf32, #tpu.memory_space<vmem>>, %arg5: memref<1x32xf32, #tpu.memory_space<vmem>>, %arg6: memref<32x16xf32, #tpu.memory_space<vmem>>, %arg7: memref<2x1024xf32, #tpu.memory_space<vmem>>, %arg8: memref<2x2x64x8xf32, #tpu.memory_space<vmem>>, %arg9: memref<128x144xbf16, #tpu.memory_space<vmem>>) attributes {dimension_semantics = [#tpu.dimension_semantics<parallel>], iteration_bounds = array<i64: 1>, scalar_prefetch = 0 : i64, scratch_operands = 2 : i64, tpu.core_type = #tpu.core_type<tc>, window_params = [{transform_indices = @transform_0, window_bounds = array<i64: 2, 12, 12, 16>}, {pipeline_mode = #tpu.pipeline_mode<synchronous>, transform_indices = @transform_1, window_bounds = array<i64: 2, 144, 8>}, {pipeline_mode = #tpu.pipeline_mode<synchronous>, transform_indices = @transform_2, window_bounds = array<i64: 2, 1, 8>}, {pipeline_mode = #tpu.pipeline_mode<synchronous>, transform_indices = @transform_3, window_bounds = array<i64: 8, 32>}, {pipeline_mode = #tpu.pipeline_mode<synchronous>, transform_indices = @transform_4, window_bounds = array<i64: 1, 32>}, {pipeline_mode = #tpu.pipeline_mode<synchronous>, transform_indices = @transform_5, window_bounds = array<i64: 32, 16>}, {transform_indices = @transform_6, window_bounds = array<i64: 2, 1024>}]} {
    %cst = arith.constant 0.000000e+00 : f32
    %0 = vector.broadcast %cst : f32 to vector<2x8xf32>
    %c0 = arith.constant 0 : index
    %c1 = arith.constant 1 : index
    %c1_0 = arith.constant 1 : index
    %c0_1 = arith.constant 0 : index
    %1 = vector.load %arg1[%c0, %c1, %c1_0, %c0_1] : memref<2x12x12x16xbf16, #tpu.memory_space<vmem>>, vector<2x8x8x16xbf16>
    %2 = vector.shape_cast %1 : vector<2x8x8x16xbf16> to vector<128x16xbf16>
    %c0_2 = arith.constant 0 : index
    %c0_3 = arith.constant 0 : index
    %3 = vector.load %arg9[%c0_2, %c0_3] : memref<128x144xbf16, #tpu.memory_space<vmem>>, vector<128x16xbf16>
    tpu.vector_store %arg9[%c0_2, %c0_3], %2 {strides = array<i32>} : memref<128x144xbf16, #tpu.memory_space<vmem>>, vector<128x16xbf16>,
    %c0_4 = arith.constant 0 : index
    %c1_5 = arith.constant 1 : index
    %c2 = arith.constant 2 : index
    %c0_6 = arith.constant 0 : index
    %4 = vector.load %arg1[%c0_4, %c1_5, %c2, %c0_6] : memref<2x12x12x16xbf16, #tpu.memory_space<vmem>>, vector<2x8x8x16xbf16>
    %5 = vector.shape_cast %4 : vector<2x8x8x16xbf16> to vector<128x16xbf16>
    %c0_7 = arith.constant 0 : index
    %c16 = arith.constant 16 : index
    %6 = vector.load %arg9[%c0_7, %c16] : memref<128x144xbf16, #tpu.memory_space<vmem>>, vector<128x16xbf16>
    tpu.vector_store %arg9[%c0_7, %c16], %5 {strides = array<i32>} : memref<128x144xbf16, #tpu.memory_space<vmem>>, vector<128x16xbf16>,
    %c0_8 = arith.constant 0 : index
    %c1_9 = arith.constant 1 : index
    %c3 = arith.constant 3 : index
    %c0_10 = arith.constant 0 : index
    %7 = vector.load %arg1[%c0_8, %c1_9, %c3, %c0_10] : memref<2x12x12x16xbf16, #tpu.memory_space<vmem>>, vector<2x8x8x16xbf16>
    %8 = vector.shape_cast %7 : vector<2x8x8x16xbf16> to vector<128x16xbf16>
    %c0_11 = arith.constant 0 : index
    %c32 = arith.constant 32 : index
    %9 = vector.load %arg9[%c0_11, %c32] : memref<128x144xbf16, #tpu.memory_space<vmem>>, vector<128x16xbf16>
    tpu.vector_store %arg9[%c0_11, %c32], %8 {strides = array<i32>} : memref<128x144xbf16, #tpu.memory_space<vmem>>, vector<128x16xbf16>,
    %c0_12 = arith.constant 0 : index
    %c2_13 = arith.constant 2 : index
    %c1_14 = arith.constant 1 : index
    %c0_15 = arith.constant 0 : index
    %10 = vector.load %arg1[%c0_12, %c2_13, %c1_14, %c0_15] : memref<2x12x12x16xbf16, #tpu.memory_space<vmem>>, vector<2x8x8x16xbf16>
    %11 = vector.shape_cast %10 : vector<2x8x8x16xbf16> to vector<128x16xbf16>
    %c0_16 = arith.constant 0 : index
    %c48 = arith.constant 48 : index
    %12 = vector.load %arg9[%c0_16, %c48] : memref<128x144xbf16, #tpu.memory_space<vmem>>, vector<128x16xbf16>
    tpu.vector_store %arg9[%c0_16, %c48], %11 {strides = array<i32>} : memref<128x144xbf16, #tpu.memory_space<vmem>>, vector<128x16xbf16>,
    %c0_17 = arith.constant 0 : index
    %c2_18 = arith.constant 2 : index
    %c2_19 = arith.constant 2 : index
    %c0_20 = arith.constant 0 : index
    %13 = vector.load %arg1[%c0_17, %c2_18, %c2_19, %c0_20] : memref<2x12x12x16xbf16, #tpu.memory_space<vmem>>, vector<2x8x8x16xbf16>
    %14 = vector.shape_cast %13 : vector<2x8x8x16xbf16> to vector<128x16xbf16>
    %c0_21 = arith.constant 0 : index
    %c64 = arith.constant 64 : index
    %15 = vector.load %arg9[%c0_21, %c64] : memref<128x144xbf16, #tpu.memory_space<vmem>>, vector<128x16xbf16>
    tpu.vector_store %arg9[%c0_21, %c64], %14 {strides = array<i32>} : memref<128x144xbf16, #tpu.memory_space<vmem>>, vector<128x16xbf16>,
    %c0_22 = arith.constant 0 : index
    %c2_23 = arith.constant 2 : index
    %c3_24 = arith.constant 3 : index
    %c0_25 = arith.constant 0 : index
    %16 = vector.load %arg1[%c0_22, %c2_23, %c3_24, %c0_25] : memref<2x12x12x16xbf16, #tpu.memory_space<vmem>>, vector<2x8x8x16xbf16>
    %17 = vector.shape_cast %16 : vector<2x8x8x16xbf16> to vector<128x16xbf16>
    %c0_26 = arith.constant 0 : index
    %c80 = arith.constant 80 : index
    %18 = vector.load %arg9[%c0_26, %c80] : memref<128x144xbf16, #tpu.memory_space<vmem>>, vector<128x16xbf16>
    tpu.vector_store %arg9[%c0_26, %c80], %17 {strides = array<i32>} : memref<128x144xbf16, #tpu.memory_space<vmem>>, vector<128x16xbf16>,
    %c0_27 = arith.constant 0 : index
    %c3_28 = arith.constant 3 : index
    %c1_29 = arith.constant 1 : index
    %c0_30 = arith.constant 0 : index
    %19 = vector.load %arg1[%c0_27, %c3_28, %c1_29, %c0_30] : memref<2x12x12x16xbf16, #tpu.memory_space<vmem>>, vector<2x8x8x16xbf16>
    %20 = vector.shape_cast %19 : vector<2x8x8x16xbf16> to vector<128x16xbf16>
    %c0_31 = arith.constant 0 : index
    %c96 = arith.constant 96 : index
    %21 = vector.load %arg9[%c0_31, %c96] : memref<128x144xbf16, #tpu.memory_space<vmem>>, vector<128x16xbf16>
    tpu.vector_store %arg9[%c0_31, %c96], %20 {strides = array<i32>} : memref<128x144xbf16, #tpu.memory_space<vmem>>, vector<128x16xbf16>,
    %c0_32 = arith.constant 0 : index
    %c3_33 = arith.constant 3 : index
    %c2_34 = arith.constant 2 : index
    %c0_35 = arith.constant 0 : index
    %22 = vector.load %arg1[%c0_32, %c3_33, %c2_34, %c0_35] : memref<2x12x12x16xbf16, #tpu.memory_space<vmem>>, vector<2x8x8x16xbf16>
    %23 = vector.shape_cast %22 : vector<2x8x8x16xbf16> to vector<128x16xbf16>
    %c0_36 = arith.constant 0 : index
    %c112 = arith.constant 112 : index
    %24 = vector.load %arg9[%c0_36, %c112] : memref<128x144xbf16, #tpu.memory_space<vmem>>, vector<128x16xbf16>
    tpu.vector_store %arg9[%c0_36, %c112], %23 {strides = array<i32>} : memref<128x144xbf16, #tpu.memory_space<vmem>>, vector<128x16xbf16>,
    %c0_37 = arith.constant 0 : index
    %c3_38 = arith.constant 3 : index
    %c3_39 = arith.constant 3 : index
    %c0_40 = arith.constant 0 : index
    %25 = vector.load %arg1[%c0_37, %c3_38, %c3_39, %c0_40] : memref<2x12x12x16xbf16, #tpu.memory_space<vmem>>, vector<2x8x8x16xbf16>
    %26 = vector.shape_cast %25 : vector<2x8x8x16xbf16> to vector<128x16xbf16>
    %c0_41 = arith.constant 0 : index
    %c128 = arith.constant 128 : index
    %27 = vector.load %arg9[%c0_41, %c128] : memref<128x144xbf16, #tpu.memory_space<vmem>>, vector<128x16xbf16>
    tpu.vector_store %arg9[%c0_41, %c128], %26 {strides = array<i32>} : memref<128x144xbf16, #tpu.memory_space<vmem>>, vector<128x16xbf16>,
    %c0_42 = arith.constant 0 : index
    %c0_43 = arith.constant 0 : index
    %28 = vector.load %arg9[%c0_42, %c0_43] : memref<128x144xbf16, #tpu.memory_space<vmem>>, vector<128x144xbf16>
    %c0_44 = arith.constant 0 : index
    %c0_45 = arith.constant 0 : index
    %c0_46 = arith.constant 0 : index
    %29 = vector.load %arg2[%c0_44, %c0_45, %c0_46] : memref<2x144x8xbf16, #tpu.memory_space<vmem>>, vector<1x144x8xbf16>
    %30 = vector.shape_cast %29 : vector<1x144x8xbf16> to vector<144x8xbf16>
    %cst_47 = arith.constant dense<0.000000e+00> : vector<128x8xf32>
    %31 = tpu.matmul %28, %30, %cst_47 {dimension_numbers = #tpu.dot_dimension_numbers<[1], [0], [0], [1], [0, 0, 1, 1], [], []>} : vector<128x144xbf16>, vector<144x8xbf16>, vector<128x8xf32> -> vector<128x8xf32>
    %c0_48 = arith.constant 0 : index
    %c0_49 = arith.constant 0 : index
    %c0_50 = arith.constant 0 : index
    %32 = vector.load %arg3[%c0_48, %c0_49, %c0_50] : memref<2x1x8xf32, #tpu.memory_space<vmem>>, vector<1x1x8xf32>
    %33 = vector.shape_cast %32 : vector<1x1x8xf32> to vector<1x8xf32>
    %34 = vector.broadcast %33 : vector<1x8xf32> to vector<128x8xf32>
    %35 = arith.addf %31, %34 : vector<128x8xf32>
    %cst_51 = arith.constant 0.000000e+00 : f32
    %36 = vector.broadcast %cst_51 : f32 to vector<128x8xf32>
    %37 = arith.maximumf %35, %36 : vector<128x8xf32>
    %38 = vector.shape_cast %37 : vector<128x8xf32> to vector<2x64x8xf32>
    %c0_52 = arith.constant 0 : index
    %c0_53 = arith.constant 0 : index
    %c0_54 = arith.constant 0 : index
    %c0_55 = arith.constant 0 : index
    %39 = vector.load %arg8[%c0_52, %c0_53, %c0_54, %c0_55] : memref<2x2x64x8xf32, #tpu.memory_space<vmem>>, vector<1x2x64x8xf32>
    %40 = vector.shape_cast %39 : vector<1x2x64x8xf32> to vector<2x64x8xf32>
    %41 = vector.shape_cast %38 : vector<2x64x8xf32> to vector<1x2x64x8xf32>
    tpu.vector_store %arg8[%c0_52, %c0_53, %c0_54, %c0_55], %41 {strides = array<i32>} : memref<2x2x64x8xf32, #tpu.memory_space<vmem>>, vector<1x2x64x8xf32>,
    %cst_56 = arith.constant dense<0.000000e+00> : vector<2x8xf32>
    %42 = vector.multi_reduction <add>, %38, %cst_56 [1] : vector<2x64x8xf32> to vector<2x8xf32>
    %43 = arith.addf %0, %42 : vector<2x8xf32>
    %c0_57 = arith.constant 0 : index
    %c0_58 = arith.constant 0 : index
    %c0_59 = arith.constant 0 : index
    %c0_60 = arith.constant 0 : index
    %44 = vector.load %arg1[%c0_57, %c0_58, %c0_59, %c0_60] : memref<2x12x12x16xbf16, #tpu.memory_space<vmem>>, vector<2x8x8x16xbf16>
    %45 = vector.shape_cast %44 : vector<2x8x8x16xbf16> to vector<128x16xbf16>
    %c0_61 = arith.constant 0 : index
    %c0_62 = arith.constant 0 : index
    %46 = vector.load %arg9[%c0_61, %c0_62] : memref<128x144xbf16, #tpu.memory_space<vmem>>, vector<128x16xbf16>
    tpu.vector_store %arg9[%c0_61, %c0_62], %45 {strides = array<i32>} : memref<128x144xbf16, #tpu.memory_space<vmem>>, vector<128x16xbf16>,
    %c0_63 = arith.constant 0 : index
    %c0_64 = arith.constant 0 : index
    %c2_65 = arith.constant 2 : index
    %c0_66 = arith.constant 0 : index
    %47 = vector.load %arg1[%c0_63, %c0_64, %c2_65, %c0_66] : memref<2x12x12x16xbf16, #tpu.memory_space<vmem>>, vector<2x8x8x16xbf16>
    %48 = vector.shape_cast %47 : vector<2x8x8x16xbf16> to vector<128x16xbf16>
    %c0_67 = arith.constant 0 : index
    %c16_68 = arith.constant 16 : index
    %49 = vector.load %arg9[%c0_67, %c16_68] : memref<128x144xbf16, #tpu.memory_space<vmem>>, vector<128x16xbf16>
    tpu.vector_store %arg9[%c0_67, %c16_68], %48 {strides = array<i32>} : memref<128x144xbf16, #tpu.memory_space<vmem>>, vector<128x16xbf16>,
    %c0_69 = arith.constant 0 : index
    %c0_70 = arith.constant 0 : index
    %c4 = arith.constant 4 : index
    %c0_71 = arith.constant 0 : index
    %50 = vector.load %arg1[%c0_69, %c0_70, %c4, %c0_71] : memref<2x12x12x16xbf16, #tpu.memory_space<vmem>>, vector<2x8x8x16xbf16>
    %51 = vector.shape_cast %50 : vector<2x8x8x16xbf16> to vector<128x16xbf16>
    %c0_72 = arith.constant 0 : index
    %c32_73 = arith.constant 32 : index
    %52 = vector.load %arg9[%c0_72, %c32_73] : memref<128x144xbf16, #tpu.memory_space<vmem>>, vector<128x16xbf16>
    tpu.vector_store %arg9[%c0_72, %c32_73], %51 {strides = array<i32>} : memref<128x144xbf16, #tpu.memory_space<vmem>>, vector<128x16xbf16>,
    %c0_74 = arith.constant 0 : index
    %c2_75 = arith.constant 2 : index
    %c0_76 = arith.constant 0 : index
    %c0_77 = arith.constant 0 : index
    %53 = vector.load %arg1[%c0_74, %c2_75, %c0_76, %c0_77] : memref<2x12x12x16xbf16, #tpu.memory_space<vmem>>, vector<2x8x8x16xbf16>
    %54 = vector.shape_cast %53 : vector<2x8x8x16xbf16> to vector<128x16xbf16>
    %c0_78 = arith.constant 0 : index
    %c48_79 = arith.constant 48 : index
    %55 = vector.load %arg9[%c0_78, %c48_79] : memref<128x144xbf16, #tpu.memory_space<vmem>>, vector<128x16xbf16>
    tpu.vector_store %arg9[%c0_78, %c48_79], %54 {strides = array<i32>} : memref<128x144xbf16, #tpu.memory_space<vmem>>, vector<128x16xbf16>,
    %c0_80 = arith.constant 0 : index
    %c2_81 = arith.constant 2 : index
    %c2_82 = arith.constant 2 : index
    %c0_83 = arith.constant 0 : index
    %56 = vector.load %arg1[%c0_80, %c2_81, %c2_82, %c0_83] : memref<2x12x12x16xbf16, #tpu.memory_space<vmem>>, vector<2x8x8x16xbf16>
    %57 = vector.shape_cast %56 : vector<2x8x8x16xbf16> to vector<128x16xbf16>
    %c0_84 = arith.constant 0 : index
    %c64_85 = arith.constant 64 : index
    %58 = vector.load %arg9[%c0_84, %c64_85] : memref<128x144xbf16, #tpu.memory_space<vmem>>, vector<128x16xbf16>
    tpu.vector_store %arg9[%c0_84, %c64_85], %57 {strides = array<i32>} : memref<128x144xbf16, #tpu.memory_space<vmem>>, vector<128x16xbf16>,
    %c0_86 = arith.constant 0 : index
    %c2_87 = arith.constant 2 : index
    %c4_88 = arith.constant 4 : index
    %c0_89 = arith.constant 0 : index
    %59 = vector.load %arg1[%c0_86, %c2_87, %c4_88, %c0_89] : memref<2x12x12x16xbf16, #tpu.memory_space<vmem>>, vector<2x8x8x16xbf16>
    %60 = vector.shape_cast %59 : vector<2x8x8x16xbf16> to vector<128x16xbf16>
    %c0_90 = arith.constant 0 : index
    %c80_91 = arith.constant 80 : index
    %61 = vector.load %arg9[%c0_90, %c80_91] : memref<128x144xbf16, #tpu.memory_space<vmem>>, vector<128x16xbf16>
    tpu.vector_store %arg9[%c0_90, %c80_91], %60 {strides = array<i32>} : memref<128x144xbf16, #tpu.memory_space<vmem>>, vector<128x16xbf16>,
    %c0_92 = arith.constant 0 : index
    %c4_93 = arith.constant 4 : index
    %c0_94 = arith.constant 0 : index
    %c0_95 = arith.constant 0 : index
    %62 = vector.load %arg1[%c0_92, %c4_93, %c0_94, %c0_95] : memref<2x12x12x16xbf16, #tpu.memory_space<vmem>>, vector<2x8x8x16xbf16>
    %63 = vector.shape_cast %62 : vector<2x8x8x16xbf16> to vector<128x16xbf16>
    %c0_96 = arith.constant 0 : index
    %c96_97 = arith.constant 96 : index
    %64 = vector.load %arg9[%c0_96, %c96_97] : memref<128x144xbf16, #tpu.memory_space<vmem>>, vector<128x16xbf16>
    tpu.vector_store %arg9[%c0_96, %c96_97], %63 {strides = array<i32>} : memref<128x144xbf16, #tpu.memory_space<vmem>>, vector<128x16xbf16>,
    %c0_98 = arith.constant 0 : index
    %c4_99 = arith.constant 4 : index
    %c2_100 = arith.constant 2 : index
    %c0_101 = arith.constant 0 : index
    %65 = vector.load %arg1[%c0_98, %c4_99, %c2_100, %c0_101] : memref<2x12x12x16xbf16, #tpu.memory_space<vmem>>, vector<2x8x8x16xbf16>
    %66 = vector.shape_cast %65 : vector<2x8x8x16xbf16> to vector<128x16xbf16>
    %c0_102 = arith.constant 0 : index
    %c112_103 = arith.constant 112 : index
    %67 = vector.load %arg9[%c0_102, %c112_103] : memref<128x144xbf16, #tpu.memory_space<vmem>>, vector<128x16xbf16>
    tpu.vector_store %arg9[%c0_102, %c112_103], %66 {strides = array<i32>} : memref<128x144xbf16, #tpu.memory_space<vmem>>, vector<128x16xbf16>,
    %c0_104 = arith.constant 0 : index
    %c4_105 = arith.constant 4 : index
    %c4_106 = arith.constant 4 : index
    %c0_107 = arith.constant 0 : index
    %68 = vector.load %arg1[%c0_104, %c4_105, %c4_106, %c0_107] : memref<2x12x12x16xbf16, #tpu.memory_space<vmem>>, vector<2x8x8x16xbf16>
    %69 = vector.shape_cast %68 : vector<2x8x8x16xbf16> to vector<128x16xbf16>
    %c0_108 = arith.constant 0 : index
    %c128_109 = arith.constant 128 : index
    %70 = vector.load %arg9[%c0_108, %c128_109] : memref<128x144xbf16, #tpu.memory_space<vmem>>, vector<128x16xbf16>
    tpu.vector_store %arg9[%c0_108, %c128_109], %69 {strides = array<i32>} : memref<128x144xbf16, #tpu.memory_space<vmem>>, vector<128x16xbf16>,
    %c0_110 = arith.constant 0 : index
    %c0_111 = arith.constant 0 : index
    %71 = vector.load %arg9[%c0_110, %c0_111] : memref<128x144xbf16, #tpu.memory_space<vmem>>, vector<128x144xbf16>
    %c1_112 = arith.constant 1 : index
    %c0_113 = arith.constant 0 : index
    %c0_114 = arith.constant 0 : index
    %72 = vector.load %arg2[%c1_112, %c0_113, %c0_114] : memref<2x144x8xbf16, #tpu.memory_space<vmem>>, vector<1x144x8xbf16>
    %73 = vector.shape_cast %72 : vector<1x144x8xbf16> to vector<144x8xbf16>
    %cst_115 = arith.constant dense<0.000000e+00> : vector<128x8xf32>
    %74 = tpu.matmul %71, %73, %cst_115 {dimension_numbers = #tpu.dot_dimension_numbers<[1], [0], [0], [1], [0, 0, 1, 1], [], []>} : vector<128x144xbf16>, vector<144x8xbf16>, vector<128x8xf32> -> vector<128x8xf32>
    %c1_116 = arith.constant 1 : index
    %c0_117 = arith.constant 0 : index
    %c0_118 = arith.constant 0 : index
    %75 = vector.load %arg3[%c1_116, %c0_117, %c0_118] : memref<2x1x8xf32, #tpu.memory_space<vmem>>, vector<1x1x8xf32>
    %76 = vector.shape_cast %75 : vector<1x1x8xf32> to vector<1x8xf32>
    %77 = vector.broadcast %76 : vector<1x8xf32> to vector<128x8xf32>
    %78 = arith.addf %74, %77 : vector<128x8xf32>
    %cst_119 = arith.constant 0.000000e+00 : f32
    %79 = vector.broadcast %cst_119 : f32 to vector<128x8xf32>
    %80 = arith.maximumf %78, %79 : vector<128x8xf32>
    %81 = vector.shape_cast %80 : vector<128x8xf32> to vector<2x64x8xf32>
    %c1_120 = arith.constant 1 : index
    %c0_121 = arith.constant 0 : index
    %c0_122 = arith.constant 0 : index
    %c0_123 = arith.constant 0 : index
    %82 = vector.load %arg8[%c1_120, %c0_121, %c0_122, %c0_123] : memref<2x2x64x8xf32, #tpu.memory_space<vmem>>, vector<1x2x64x8xf32>
    %83 = vector.shape_cast %82 : vector<1x2x64x8xf32> to vector<2x64x8xf32>
    %84 = vector.shape_cast %81 : vector<2x64x8xf32> to vector<1x2x64x8xf32>
    tpu.vector_store %arg8[%c1_120, %c0_121, %c0_122, %c0_123], %84 {strides = array<i32>} : memref<2x2x64x8xf32, #tpu.memory_space<vmem>>, vector<1x2x64x8xf32>,
    %cst_124 = arith.constant dense<0.000000e+00> : vector<2x8xf32>
    %85 = vector.multi_reduction <add>, %81, %cst_124 [1] : vector<2x64x8xf32> to vector<2x8xf32>
    %86 = arith.addf %43, %85 : vector<2x8xf32>
    %cst_125 = arith.constant 1.562500e-02 : f32
    %87 = vector.broadcast %cst_125 : f32 to vector<2x8xf32>
    %88 = arith.mulf %86, %87 : vector<2x8xf32>
    %c0_126 = arith.constant 0 : index
    %c0_127 = arith.constant 0 : index
    %89 = vector.load %arg4[%c0_126, %c0_127] : memref<8x32xf32, #tpu.memory_space<vmem>>, vector<8x32xf32>
    %cst_128 = arith.constant dense<0.000000e+00> : vector<2x32xf32>
    %90 = tpu.matmul %88, %89, %cst_128 {dimension_numbers = #tpu.dot_dimension_numbers<[1], [0], [0], [1], [0, 0, 1, 1], [], []>} : vector<2x8xf32>, vector<8x32xf32>, vector<2x32xf32> -> vector<2x32xf32>
    %c0_129 = arith.constant 0 : index
    %c0_130 = arith.constant 0 : index
    %91 = vector.load %arg5[%c0_129, %c0_130] : memref<1x32xf32, #tpu.memory_space<vmem>>, vector<1x32xf32>
    %92 = vector.broadcast %91 : vector<1x32xf32> to vector<2x32xf32>
    %93 = arith.addf %90, %92 : vector<2x32xf32>
    %cst_131 = arith.constant 0.000000e+00 : f32
    %94 = vector.broadcast %cst_131 : f32 to vector<2x32xf32>
    %95 = arith.maximumf %93, %94 : vector<2x32xf32>
    %c0_132 = arith.constant 0 : index
    %c0_133 = arith.constant 0 : index
    %96 = vector.load %arg6[%c0_132, %c0_133] : memref<32x16xf32, #tpu.memory_space<vmem>>, vector<32x16xf32>
    %cst_134 = arith.constant dense<0.000000e+00> : vector<2x16xf32>
    %97 = tpu.matmul %95, %96, %cst_134 {dimension_numbers = #tpu.dot_dimension_numbers<[1], [0], [0], [1], [0, 0, 1, 1], [], []>} : vector<2x32xf32>, vector<32x16xf32>, vector<2x16xf32> -> vector<2x16xf32>
    %98 = vector.extract_strided_slice %97 {offsets = [0, 0], sizes = [2, 8], strides = [1, 1]} : vector<2x16xf32> to vector<2x8xf32>
    %99 = vector.extract_strided_slice %97 {offsets = [0, 8], sizes = [2, 8], strides = [1, 1]} : vector<2x16xf32> to vector<2x8xf32>
    %100 = arith.maximumf %98, %99 : vector<2x8xf32>
    %101 = arith.subf %98, %100 : vector<2x8xf32>
    %102 = math.exp %101 : vector<2x8xf32>
    %103 = arith.subf %99, %100 : vector<2x8xf32>
    %104 = math.exp %103 : vector<2x8xf32>
    %105 = arith.addf %102, %104 : vector<2x8xf32>
    %106 = tpu.reciprocal %105 {approx = true} : vector<2x8xf32> -> vector<2x8xf32>
    %107 = arith.mulf %102, %106 : vector<2x8xf32>
    %c0_135 = arith.constant 0 : index
    %c0_136 = arith.constant 0 : index
    %c0_137 = arith.constant 0 : index
    %c0_138 = arith.constant 0 : index
    %108 = vector.load %arg8[%c0_135, %c0_136, %c0_137, %c0_138] : memref<2x2x64x8xf32, #tpu.memory_space<vmem>>, vector<1x2x64x8xf32>
    %109 = vector.shape_cast %108 : vector<1x2x64x8xf32> to vector<2x64x8xf32>
    %110 = vector.shape_cast %107 : vector<2x8xf32> to vector<2x1x8xf32>
    %111 = vector.broadcast %110 : vector<2x1x8xf32> to vector<2x64x8xf32>
    %112 = arith.mulf %109, %111 : vector<2x64x8xf32>
    %113 = vector.shape_cast %112 : vector<2x64x8xf32> to vector<2x512xf32>
    %c0_139 = arith.constant 0 : index
    %c0_140 = arith.constant 0 : index
    %114 = vector.load %arg7[%c0_139, %c0_140] : memref<2x1024xf32, #tpu.memory_space<vmem>>, vector<2x512xf32>
    tpu.vector_store %arg7[%c0_139, %c0_140], %113 {strides = array<i32>} : memref<2x1024xf32, #tpu.memory_space<vmem>>, vector<2x512xf32>,
    %115 = arith.mulf %104, %106 : vector<2x8xf32>
    %c1_141 = arith.constant 1 : index
    %c0_142 = arith.constant 0 : index
    %c0_143 = arith.constant 0 : index
    %c0_144 = arith.constant 0 : index
    %116 = vector.load %arg8[%c1_141, %c0_142, %c0_143, %c0_144] : memref<2x2x64x8xf32, #tpu.memory_space<vmem>>, vector<1x2x64x8xf32>
    %117 = vector.shape_cast %116 : vector<1x2x64x8xf32> to vector<2x64x8xf32>
    %118 = vector.shape_cast %115 : vector<2x8xf32> to vector<2x1x8xf32>
    %119 = vector.broadcast %118 : vector<2x1x8xf32> to vector<2x64x8xf32>
    %120 = arith.mulf %117, %119 : vector<2x64x8xf32>
    %121 = vector.shape_cast %120 : vector<2x64x8xf32> to vector<2x512xf32>
    %c0_145 = arith.constant 0 : index
    %c512 = arith.constant 512 : index
    %122 = vector.load %arg7[%c0_145, %c512] : memref<2x1024xf32, #tpu.memory_space<vmem>>, vector<2x512xf32>
    tpu.vector_store %arg7[%c0_145, %c512], %121 {strides = array<i32>} : memref<2x1024xf32, #tpu.memory_space<vmem>>, vector<2x512xf32>,
    return
  }
  func.func @transform_0(%arg0: i32) -> (i32, i32, i32, i32) {
    %c0_i32 = arith.constant 0 : i32
    %c0_i32_0 = arith.constant 0 : i32
    %c0_i32_1 = arith.constant 0 : i32
    %c0_i32_2 = arith.constant 0 : i32
    return %arg0, %c0_i32, %c0_i32_0, %c0_i32_1 : i32, i32, i32, i32
  }
  func.func @transform_1(%arg0: i32) -> (i32, i32, i32) {
    %c0_i32 = arith.constant 0 : i32
    %c0_i32_0 = arith.constant 0 : i32
    %c0_i32_1 = arith.constant 0 : i32
    %c0_i32_2 = arith.constant 0 : i32
    return %c0_i32, %c0_i32_0, %c0_i32_1 : i32, i32, i32
  }
  func.func @transform_2(%arg0: i32) -> (i32, i32, i32) {
    %c0_i32 = arith.constant 0 : i32
    %c0_i32_0 = arith.constant 0 : i32
    %c0_i32_1 = arith.constant 0 : i32
    %c0_i32_2 = arith.constant 0 : i32
    return %c0_i32, %c0_i32_0, %c0_i32_1 : i32, i32, i32
  }
  func.func @transform_3(%arg0: i32) -> (i32, i32) {
    %c0_i32 = arith.constant 0 : i32
    %c0_i32_0 = arith.constant 0 : i32
    %c0_i32_1 = arith.constant 0 : i32
    return %c0_i32, %c0_i32_0 : i32, i32
  }
  func.func @transform_4(%arg0: i32) -> (i32, i32) {
    %c0_i32 = arith.constant 0 : i32
    %c0_i32_0 = arith.constant 0 : i32
    %c0_i32_1 = arith.constant 0 : i32
    return %c0_i32, %c0_i32_0 : i32, i32
  }
  func.func @transform_5(%arg0: i32) -> (i32, i32) {
    %c0_i32 = arith.constant 0 : i32
    %c0_i32_0 = arith.constant 0 : i32
    %c0_i32_1 = arith.constant 0 : i32
    return %c0_i32, %c0_i32_0 : i32, i32
  }
  func.func @transform_6(%arg0: i32) -> (i32, i32) {
    %c0_i32 = arith.constant 0 : i32
    %c0_i32_0 = arith.constant 0 : i32
    return %arg0, %c0_i32 : i32, i32
  }
}

</mosaic_0001>

<bundles_post_ra>
// kernel: tpu_custom_call.1
= control target key start
LH: loop header
LB: loop body
LE: loop exit
PB: predicated region body
PF: predicated region fallthrough
CT: control target
= control target key end

     0   :  { %vm390_vm0 = vcmask 1042432   ;;  %vm391_vm1 = vcmask 1046532   ;;  %s7529_s23 = smov 64   ;;  %s7530_s12 = smov 16   ;;  %vm546_vm3 = vsmask.f32 2304  ;;  %s11346_s0 = inlined_call_operand.vmem [shape: bf16[2,12,12,16], index: 0, kind: input, shape index: {}]   ;;  %s11347_s1 = inlined_call_operand.vmem [shape: bf16[2,144,8], index: 1, kind: input, shape index: {}]   ;;  %s11348_s2 = inlined_call_operand.vmem [shape: f32[2,1,8], index: 2, kind: input, shape index: {}]   ;;  %s11349_s3 = inlined_call_operand.vmem [shape: f32[8,32], index: 3, kind: input, shape index: {}]   ;;  %s11350_s4 = inlined_call_operand.vmem [shape: f32[1,32], index: 4, kind: input, shape index: {}]   ;;  %s11351_s5 = inlined_call_operand.vmem [shape: f32[32,16], index: 5, kind: input, shape index: {}]   ;;  %s11352_s6 = inlined_call_operand.hbm [shape: f32[2,1024], index: 6, kind: output, shape index: {}]  }
   0x1   :  { %v6787_v0 = vld [vmem:[%s11346_s0 + $0x10] sm:$0xe]  ;;  %v6788_v1 = vld [vmem:[%s11346_s0 + $0x14] sm:$0x1]  ;;  %vm7593_vm2 = vmor %vm390_vm0, %vm391_vm1  ;;  %vm547_vm4 = vsmask.f32 6416 }
   0x2   :  { %v6789_v3 = vld [vmem:[%s11346_s0 + $0x18] sm:$0xe]  ;;  %v6790_v4 = vld [vmem:[%s11346_s0 + $0x1c] sm:$0x1]  ;;  %v6819_v5 = vrot.slane %v6787_v0, 9  ;;  %v1274_v6 = vrot.slane %v6788_v1, 5  ;;  %vm7682_vm7 = vmor %vm546_vm3, %vm547_vm4 }
   0x3   :  { %v6820_v7 = vrot.slane %v6789_v3, 9  ;;  %v1278_v8 = vrot.slane %v6790_v4, 5  ;;  %v6651_v9 = vld [vmem:[%s11346_s0 + $0x8] sm:$0xe]  ;;  %v6652_v11 = vld [vmem:[%s11346_s0 + $0xc] sm:$0x1] }
   0x4   :  { %v1275_v10 = vsel %vm7593_vm2, %v6819_v5, %v1274_v6  ;;  %v6653_v12 = vld [vmem:[%s11346_s0 + $0x10] sm:$0xe]  ;;  %v6654_v13 = vld [vmem:[%s11346_s0 + $0x14] sm:$0x1]  ;;  %v6683_v15 = vrot.slane %v6651_v9, 9  ;;  %v395_v16 = vrot.slane %v6652_v11, 5 }
   0x5   :  { %v1279_v14 = vsel %vm7593_vm2, %v6820_v7, %v1278_v8  ;;  %v6684_v17 = vrot.slane %v6653_v12, 9  ;;  %v6655_v18 = vld [vmem:[%s11346_s0 + $0x18] sm:$0xe]  ;;  %v399_v20 = vrot.slane %v6654_v13, 5  ;;  %v6656_v21 = vld [vmem:[%s11346_s0 + $0x1c] sm:$0x1] }
   0x6   :  { %v6835_v19 = vcombine.low %v1275_v10, %v1279_v14  ;;  %v6657_v22 = vld [vmem:[%s11346_s0 + $0x20] sm:$0xe]  ;;  %v6685_v23 = vrot.slane %v6655_v18, 9  ;;  %v396_v24 = vsel %vm7593_vm2, %v6683_v15, %v395_v16  ;;  %v6658_v25 = vld [vmem:[%s11346_s0 + $0x24] sm:$0x1]  ;;  %v403_v26 = vrot.slane %v6656_v21, 5 }
   0x7   :  { %v6686_v27 = vrot.slane %v6657_v22, 9  ;;  %v6923_v28 = vld [vmem:[%s11346_s0 + $0x18] sm:$0xe]  ;;  %v400_v29 = vsel %vm7593_vm2, %v6684_v17, %v399_v20  ;;  %v407_v30 = vrot.slane %v6658_v25, 5  ;;  %v6924_v31 = vld [vmem:[%s11346_s0 + $0x1c] sm:$0x1] }
   0x8   :  { %1360 = vrot.lane.b32.xlu1 %v6835_v19, %s7529_s23  ;;  %v6925_v32 = vld [vmem:[%s11346_s0 + $0x20] sm:$0xe]  ;;  %v6955_v33 = vrot.slane %v6923_v28, 9  ;;  %v6699_v34 = vcombine.low %v396_v24, %v400_v29  ;;  %v404_v35 = vsel %vm7593_vm2, %v6685_v23, %v403_v26  ;;  %v6926_v36 = vld [vmem:[%s11346_s0 + $0x24] sm:$0x1]  ;;  %v2150_v37 = vrot.slane %v6924_v31, 5 }
   0x9   :  { %v6956_v38 = vrot.slane %v6925_v32, 9  ;;  %v6707_v39 = vld [vmem:[%s11346_s0 + $0x8] sm:$0xe]  ;;  %v408_v40 = vsel %vm7593_vm2, %v6686_v27, %v407_v30  ;;  %v2154_v41 = vrot.slane %v6926_v36, 5  ;;  %v6708_v42 = vld [vmem:[%s11346_s0 + $0xc] sm:$0x3] }
   0xa   :  { %v6709_v43 = vld [vmem:[%s11346_s0 + $0x10] sm:$0xe]  ;;  %v550_v44 = vshrl.u32 %v6707_v39, 16  ;;  %481 = vrot.lane.b32.xlu0 %v6699_v34, %s7530_s12  ;;  %v6700_v45 = vcombine.low %v404_v35, %v408_v40  ;;  %v2151_v46 = vsel %vm7593_vm2, %v6955_v33, %v2150_v37  ;;  %v6710_v47 = vld [vmem:[%s11346_s0 + $0x14] sm:$0x3]  ;;  %v553_v50 = vshll.u32 %v6707_v39, 16 }
   0xb   :  { %v2155_v48 = vsel %vm7593_vm2, %v6956_v38, %v2154_v41  ;;  %v559_v51 = vshrl.u32 %v6708_v42, 16  ;;  %v6747_v52 = vld [vmem:[%s11346_s0 + $0x10] sm:$0xf]  ;;  %v562_v54 = vshll.u32 %v6708_v42, 16  ;;  %v568_v55 = vshrl.u32 %v6709_v43, 16  ;;  %s7531_s21 = smov 112  }
   0xc   :  { %v552_v49 = vrot.slane %v550_v44, 5  ;;  %483 = vrot.lane.b32.xlu1 %v6700_v45, %s7530_s12  ;;  %v6971_v53 = vcombine.low %v2151_v46, %v2155_v48  ;;  %v571_v56 = vshll.u32 %v6709_v43, 16  ;;  %v6748_v57 = vld [vmem:[%s11346_s0 + $0x14] sm:$0x1]  ;;  %v555_v58 = vrot.slane %v553_v50, 6  ;;  %s7532_s9 = smov 32  }
   0xd   :  { %v561_v59 = vrot.slane %v559_v51, 5  ;;  %v577_v60 = vshrl.u32 %v6710_v47, 16  ;;  %v580_v61 = vshll.u32 %v6710_v47, 16  ;;  %v6749_v62 = vld [vmem:[%s11346_s0 + $0x18] sm:$0xf]  ;;  %v564_v63 = vrot.slane %v562_v54, 6 }
   0xe   :  { %2236 = vrot.lane.b32.xlu0 %v6971_v53, %s7531_s21  ;;  %v570_v0 = vrot.slane %v568_v55, 5  ;;  %v573_v1 = vrot.slane %v571_v56, 6  ;;  %vm58_vm5 = vsmask.f32 3328  ;;  %v556_v3 = vor.u32 %v555_v58, %v552_v49  ;;  %v6750_v9 = vld [vmem:[%s11346_s0 + $0x1c] sm:$0x1] }
   0xf   :  { %v579_v4 = vrot.slane %v577_v60, 5  ;;  %v582_v5 = vrot.slane %v580_v61, 6  ;;  %vm59_vm6 = vsmask.f32 7440  ;;  %v565_v7 = vor.u32 %v564_v63, %v561_v59  ;;  %v6843_v16 = vld [vmem:[%s11346_s0 + $0x10] sm:$0xe] }
  0x10   :  { %v574_v8 = vor.u32 %v573_v1, %v570_v0  ;;  %v928_v10 = vshrl.u32 %v6747_v52, 16  ;;  %v931_v11 = vshll.u32 %v6747_v52, 16  ;;  %v557_v12 = vrot.slane %v556_v3, 4  ;;  %v6844_v21 = vld [vmem:[%s11346_s0 + $0x14] sm:$0x3]  ;;  %vm7704_vm8 = vmor %vm58_vm5, %vm59_vm6  ;;  %s7533_s22 = smov 48  }
  0x11   :  { %v583_v13 = vor.u32 %v582_v5, %v579_v4  ;;  %v937_v14 = vshll.u32 %v6748_v57, 16  ;;  %v942_v15 = vshrl.u32 %v6749_v62, 16  ;;  %v945_v20 = vshll.u32 %v6749_v62, 16  ;;  %v6845_v29 = vld [vmem:[%s11346_s0 + $0x18] sm:$0xe]  ;;  %s7534_s30 = smov 80  }
  0x12   :  { %v575_v17 = vrot.slane %v574_v8, 4  ;;  %v930_v18 = vrot.slane %v928_v10, 4  ;;  %v933_v19 = vrot.slane %v931_v11, 5  ;;  %v566_v22 = vsel %vm7682_vm7, %v557_v12, %v565_v7  ;;  %v6846_v34 = vld [vmem:[%s11346_s0 + $0x1c] sm:$0x3]  ;;  %s7535_s26 = smov 96  }
  0x13   :  { %v939_v23 = vrot.slane %v937_v14, 5  ;;  %v944_v24 = vrot.slane %v942_v15, 4  ;;  %v951_v25 = vshll.u32 %v6750_v9, 16  ;;  %v947_v28 = vrot.slane %v945_v20, 5  ;;  %v6883_v45 = vld [vmem:[%s11346_s0 + $0x18] sm:$0xf] }
  0x14   :  { %v584_v26 = vsel %vm7682_vm7, %v575_v17, %v583_v13  ;;  %v934_v27 = vor.u32 %v933_v19, %v930_v18  ;;  %v1426_v30 = vshrl.u32 %v6843_v16, 16  ;;  %v1429_v35 = vshll.u32 %v6843_v16, 16  ;;  %v6884_v50 = vld [vmem:[%s11346_s0 + $0x1c] sm:$0x1]  ;;  %v6885_v55 = vld [vmem:[%s11346_s0 + $0x20] sm:$0xf] }
  0x15   :  { %v6739_v31 = vcombine.low %v566_v22, %v584_v26  ;;  %v953_v33 = vrot.slane %v951_v25, 5  ;;  %v1435_v36 = vshrl.u32 %v6844_v21, 16  ;;  %v948_v38 = vor.u32 %v947_v28, %v944_v24  ;;  %v6886_v0 = vld [vmem:[%s11346_s0 + $0x24] sm:$0x1]  ;;  %v6711_v7 = vld [vmem:[%s11346_s0 + $0x18] sm:$0xe] }
  0x16   :  { %v935_v37 = vrot.slane %v934_v27, 4  ;;  %v1428_v39 = vrot.slane %v1426_v30, 5  ;;  %v1438_v40 = vshll.u32 %v6844_v21, 16  ;;  %v1431_v41 = vrot.slane %v1429_v35, 6  ;;  %v6712_v12 = vld [vmem:[%s11346_s0 + $0x1c] sm:$0x3] }
  0x17   :  { %861 = vrot.lane.b32.xlu0 %v6739_v31, %s7532_s9  ;;  %v1437_v42 = vrot.slane %v1435_v36, 5  ;;  %v1444_v43 = vshrl.u32 %v6845_v29, 16  ;;  %v1447_v44 = vshll.u32 %v6845_v29, 16  ;;  %v949_v47 = vrot.slane %v948_v38, 4  ;;  %v6713_v19 = vld [vmem:[%s11346_s0 + $0x20] sm:$0xe] }
  0x18   :  { %v940_v46 = vsel %vm7704_vm8, %v935_v37, %v939_v23  ;;  %v1440_v48 = vrot.slane %v1438_v40, 6  ;;  %v1453_v49 = vshrl.u32 %v6846_v34, 16  ;;  %v1432_v51 = vor.u32 %v1431_v41, %v1428_v39  ;;  %v6714_v25 = vld [vmem:[%s11346_s0 + $0x24] sm:$0x3]  ;;  %v6751_v36 = vld [vmem:[%s11346_s0 + $0x20] sm:$0xf] }
  0x19   :  { %v1446_v52 = vrot.slane %v1444_v43, 5  ;;  %v1449_v53 = vrot.slane %v1447_v44, 6  ;;  %v1456_v54 = vshll.u32 %v6846_v34, 16  ;;  %v954_v56 = vsel %vm7704_vm8, %v949_v47, %v953_v33  ;;  %v6752_v41 = vld [vmem:[%s11346_s0 + $0x24] sm:$0x1] }
  0x1a   :  { %v1441_v57 = vor.u32 %v1440_v48, %v1437_v42  ;;  %v1455_v58 = vrot.slane %v1453_v49, 5  ;;  %v1804_v59 = vshrl.u32 %v6883_v45, 16  ;;  %v6779_v60 = vcombine.low %v940_v46, %v954_v56  ;;  %v6753_v46 = vld [vmem:[%s11346_s0 + $0x28] sm:$0xf]  ;;  %v6791_v56 = vld [vmem:[%s11346_s0 + $0x20] sm:$0xe] }
  0x1b   :  { %v1433_v61 = vrot.slane %v1432_v51, 4  ;;  %v1450_v62 = vor.u32 %v1449_v53, %v1446_v52  ;;  %v1458_v63 = vrot.slane %v1456_v54, 6  ;;  %v1807_v3 = vshll.u32 %v6883_v45, 16  ;;  %v6754_v51 = vld [vmem:[%s11346_s0 + $0x2c] sm:$0x1] }
  0x1c   :  { %v1806_v1 = vrot.slane %v1804_v59, 4  ;;  %v1813_v4 = vshll.u32 %v6884_v50, 16  ;;  %v1818_v5 = vshrl.u32 %v6885_v55, 16  ;;  %1175 = vrot.lane.b32.xlu1 %v6779_v60, %s7533_s22  ;;  %v1821_v11 = vshll.u32 %v6885_v55, 16  ;;  %v6995_v2 = vld [vmem:[%s11346_s0 + $0x78] sm:$0xe] }
  0x1d   :  { %v1442_v8 = vsel %vm7682_vm7, %v1433_v61, %v1441_v57  ;;  %v1451_v9 = vrot.slane %v1450_v62, 4  ;;  %v1459_v10 = vor.u32 %v1458_v63, %v1455_v58  ;;  %v1809_v13 = vrot.slane %v1807_v3, 5  ;;  %v6792_v57 = vld [vmem:[%s11346_s0 + $0x24] sm:$0x1]  ;;  %v6793_v62 = vld [vmem:[%s11346_s0 + $0x28] sm:$0xe] }
  0x1e   :  { %v1815_v14 = vrot.slane %v1813_v4, 5  ;;  %v1820_v15 = vrot.slane %v1818_v5, 4  ;;  %v1827_v16 = vshll.u32 %v6886_v0, 16  ;;  %v1823_v18 = vrot.slane %v1821_v11, 5  ;;  %v6794_v4 = vld [vmem:[%s11346_s0 + $0x2c] sm:$0x1] }
  0x1f   :  { %v1460_v17 = vsel %vm7682_vm7, %v1451_v9, %v1459_v10  ;;  %v586_v20 = vshrl.u32 %v6711_v7, 16  ;;  %v589_v21 = vshll.u32 %v6711_v7, 16  ;;  %v1810_v23 = vor.u32 %v1809_v13, %v1806_v1  ;;  %v6847_v10 = vld [vmem:[%s11346_s0 + $0x20] sm:$0xe]  ;;  %v7009_v32 = vld [vmem:[%s11346_s0 + $0xb0] sm:$0xe] }
  0x20   :  { %v6875_v22 = vcombine.low %v1442_v8, %v1460_v17  ;;  %v1829_v24 = vrot.slane %v1827_v16, 5  ;;  %v595_v26 = vshrl.u32 %v6712_v12, 16  ;;  %v1824_v27 = vor.u32 %v1823_v18, %v1820_v15  ;;  %v6848_v15 = vld [vmem:[%s11346_s0 + $0x24] sm:$0x3] }
  0x21   :  { %v588_v28 = vrot.slane %v586_v20, 5  ;;  %v591_v29 = vrot.slane %v589_v21, 6  ;;  %v598_v30 = vshll.u32 %v6712_v12, 16  ;;  %v1811_v31 = vrot.slane %v1810_v23, 4  ;;  %v6849_v20 = vld [vmem:[%s11346_s0 + $0x28] sm:$0xe] }
  0x22   :  { %1737 = vrot.lane.b32.xlu0 %v6875_v22, %s7534_s30  ;;  %v597_v33 = vrot.slane %v595_v26, 5  ;;  %v604_v34 = vshrl.u32 %v6713_v19, 16  ;;  %v607_v35 = vshll.u32 %v6713_v19, 16  ;;  %v1825_v37 = vrot.slane %v1824_v27, 4 }
  0x23   :  { %v592_v38 = vor.u32 %v591_v29, %v588_v28  ;;  %v600_v39 = vrot.slane %v598_v30, 6  ;;  %v613_v40 = vshrl.u32 %v6714_v25, 16  ;;  %v1816_v42 = vsel %vm7704_vm8, %v1811_v31, %v1815_v14  ;;  %v6850_v31 = vld [vmem:[%s11346_s0 + $0x2c] sm:$0x3] }
  0x24   :  { %v606_v43 = vrot.slane %v604_v34, 5  ;;  %v609_v44 = vrot.slane %v607_v35, 6  ;;  %v616_v45 = vshll.u32 %v6714_v25, 16  ;;  %v1830_v47 = vsel %vm7704_vm8, %v1825_v37, %v1829_v24 }
  0x25   :  { %v593_v48 = vrot.slane %v592_v38, 4  ;;  %v601_v49 = vor.u32 %v600_v39, %v597_v33  ;;  %v615_v50 = vrot.slane %v613_v40, 5  ;;  %v6915_v52 = vcombine.low %v1816_v42, %v1830_v47  ;;  %v6887_v39 = vld [vmem:[%s11346_s0 + $0x28] sm:$0xf] }
  0x26   :  { %v610_v53 = vor.u32 %v609_v44, %v606_v43  ;;  %v618_v54 = vrot.slane %v616_v45, 6  ;;  %v956_v55 = vshrl.u32 %v6751_v36, 16  ;;  %v959_v59 = vshll.u32 %v6751_v36, 16  ;;  %v6888_v44 = vld [vmem:[%s11346_s0 + $0x2c] sm:$0x1] }
  0x27   :  { %v602_v58 = vsel %vm7682_vm7, %v593_v48, %v601_v49  ;;  %v965_v60 = vshll.u32 %v6752_v41, 16  ;;  %v970_v61 = vshrl.u32 %v6753_v46, 16  ;;  %2051 = vrot.lane.b32.xlu1 %v6915_v52, %s7535_s26  ;;  %v973_v3 = vshll.u32 %v6753_v46, 16  ;;  %v6889_v49 = vld [vmem:[%s11346_s0 + $0x30] sm:$0xf] }
  0x28   :  { %v611_v63 = vrot.slane %v610_v53, 4  ;;  %v619_v0 = vor.u32 %v618_v54, %v615_v50  ;;  %v958_v1 = vrot.slane %v956_v55, 4  ;;  %v961_v5 = vrot.slane %v959_v59, 5  ;;  %v6890_v50 = vld [vmem:[%s11346_s0 + $0x34] sm:$0x1] }
  0x29   :  { %v967_v7 = vrot.slane %v965_v60, 5  ;;  %v972_v8 = vrot.slane %v970_v61, 4  ;;  %v979_v9 = vshll.u32 %v6754_v51, 16  ;;  %v975_v12 = vrot.slane %v973_v3, 5  ;;  %v6927_v55 = vld [vmem:[%s11346_s0 + $0x28] sm:$0xe] }
  0x2a   :  { %v620_v11 = vsel %vm7682_vm7, %v611_v63, %v619_v0  ;;  %v6821_v13 = vrot.slane %v6791_v56, 9  ;;  %v1282_v14 = vrot.slane %v6792_v57, 5  ;;  %v962_v17 = vor.u32 %v961_v5, %v958_v1  ;;  %v6928_v56 = vld [vmem:[%s11346_s0 + $0x2c] sm:$0x1]  ;;  %v6929_v57 = vld [vmem:[%s11346_s0 + $0x30] sm:$0xe] }
  0x2b   :  { %v6740_v16 = vcombine.low %v602_v58, %v620_v11  ;;  %v981_v18 = vrot.slane %v979_v9, 5  ;;  %v6822_v19 = vrot.slane %v6793_v62, 9  ;;  %v976_v21 = vor.u32 %v975_v12, %v972_v8  ;;  %v6930_v62 = vld [vmem:[%s11346_s0 + $0x34] sm:$0x1]  ;;  %v2996_v11 = vld [vmem:[%s11346_s0 + $0x8] sm:$0xe] }
  0x2c   :  { %v1283_v22 = vsel %vm7593_vm2, %v6821_v13, %v1282_v14  ;;  %v1286_v23 = vrot.slane %v6794_v4, 5  ;;  %v1462_v24 = vshrl.u32 %v6847_v10, 16  ;;  %v963_v25 = vrot.slane %v962_v17, 4  ;;  %v2994_v4 = vld [vmem:[%s11346_s0] sm:$0xe] }
  0x2d   :  { %863 = vrot.lane.b32.xlu0 %v6740_v16, %s7532_s9  ;;  %v1465_v26 = vshll.u32 %v6847_v10, 16  ;;  %v1471_v27 = vshrl.u32 %v6848_v15, 16  ;;  %v1474_v28 = vshll.u32 %v6848_v15, 16  ;;  %v977_v29 = vrot.slane %v976_v21, 4  ;;  %v2995_v10 = vld [vmem:[%s11346_s0 + $0x4] sm:$0x1] }
  0x2e   :  { %v1287_v30 = vsel %vm7593_vm2, %v6822_v19, %v1286_v23  ;;  %v1464_v33 = vrot.slane %v1462_v24, 5  ;;  %v1480_v34 = vshrl.u32 %v6849_v20, 16  ;;  %v968_v35 = vsel %vm7704_vm8, %v963_v25, %v967_v7  ;;  %v2997_v16 = vld [vmem:[%s11346_s0 + $0xc] sm:$0x1]  ;;  %v6659_v21 = vld [vmem:[%s11346_s0 + $0x28] sm:$0xe] }
  0x2f   :  { %v6836_v36 = vcombine.low %v1283_v22, %v1287_v30  ;;  %v1467_v37 = vrot.slane %v1465_v26, 6  ;;  %v1473_v38 = vrot.slane %v1471_v27, 5  ;;  %v982_v40 = vsel %vm7704_vm8, %v977_v29, %v981_v18  ;;  %v6660_v26 = vld [vmem:[%s11346_s0 + $0x2c] sm:$0x1] }
  0x30   :  { %v1476_v41 = vrot.slane %v1474_v28, 6  ;;  %v1482_v42 = vrot.slane %v1480_v34, 5  ;;  %v1483_v43 = vshll.u32 %v6849_v20, 16  ;;  %v6780_v45 = vcombine.low %v968_v35, %v982_v40 }
  0x31   :  { %1362 = vrot.lane.b32.xlu0 %v6836_v36, %s7529_s23  ;;  %v1468_v46 = vor.u32 %v1467_v37, %v1464_v33  ;;  %v1489_v47 = vshrl.u32 %v6850_v31, 16  ;;  %v1492_v48 = vshll.u32 %v6850_v31, 16  ;;  %v1832_v53 = vshrl.u32 %v6887_v39, 16  ;;  %v6661_v31 = vld [vmem:[%s11346_s0 + $0x30] sm:$0xe] }
  0x32   :  { %v1477_v51 = vor.u32 %v1476_v41, %v1473_v38  ;;  %v1485_v52 = vrot.slane %v1483_v43, 6  ;;  %v1835_v54 = vshll.u32 %v6887_v39, 16  ;;  %1177 = vrot.lane.b32.xlu1 %v6780_v45, %s7533_s22  ;;  %v1841_v61 = vshll.u32 %v6888_v44, 16  ;;  %v6662_v33 = vld [vmem:[%s11346_s0 + $0x34] sm:$0x1] }
  0x33   :  { %v1469_v58 = vrot.slane %v1468_v46, 4  ;;  %v1491_v59 = vrot.slane %v1489_v47, 5  ;;  %v1494_v60 = vrot.slane %v1492_v48, 6  ;;  %v1834_v0 = vrot.slane %v1832_v53, 4  ;;  %v3178_v38 = vld [vmem:[%s11346_s0] sm:$0xc] }
  0x34   :  { %v1486_v63 = vor.u32 %v1485_v52, %v1482_v42  ;;  %v1837_v1 = vrot.slane %v1835_v54, 5  ;;  %v1846_v3 = vshrl.u32 %v6889_v49, 16  ;;  %v1843_v8 = vrot.slane %v1841_v61, 5  ;;  %v3179_v39 = vld [vmem:[%s11346_s0 + $0x4] sm:$0x3] }
  0x35   :  { %v1478_v5 = vsel %vm7682_vm7, %v1469_v58, %v1477_v51  ;;  %v1495_v7 = vor.u32 %v1494_v60, %v1491_v59  ;;  %v1849_v9 = vshll.u32 %v6889_v49, 16  ;;  %v1855_v15 = vshll.u32 %v6890_v50, 16  ;;  %v3180_v44 = vld [vmem:[%s11346_s0 + $0x8] sm:$0xc]  ;;  %v3181_v49 = vld [vmem:[%s11346_s0 + $0xc] sm:$0x3] }
  0x36   :  { %v1487_v12 = vrot.slane %v1486_v63, 4  ;;  %v1838_v13 = vor.u32 %v1837_v1, %v1834_v0  ;;  %v1848_v14 = vrot.slane %v1846_v3, 4  ;;  %v6957_v18 = vrot.slane %v6927_v55, 9  ;;  %v6715_v52 = vld [vmem:[%s11346_s0 + $0x28] sm:$0xe] }
  0x37   :  { %v1851_v17 = vrot.slane %v1849_v9, 5  ;;  %v2158_v19 = vrot.slane %v6928_v56, 5  ;;  %v6958_v20 = vrot.slane %v6929_v57, 9  ;;  %v1857_v24 = vrot.slane %v1855_v15, 5  ;;  %v6716_v53 = vld [vmem:[%s11346_s0 + $0x2c] sm:$0x3] }
  0x38   :  { %v1496_v22 = vsel %vm7682_vm7, %v1487_v12, %v1495_v7  ;;  %v1839_v23 = vrot.slane %v1838_v13, 4  ;;  %v2162_v25 = vrot.slane %v6930_v62, 5  ;;  %v7045_v30 = vrot.slane %v2994_v4, 9  ;;  %v6717_v59 = vld [vmem:[%s11346_s0 + $0x30] sm:$0xe] }
  0x39   :  { %v6876_v27 = vcombine.low %v1478_v5, %v1496_v22  ;;  %v1852_v28 = vor.u32 %v1851_v17, %v1848_v14  ;;  %v2159_v29 = vsel %vm7593_vm2, %v6957_v18, %v2158_v19  ;;  %v3060_v36 = vrot.slane %v2995_v10, 5  ;;  %v6718_v0 = vld [vmem:[%s11346_s0 + $0x34] sm:$0x3]  ;;  %v6755_v7 = vld [vmem:[%s11346_s0 + $0x30] sm:$0xf] }
  0x3a   :  { %v1844_v34 = vsel %vm7704_vm8, %v1839_v23, %v1843_v8  ;;  %v2163_v35 = vsel %vm7593_vm2, %v6958_v20, %v2162_v25  ;;  %v7046_v37 = vrot.slane %v2996_v11, 9  ;;  %v3064_v42 = vrot.slane %v2997_v16, 5  ;;  %v6756_v12 = vld [vmem:[%s11346_s0 + $0x34] sm:$0x1]  ;;  %v6757_v17 = vld [vmem:[%s11346_s0 + $0x38] sm:$0xf] }
  0x3b   :  { %1739 = vrot.lane.b32.xlu1 %v6876_v27, %s7534_s30  ;;  %v1853_v40 = vrot.slane %v1852_v28, 4  ;;  %v6972_v41 = vcombine.low %v2159_v29, %v2163_v35  ;;  %v6687_v43 = vrot.slane %v6659_v21, 9  ;;  %v3061_v45 = vsel %vm7593_vm2, %v7045_v30, %v3060_v36  ;;  %v6758_v22 = vld [vmem:[%s11346_s0 + $0x3c] sm:$0x1]  ;;  %v7117_v27 = vld [vmem:[%s11346_s0 + $0x10] sm:$0xe] }
  0x3c   :  { %v411_v46 = vrot.slane %v6660_v26, 5  ;;  %v6688_v47 = vrot.slane %v6661_v31, 9  ;;  %v415_v48 = vrot.slane %v6662_v33, 5  ;;  %v3065_v51 = vsel %vm7593_vm2, %v7046_v37, %v3064_v42  ;;  %v7118_v28 = vld [vmem:[%s11346_s0 + $0x14] sm:$0x1] }
  0x3d   :  { %v1858_v50 = vsel %vm7704_vm8, %v1853_v40, %v1857_v24  ;;  %vm3242_vm9 = vcmask 1041408   ;;  %vm3243_vm10 = vcmask 1045508   ;;  %v7061_v55 = vcombine.low %v3061_v45, %v3065_v51  ;;  %v7120_v40 = vld [vmem:[%s11346_s0 + $0x1c] sm:$0x1]  ;;  %v6795_v45 = vld [vmem:[%s11346_s0 + $0x30] sm:$0xe] }
  0x3e   :  { %v6916_v54 = vcombine.low %v1844_v34, %v1858_v50  ;;  %v412_v56 = vsel %vm7593_vm2, %v6687_v43, %v411_v46  ;;  %v416_v57 = vsel %vm7593_vm2, %v6688_v47, %v415_v48  ;;  %vm7889_vm11 = vmor %vm3242_vm9, %vm3243_vm10  ;;  %v7069_v61 = vrot.slane %v3178_v38, 10  ;;  %v7119_v34 = vld [vmem:[%s11346_s0 + $0x18] sm:$0xe]  ;;  %v6796_v46 = vld [vmem:[%s11346_s0 + $0x34] sm:$0x1] }
  0x3f   :  { %2238 = vrot.lane.b32.xlu1 %v6972_v41, %s7531_s21  ;;  %v6701_v60 = vcombine.low %v412_v56, %v416_v57  ;;  %v3247_v62 = vrot.slane %v3179_v39, 6  ;;  %v7070_v63 = vrot.slane %v3180_v44, 10  ;;  %v3251_v1 = vrot.slane %v3181_v49, 6  ;;  %v7457_v38 = vld [vmem:[%s11346_s0 + $0x10] ss:$8 sps:$4 sm:$0xff]  }
  0x40   :  { %2053 = vrot.lane.b32.xlu0 %v6916_v54, %s7535_s26  ;;  %v622_v3 = vshrl.u32 %v6715_v52, 16  ;;  %v625_v4 = vshll.u32 %v6715_v52, 16  ;;  %v631_v5 = vshrl.u32 %v6716_v53, 16  ;;  %v634_v9 = vshll.u32 %v6716_v53, 16  ;;  %v6797_v51 = vld [vmem:[%s11346_s0 + $0x38] sm:$0xe] }
  0x41   :  { %v3248_v8 = vsel %vm7889_vm11, %v7069_v61, %v3247_v62  ;;  %v640_v10 = vshrl.u32 %v6717_v59, 16  ;;  %v643_v11 = vshll.u32 %v6717_v59, 16  ;;  %v3252_v13 = vsel %vm7889_vm11, %v7070_v63, %v3251_v1  ;;  %v6798_v52 = vld [vmem:[%s11346_s0 + $0x3c] sm:$0x1]  ;;  %v7173_v57 = vld [vmem:[%s11346_s0 + $0x10] sm:$0xc] }
  0x42   :  { %v624_v14 = vrot.slane %v622_v3, 5  ;;  %v627_v15 = vrot.slane %v625_v4, 6  ;;  %v633_v16 = vrot.slane %v631_v5, 5  ;;  %v7085_v18 = vcombine.low %v3248_v8, %v3252_v13  ;;  %v7174_v63 = vld [vmem:[%s11346_s0 + $0x14] sm:$0x3] }
  0x43   :  { %485 = vrot.lane.b32.xlu1 %v6701_v60, %s7530_s12  ;;  %v636_v19 = vrot.slane %v634_v9, 6  ;;  %v642_v20 = vrot.slane %v640_v10, 5  ;;  %v645_v21 = vrot.slane %v643_v11, 6  ;;  %v649_v24 = vshrl.u32 %v6718_v0, 16  ;;  %v7175_v5 = vld [vmem:[%s11346_s0 + $0x18] sm:$0xc] }
  0x44   :  { %3146 = vrot.lane.b32.xlu0 %v7061_v55, %s7530_s12  ;;  %v628_v23 = vor.u32 %v627_v15, %v624_v14  ;;  %v652_v25 = vshll.u32 %v6718_v0, 16  ;;  %v984_v26 = vshrl.u32 %v6755_v7, 16  ;;  %v987_v31 = vshll.u32 %v6755_v7, 16  ;;  %v7176_v7 = vld [vmem:[%s11346_s0 + $0x1c] sm:$0x3] }
  0x45   :  { %v637_v29 = vor.u32 %v636_v19, %v633_v16  ;;  %v646_v30 = vor.u32 %v645_v21, %v642_v20  ;;  %v993_v33 = vshll.u32 %v6756_v12, 16  ;;  %v651_v36 = vrot.slane %v649_v24, 5  ;;  %v6851_v12 = vld [vmem:[%s11346_s0 + $0x30] sm:$0xe]  ;;  %v6852_v21 = vld [vmem:[%s11346_s0 + $0x34] sm:$0x3] }
  0x46   :  { %v629_v35 = vrot.slane %v628_v23, 4  ;;  %v654_v37 = vrot.slane %v652_v25, 6  ;;  %v986_v39 = vrot.slane %v984_v26, 4  ;;  %v989_v42 = vrot.slane %v987_v31, 5  ;;  %v6853_v25 = vld [vmem:[%s11346_s0 + $0x38] sm:$0xe] }
  0x47   :  { %v647_v41 = vrot.slane %v646_v30, 4  ;;  %v995_v43 = vrot.slane %v993_v33, 5  ;;  %v998_v44 = vshrl.u32 %v6757_v17, 16  ;;  %v1001_v49 = vshll.u32 %v6757_v17, 16  ;;  %v6854_v30 = vld [vmem:[%s11346_s0 + $0x3c] sm:$0x3] }
  0x48   :  { %3333 = vrot.lane.b32.xlu0 %v7085_v18, %s7532_s9  ;;  %v638_v47 = vsel %vm7682_vm7, %v629_v35, %v637_v29  ;;  %v655_v48 = vor.u32 %v654_v37, %v651_v36  ;;  %v1007_v50 = vshll.u32 %v6758_v22, 16  ;;  %v990_v53 = vor.u32 %v989_v42, %v986_v39  ;;  %v6891_v37 = vld [vmem:[%s11346_s0 + $0x38] sm:$0xf] }
  0x49   :  { %v1000_v54 = vrot.slane %v998_v44, 4  ;;  %v7149_v55 = vrot.slane %v7117_v27, 9  ;;  %v3519_v56 = vrot.slane %v7118_v28, 5  ;;  %v1003_v60 = vrot.slane %v1001_v49, 5  ;;  %v6893_v44 = vld [vmem:[%s11346_s0 + $0x40] sm:$0xf] }
  0x4a   :  { %v656_v59 = vsel %vm7682_vm7, %v647_v41, %v655_v48  ;;  %v1009_v61 = vrot.slane %v1007_v50, 5  ;;  %v7150_v62 = vrot.slane %v7119_v34, 9  ;;  %v991_v1 = vrot.slane %v990_v53, 4  ;;  %v6894_v49 = vld [vmem:[%s11346_s0 + $0x44] sm:$0x1] }
  0x4b   :  { %v6741_v0 = vcombine.low %v638_v47, %v656_v59  ;;  %v3520_v3 = vsel %vm7593_vm2, %v7149_v55, %v3519_v56  ;;  %v3523_v4 = vrot.slane %v7120_v40, 5  ;;  %v1004_v8 = vor.u32 %v1003_v60, %v1000_v54  ;;  %v7253_v54 = vld [vmem:[%s11346_s0 + $0x20] sm:$0xe]  ;;  %v7254_v60 = vld [vmem:[%s11346_s0 + $0x24] sm:$0x1] }
  0x4c   :  { %3421 = vrot.lane.b32.xlu0 %v7457_v38, %s7533_s22  ;;  %v6823_v9 = vrot.slane %v6795_v45, 9  ;;  %v1290_v10 = vrot.slane %v6796_v46, 5  ;;  %v6824_v11 = vrot.slane %v6797_v51, 9  ;;  %v996_v13 = vsel %vm7704_vm8, %v991_v1, %v995_v43  ;;  %v6892_v38 = vld [vmem:[%s11346_s0 + $0x3c] sm:$0x1] }
  0x4d   :  { %865 = vrot.lane.b32.xlu1 %v6741_v0, %s7532_s9  ;;  %v3524_v14 = vsel %vm7593_vm2, %v7150_v62, %v3523_v4  ;;  %v1294_v15 = vrot.slane %v6798_v52, 5  ;;  %v7205_v16 = vrot.slane %v7173_v57, 10  ;;  %v1005_v17 = vrot.slane %v1004_v8, 4  ;;  %v7458_v43 = vld [vmem:[%s11346_s0 + $0x20] ss:$8 sps:$4 sm:$0xff]  }
  0x4e   :  { %v7165_v18 = vcombine.low %v3520_v3, %v3524_v14  ;;  %v1291_v19 = vsel %vm7593_vm2, %v6823_v9, %v1290_v10  ;;  %v3703_v20 = vrot.slane %v7174_v63, 6  ;;  %v7206_v23 = vrot.slane %v7175_v5, 10  ;;  %v7256_v3 = vld [vmem:[%s11346_s0 + $0x2c] sm:$0x1]  ;;  %v6931_v9 = vld [vmem:[%s11346_s0 + $0x38] sm:$0xe] }
  0x4f   :  { %v1295_v22 = vsel %vm7593_vm2, %v6824_v11, %v1294_v15  ;;  %v3707_v24 = vrot.slane %v7176_v7, 6  ;;  %v1498_v26 = vshrl.u32 %v6851_v12, 16  ;;  %v1010_v27 = vsel %vm7704_vm8, %v1005_v17, %v1009_v61  ;;  %v7255_v61 = vld [vmem:[%s11346_s0 + $0x28] sm:$0xe]  ;;  %v6932_v10 = vld [vmem:[%s11346_s0 + $0x3c] sm:$0x1] }
  0x50   :  { %3605 = vrot.lane.b32.xlu0 %v7165_v18, %s7529_s23  ;;  %v6837_v28 = vcombine.low %v1291_v19, %v1295_v22  ;;  %v3704_v29 = vsel %vm7889_vm11, %v7205_v16, %v3703_v20  ;;  %v1501_v31 = vshll.u32 %v6851_v12, 16  ;;  %v6781_v33 = vcombine.low %v996_v13, %v1010_v27  ;;  %v6933_v15 = vld [vmem:[%s11346_s0 + $0x40] sm:$0xe]  ;;  %v6934_v16 = vld [vmem:[%s11346_s0 + $0x44] sm:$0x1] }
  0x51   :  { %v3708_v34 = vsel %vm7889_vm11, %v7206_v23, %v3707_v24  ;;  %v1500_v35 = vrot.slane %v1498_v26, 5  ;;  %v1507_v36 = vshrl.u32 %v6852_v21, 16  ;;  %v1510_v41 = vshll.u32 %v6852_v21, 16  ;;  %v2998_v21 = vld [vmem:[%s11346_s0 + $0x10] sm:$0xe] }
  0x52   :  { %v7221_v39 = vcombine.low %v3704_v29, %v3708_v34  ;;  %v1503_v40 = vrot.slane %v1501_v31, 6  ;;  %v1516_v42 = vshrl.u32 %v6853_v25, 16  ;;  %1179 = vrot.lane.b32.xlu1 %v6781_v33, %s7533_s22  ;;  %v1519_v46 = vshll.u32 %v6853_v25, 16  ;;  %v2999_v26 = vld [vmem:[%s11346_s0 + $0x14] sm:$0x1] }
  0x53   :  { %v1509_v45 = vrot.slane %v1507_v36, 5  ;;  %v1525_v47 = vshrl.u32 %v6854_v30, 16  ;;  %v1528_v48 = vshll.u32 %v6854_v30, 16  ;;  %v1512_v51 = vrot.slane %v1510_v41, 6  ;;  %v3000_v27 = vld [vmem:[%s11346_s0 + $0x18] sm:$0xe] }
  0x54   :  { %3789 = vrot.lane.b32.xlu0 %v7221_v39, %s7534_s30  ;;  %v1504_v50 = vor.u32 %v1503_v40, %v1500_v35  ;;  %v1518_v52 = vrot.slane %v1516_v42, 5  ;;  %v1860_v53 = vshrl.u32 %v6891_v37, 16  ;;  %v1521_v55 = vrot.slane %v1519_v46, 6  ;;  %v6663_v34 = vld [vmem:[%s11346_s0 + $0x38] sm:$0xe] }
  0x55   :  { %v1527_v56 = vrot.slane %v1525_v47, 5  ;;  %v1530_v57 = vrot.slane %v1528_v48, 6  ;;  %v1863_v59 = vshll.u32 %v6891_v37, 16  ;;  %v1513_v63 = vor.u32 %v1512_v51, %v1509_v45  ;;  %v6664_v35 = vld [vmem:[%s11346_s0 + $0x3c] sm:$0x1] }
  0x56   :  { %v1505_v62 = vrot.slane %v1504_v50, 4  ;;  %v1862_v0 = vrot.slane %v1860_v53, 4  ;;  %v1869_v1 = vshll.u32 %v6892_v38, 16  ;;  %1364 = vrot.lane.b32.xlu1 %v6837_v28, %s7529_s23  ;;  %v1522_v4 = vor.u32 %v1521_v55, %v1518_v52  ;;  %v3001_v28 = vld [vmem:[%s11346_s0 + $0x1c] sm:$0x1] }
  0x57   :  { %v1531_v5 = vor.u32 %v1530_v57, %v1527_v56  ;;  %v1865_v7 = vrot.slane %v1863_v59, 5  ;;  %v1874_v8 = vshrl.u32 %v6893_v44, 16  ;;  %v1877_v13 = vshll.u32 %v6893_v44, 16  ;;  %v6665_v40 = vld [vmem:[%s11346_s0 + $0x40] sm:$0xe] }
  0x58   :  { %v1514_v11 = vsel %vm7682_vm7, %v1505_v62, %v1513_v63  ;;  %3878 = vrot.lane.b32.xlu0 %v7458_v43, %s7535_s26  ;;  %v1871_v12 = vrot.slane %v1869_v1, 5  ;;  %v1883_v14 = vshll.u32 %v6894_v49, 16  ;;  %v1523_v17 = vrot.slane %v1522_v4, 4  ;;  %v6666_v45 = vld [vmem:[%s11346_s0 + $0x44] sm:$0x1] }
  0x59   :  { %v1866_v18 = vor.u32 %v1865_v7, %v1862_v0  ;;  %v1876_v19 = vrot.slane %v1874_v8, 4  ;;  %v7285_v20 = vrot.slane %v7253_v54, 9  ;;  %v1879_v22 = vrot.slane %v1877_v13, 5  ;;  %v3182_v50 = vld [vmem:[%s11346_s0 + $0x10] sm:$0xc] }
  0x5a   :  { %v1885_v23 = vrot.slane %v1883_v14, 5  ;;  %v3976_v24 = vrot.slane %v7254_v60, 5  ;;  %v7286_v25 = vrot.slane %v7255_v61, 9  ;;  %v1532_v29 = vsel %vm7682_vm7, %v1523_v17, %v1531_v5  ;;  %v3183_v51 = vld [vmem:[%s11346_s0 + $0x14] sm:$0x3] }
  0x5b   :  { %v1867_v30 = vrot.slane %v1866_v18, 4  ;;  %v3980_v31 = vrot.slane %v7256_v3, 5  ;;  %v6959_v33 = vrot.slane %v6931_v9, 9  ;;  %v6877_v36 = vcombine.low %v1514_v11, %v1532_v29  ;;  %v3184_v56 = vld [vmem:[%s11346_s0 + $0x18] sm:$0xc] }
  0x5c   :  { %v1880_v37 = vor.u32 %v1879_v22, %v1876_v19  ;;  %v3977_v38 = vsel %vm7593_vm2, %v7285_v20, %v3976_v24  ;;  %v2166_v39 = vrot.slane %v6932_v10, 5  ;;  %v6960_v43 = vrot.slane %v6933_v15, 9  ;;  %v3185_v62 = vld [vmem:[%s11346_s0 + $0x1c] sm:$0x3]  ;;  %v6719_v63 = vld [vmem:[%s11346_s0 + $0x38] sm:$0xe] }
  0x5d   :  { %v1872_v41 = vsel %vm7704_vm8, %v1867_v30, %v1871_v12  ;;  %v3981_v42 = vsel %vm7593_vm2, %v7286_v25, %v3980_v31  ;;  %v2170_v44 = vrot.slane %v6934_v16, 5  ;;  %1741 = vrot.lane.b32.xlu1 %v6877_v36, %s7534_s30  ;;  %v7047_v49 = vrot.slane %v2998_v21, 9  ;;  %v6720_v5 = vld [vmem:[%s11346_s0 + $0x3c] sm:$0x3]  ;;  %v6721_v14 = vld [vmem:[%s11346_s0 + $0x40] sm:$0xe] }
  0x5e   :  { %v1881_v46 = vrot.slane %v1880_v37, 4  ;;  %v7301_v47 = vcombine.low %v3977_v38, %v3981_v42  ;;  %v2167_v48 = vsel %vm7593_vm2, %v6959_v33, %v2166_v39  ;;  %v3068_v53 = vrot.slane %v2999_v26, 5  ;;  %v6722_v17 = vld [vmem:[%s11346_s0 + $0x44] sm:$0x3]  ;;  %v6759_v25 = vld [vmem:[%s11346_s0 + $0x40] sm:$0xf] }
  0x5f   :  { %v2171_v52 = vsel %vm7593_vm2, %v6960_v43, %v2170_v44  ;;  %v7048_v54 = vrot.slane %v3000_v27, 9  ;;  %v3072_v55 = vrot.slane %v3001_v28, 5  ;;  %v6689_v60 = vrot.slane %v6663_v34, 9  ;;  %v7459_v30 = vld [vmem:[%s11346_s0 + $0x20] ss:$8 sps:$4 sm:$0xff]  }
  0x60   :  { %v1886_v57 = vsel %vm7704_vm8, %v1881_v46, %v1885_v23  ;;  %4062 = vrot.lane.b32.xlu0 %v7301_v47, %s7531_s21  ;;  %v6973_v59 = vcombine.low %v2167_v48, %v2171_v52  ;;  %v419_v61 = vrot.slane %v6664_v35, 5  ;;  %v3069_v1 = vsel %vm7593_vm2, %v7047_v49, %v3068_v53  ;;  %v6760_v31 = vld [vmem:[%s11346_s0 + $0x44] sm:$0x1]  ;;  %v6761_v37 = vld [vmem:[%s11346_s0 + $0x48] sm:$0xf] }
  0x61   :  { %v6917_v0 = vcombine.low %v1872_v41, %v1886_v57  ;;  %v3073_v3 = vsel %vm7593_vm2, %v7048_v54, %v3072_v55  ;;  %v6690_v4 = vrot.slane %v6665_v40, 9  ;;  %v423_v9 = vrot.slane %v6666_v45, 5  ;;  %v6762_v40 = vld [vmem:[%s11346_s0 + $0x4c] sm:$0x1]  ;;  %v7121_v43 = vld [vmem:[%s11346_s0 + $0x20] sm:$0xe] }
  0x62   :  { %v7062_v7 = vcombine.low %v3069_v1, %v3073_v3  ;;  %v420_v8 = vsel %vm7593_vm2, %v6689_v60, %v419_v61  ;;  %v7071_v10 = vrot.slane %v3182_v50, 10  ;;  %v3255_v11 = vrot.slane %v3183_v51, 6  ;;  %v7122_v48 = vld [vmem:[%s11346_s0 + $0x24] sm:$0x1]  ;;  %v7123_v49 = vld [vmem:[%s11346_s0 + $0x28] sm:$0xe] }
  0x63   :  { %2055 = vrot.lane.b32.xlu1 %v6917_v0, %s7535_s26  ;;  %v7072_v12 = vrot.slane %v3184_v56, 10  ;;  %v3259_v13 = vrot.slane %v3185_v62, 6  ;;  %v658_v15 = vshrl.u32 %v6719_v63, 16  ;;  %v424_v16 = vsel %vm7593_vm2, %v6690_v4, %v423_v9  ;;  %v7124_v54 = vld [vmem:[%s11346_s0 + $0x2c] sm:$0x1] }
  0x64   :  { %3148 = vrot.lane.b32.xlu0 %v7062_v7, %s7530_s12  ;;  %v661_v18 = vshll.u32 %v6719_v63, 16  ;;  %v667_v19 = vshrl.u32 %v6720_v5, 16  ;;  %v670_v20 = vshll.u32 %v6720_v5, 16  ;;  %v6702_v21 = vcombine.low %v420_v8, %v424_v16  ;;  %v6799_v60 = vld [vmem:[%s11346_s0 + $0x40] sm:$0xe] }
  0x65   :  { %v3256_v22 = vsel %vm7889_vm11, %v7071_v10, %v3255_v11  ;;  %v3260_v23 = vsel %vm7889_vm11, %v7072_v12, %v3259_v13  ;;  %v660_v24 = vrot.slane %v658_v15, 5  ;;  %v676_v33 = vshrl.u32 %v6721_v14, 16  ;;  %v6800_v1 = vld [vmem:[%s11346_s0 + $0x44] sm:$0x1]  ;;  %v6801_v8 = vld [vmem:[%s11346_s0 + $0x48] sm:$0xe] }
  0x66   :  { %v7086_v26 = vcombine.low %v3256_v22, %v3260_v23  ;;  %v663_v27 = vrot.slane %v661_v18, 6  ;;  %v669_v28 = vrot.slane %v667_v19, 5  ;;  %v672_v29 = vrot.slane %v670_v20, 6  ;;  %v6802_v13 = vld [vmem:[%s11346_s0 + $0x4c] sm:$0x1] }
  0x67   :  { %2240 = vrot.lane.b32.xlu1 %v6973_v59, %s7531_s21  ;;  %v679_v34 = vshll.u32 %v6721_v14, 16  ;;  %v685_v35 = vshrl.u32 %v6722_v17, 16  ;;  %v688_v36 = vshll.u32 %v6722_v17, 16  ;;  %v1012_v41 = vshrl.u32 %v6759_v25, 16  ;;  %v7177_v18 = vld [vmem:[%s11346_s0 + $0x20] sm:$0xc] }
  0x68   :  { %3335 = vrot.lane.b32.xlu0 %v7086_v26, %s7532_s9  ;;  %v664_v38 = vor.u32 %v663_v27, %v660_v24  ;;  %v673_v39 = vor.u32 %v672_v29, %v669_v28  ;;  %v1015_v42 = vshll.u32 %v6759_v25, 16  ;;  %v678_v44 = vrot.slane %v676_v33, 5  ;;  %v7178_v19 = vld [vmem:[%s11346_s0 + $0x24] sm:$0x3]  ;;  %v7179_v24 = vld [vmem:[%s11346_s0 + $0x28] sm:$0xc] }
  0x69   :  { %v681_v45 = vrot.slane %v679_v34, 6  ;;  %v687_v46 = vrot.slane %v685_v35, 5  ;;  %v690_v47 = vrot.slane %v688_v36, 6  ;;  %v1014_v51 = vrot.slane %v1012_v41, 4  ;;  %v7180_v25 = vld [vmem:[%s11346_s0 + $0x2c] sm:$0x3] }
  0x6a   :  { %v665_v50 = vrot.slane %v664_v38, 4  ;;  %v1017_v52 = vrot.slane %v1015_v42, 5  ;;  %v1021_v53 = vshll.u32 %v6760_v31, 16  ;;  %v1026_v57 = vshrl.u32 %v6761_v37, 16  ;;  %v6856_v36 = vld [vmem:[%s11346_s0 + $0x44] sm:$0x3] }
  0x6b   :  { %487 = vrot.lane.b32.xlu1 %v6702_v21, %s7530_s12  ;;  %v682_v55 = vor.u32 %v681_v45, %v678_v44  ;;  %v691_v56 = vor.u32 %v690_v47, %v687_v46  ;;  %v1029_v59 = vshll.u32 %v6761_v37, 16  ;;  %v1035_v0 = vshll.u32 %v6762_v40, 16  ;;  %v6857_v41 = vld [vmem:[%s11346_s0 + $0x48] sm:$0xe]  ;;  %v6858_v45 = vld [vmem:[%s11346_s0 + $0x4c] sm:$0x3] }
  0x6c   :  { %v674_v61 = vsel %vm7682_vm7, %v665_v50, %v673_v39  ;;  %3423 = vrot.lane.b32.xlu0 %v7459_v30, %s7533_s22  ;;  %v1018_v62 = vor.u32 %v1017_v52, %v1014_v51  ;;  %v1023_v63 = vrot.slane %v1021_v53, 5  ;;  %v1028_v4 = vrot.slane %v1026_v57, 4  ;;  %v6855_v30 = vld [vmem:[%s11346_s0 + $0x40] sm:$0xe]  ;;  %v6895_v51 = vld [vmem:[%s11346_s0 + $0x48] sm:$0xf] }
  0x6d   :  { %v683_v3 = vrot.slane %v682_v55, 4  ;;  %v1031_v5 = vrot.slane %v1029_v59, 5  ;;  %v7151_v7 = vrot.slane %v7121_v43, 9  ;;  %v1037_v10 = vrot.slane %v1035_v0, 5  ;;  %v6896_v57 = vld [vmem:[%s11346_s0 + $0x4c] sm:$0x1] }
  0x6e   :  { %v1019_v9 = vrot.slane %v1018_v62, 4  ;;  %v3527_v11 = vrot.slane %v7122_v48, 5  ;;  %v7152_v12 = vrot.slane %v7123_v49, 9  ;;  %v3531_v16 = vrot.slane %v7124_v54, 5 }
  0x6f   :  { %v692_v14 = vsel %vm7682_vm7, %v683_v3, %v691_v56  ;;  %v1032_v15 = vor.u32 %v1031_v5, %v1028_v4  ;;  %v6825_v17 = vrot.slane %v6799_v60, 9  ;;  %v1298_v23 = vrot.slane %v6800_v1, 5  ;;  %v7460_v56 = vld [vmem:[%s11346_s0 + $0x30] ss:$8 sps:$4 sm:$0xff]   ;;  %v6898_v4 = vld [vmem:[%s11346_s0 + $0x54] sm:$0x1] }
  0x70   :  { %v6742_v20 = vcombine.low %v674_v61, %v692_v14  ;;  %v1024_v21 = vsel %vm7704_vm8, %v1019_v9, %v1023_v63  ;;  %v3528_v22 = vsel %vm7593_vm2, %v7151_v7, %v3527_v11  ;;  %v3532_v27 = vsel %vm7593_vm2, %v7152_v12, %v3531_v16  ;;  %v6897_v63 = vld [vmem:[%s11346_s0 + $0x50] sm:$0xf]  ;;  %v7258_v12 = vld [vmem:[%s11346_s0 + $0x34] sm:$0x1] }
  0x71   :  { %v1033_v26 = vrot.slane %v1032_v15, 4  ;;  %v6826_v28 = vrot.slane %v6801_v8, 9  ;;  %v1302_v29 = vrot.slane %v6802_v13, 5  ;;  %v7166_v31 = vcombine.low %v3528_v22, %v3532_v27  ;;  %v7257_v11 = vld [vmem:[%s11346_s0 + $0x30] sm:$0xe] }
  0x72   :  { %867 = vrot.lane.b32.xlu1 %v6742_v20, %s7532_s9  ;;  %v1299_v33 = vsel %vm7593_vm2, %v6825_v17, %v1298_v23  ;;  %v7207_v34 = vrot.slane %v7177_v18, 10  ;;  %v3711_v35 = vrot.slane %v7178_v19, 6  ;;  %v7208_v39 = vrot.slane %v7179_v24, 10  ;;  %v7259_v17 = vld [vmem:[%s11346_s0 + $0x38] sm:$0xe] }
  0x73   :  { %v1038_v37 = vsel %vm7704_vm8, %v1033_v26, %v1037_v10  ;;  %v1303_v38 = vsel %vm7593_vm2, %v6826_v28, %v1302_v29  ;;  %v3715_v40 = vrot.slane %v7180_v25, 6  ;;  %3607 = vrot.lane.b32.xlu0 %v7166_v31, %s7529_s23  ;;  %v1534_v46 = vshrl.u32 %v6855_v30, 16  ;;  %v7260_v22 = vld [vmem:[%s11346_s0 + $0x3c] sm:$0x1]  ;;  %v6935_v23 = vld [vmem:[%s11346_s0 + $0x48] sm:$0xe] }
  0x74   :  { %v6782_v42 = vcombine.low %v1024_v21, %v1038_v37  ;;  %v6838_v43 = vcombine.low %v1299_v33, %v1303_v38  ;;  %v3712_v44 = vsel %vm7889_vm11, %v7207_v34, %v3711_v35  ;;  %v1537_v48 = vshll.u32 %v6855_v30, 16  ;;  %v6936_v24 = vld [vmem:[%s11346_s0 + $0x4c] sm:$0x1]  ;;  %v6937_v29 = vld [vmem:[%s11346_s0 + $0x50] sm:$0xe] }
  0x75   :  { %v3716_v47 = vsel %vm7889_vm11, %v7208_v39, %v3715_v40  ;;  %v1543_v49 = vshrl.u32 %v6856_v36, 16  ;;  %v1546_v50 = vshll.u32 %v6856_v36, 16  ;;  %v1536_v53 = vrot.slane %v1534_v46, 5  ;;  %v6938_v35 = vld [vmem:[%s11346_s0 + $0x54] sm:$0x1] }
  0x76   :  { %1181 = vrot.lane.b32.xlu1 %v6782_v42, %s7533_s22  ;;  %v7222_v52 = vcombine.low %v3712_v44, %v3716_v47  ;;  %v1552_v54 = vshrl.u32 %v6857_v41, 16  ;;  %v1555_v55 = vshll.u32 %v6857_v41, 16  ;;  %v1539_v59 = vrot.slane %v1537_v48, 6  ;;  %v3002_v36 = vld [vmem:[%s11346_s0 + $0x20] sm:$0xe] }
  0x77   :  { %v1545_v60 = vrot.slane %v1543_v49, 5  ;;  %v1548_v61 = vrot.slane %v1546_v50, 6  ;;  %v1561_v62 = vshrl.u32 %v6858_v45, 16  ;;  %v1564_v3 = vshll.u32 %v6858_v45, 16  ;;  %v3003_v41 = vld [vmem:[%s11346_s0 + $0x24] sm:$0x1] }
  0x78   :  { %3791 = vrot.lane.b32.xlu0 %v7222_v52, %s7534_s30  ;;  %v1554_v0 = vrot.slane %v1552_v54, 5  ;;  %v1557_v1 = vrot.slane %v1555_v55, 6  ;;  %v1888_v5 = vshrl.u32 %v6895_v51, 16  ;;  %v1540_v7 = vor.u32 %v1539_v59, %v1536_v53  ;;  %v3004_v46 = vld [vmem:[%s11346_s0 + $0x28] sm:$0xe] }
  0x79   :  { %v1549_v8 = vor.u32 %v1548_v61, %v1545_v60  ;;  %v1563_v9 = vrot.slane %v1561_v62, 5  ;;  %v1891_v10 = vshll.u32 %v6895_v51, 16  ;;  %v1566_v14 = vrot.slane %v1564_v3, 6  ;;  %v3005_v47 = vld [vmem:[%s11346_s0 + $0x2c] sm:$0x1] }
  0x7a   :  { %1366 = vrot.lane.b32.xlu1 %v6838_v43, %s7529_s23  ;;  %v1558_v13 = vor.u32 %v1557_v1, %v1554_v0  ;;  %v1890_v15 = vrot.slane %v1888_v5, 4  ;;  %v1897_v16 = vshll.u32 %v6896_v57, 16  ;;  %v1541_v18 = vrot.slane %v1540_v7, 4  ;;  %v6667_v52 = vld [vmem:[%s11346_s0 + $0x68] sm:$0xe] }
  0x7b   :  { %v1893_v19 = vrot.slane %v1891_v10, 5  ;;  %v1902_v20 = vshrl.u32 %v6897_v63, 16  ;;  %v1905_v21 = vshll.u32 %v6897_v63, 16  ;;  %v1567_v26 = vor.u32 %v1566_v14, %v1563_v9  ;;  %v6668_v53 = vld [vmem:[%s11346_s0 + $0x6c] sm:$0x1] }
  0x7c   :  { %v1559_v25 = vrot.slane %v1558_v13, 4  ;;  %3880 = vrot.lane.b32.xlu0 %v7460_v56, %s7535_s26  ;;  %v1899_v27 = vrot.slane %v1897_v16, 5  ;;  %v1911_v28 = vshll.u32 %v6898_v4, 16  ;;  %v1550_v30 = vsel %vm7682_vm7, %v1541_v18, %v1549_v8  ;;  %v6669_v54 = vld [vmem:[%s11346_s0 + $0x70] sm:$0xe] }
  0x7d   :  { %v1894_v31 = vor.u32 %v1893_v19, %v1890_v15  ;;  %v1904_v33 = vrot.slane %v1902_v20, 4  ;;  %v1907_v34 = vrot.slane %v1905_v21, 5  ;;  %v7287_v39 = vrot.slane %v7257_v11, 9  ;;  %v6670_v55 = vld [vmem:[%s11346_s0 + $0x74] sm:$0x1] }
  0x7e   :  { %v1568_v37 = vsel %vm7682_vm7, %v1559_v25, %v1567_v26  ;;  %v1913_v38 = vrot.slane %v1911_v28, 5  ;;  %v3984_v40 = vrot.slane %v7258_v12, 5  ;;  %v7288_v45 = vrot.slane %v7259_v17, 9  ;;  %v3186_v1 = vld [vmem:[%s11346_s0 + $0x20] sm:$0xc] }
  0x7f   :  { %v6878_v42 = vcombine.low %v1550_v30, %v1568_v37  ;;  %v1895_v43 = vrot.slane %v1894_v31, 4  ;;  %v1908_v44 = vor.u32 %v1907_v34, %v1904_v33  ;;  %v3988_v49 = vrot.slane %v7260_v22, 5  ;;  %v3187_v8 = vld [vmem:[%s11346_s0 + $0x24] sm:$0x3]  ;;  %v3188_v9 = vld [vmem:[%s11346_s0 + $0x28] sm:$0xc] }
  0x80   :  { %v3985_v48 = vsel %vm7593_vm2, %v7287_v39, %v3984_v40  ;;  %v6961_v50 = vrot.slane %v6935_v23, 9  ;;  %v2174_v51 = vrot.slane %v6936_v24, 5  ;;  %v6962_v59 = vrot.slane %v6937_v29, 9  ;;  %v3189_v14 = vld [vmem:[%s11346_s0 + $0x2c] sm:$0x3] }
  0x81   :  { %1743 = vrot.lane.b32.xlu1 %v6878_v42, %s7534_s30  ;;  %v1900_v56 = vsel %vm7704_vm8, %v1895_v43, %v1899_v27  ;;  %v1909_v57 = vrot.slane %v1908_v44, 4  ;;  %v2178_v60 = vrot.slane %v6938_v35, 5  ;;  %v3989_v61 = vsel %vm7593_vm2, %v7288_v45, %v3988_v49  ;;  %v6723_v15 = vld [vmem:[%s11346_s0 + $0x68] sm:$0xe]  ;;  %v6724_v20 = vld [vmem:[%s11346_s0 + $0x6c] sm:$0x3] }
  0x82   :  { %v2175_v62 = vsel %vm7593_vm2, %v6961_v50, %v2174_v51  ;;  %v7049_v63 = vrot.slane %v3002_v36, 9  ;;  %v3076_v0 = vrot.slane %v3003_v41, 5  ;;  %v7302_v4 = vcombine.low %v3985_v48, %v3989_v61  ;;  %v6725_v25 = vld [vmem:[%s11346_s0 + $0x70] sm:$0xe]  ;;  %v6726_v33 = vld [vmem:[%s11346_s0 + $0x74] sm:$0x3] }
  0x83   :  { %v1914_v3 = vsel %vm7704_vm8, %v1909_v57, %v1913_v38  ;;  %v2179_v5 = vsel %vm7593_vm2, %v6962_v59, %v2178_v60  ;;  %v7050_v7 = vrot.slane %v3004_v46, 9  ;;  %v3080_v13 = vrot.slane %v3005_v47, 5  ;;  %v6763_v36 = vld [vmem:[%s11346_s0 + $0x70] sm:$0xf]  ;;  %v6764_v41 = vld [vmem:[%s11346_s0 + $0x74] sm:$0x1] }
  0x84   :  { %v6918_v10 = vcombine.low %v1900_v56, %v1914_v3  ;;  %v6974_v11 = vcombine.low %v2175_v62, %v2179_v5  ;;  %v3077_v12 = vsel %vm7593_vm2, %v7049_v63, %v3076_v0  ;;  %4064 = vrot.lane.b32.xlu0 %v7302_v4, %s7531_s21  ;;  %v6691_v16 = vrot.slane %v6667_v52, 9  ;;  %v6765_v46 = vld [vmem:[%s11346_s0 + $0x78] sm:$0xf]  ;;  %v6766_v52 = vld [vmem:[%s11346_s0 + $0x7c] sm:$0x1] }
  0x85   :  { %v427_v17 = vrot.slane %v6668_v53, 5  ;;  %v6692_v18 = vrot.slane %v6669_v54, 9  ;;  %v431_v19 = vrot.slane %v6670_v55, 5  ;;  %v3081_v21 = vsel %vm7593_vm2, %v7050_v7, %v3080_v13  ;;  %v7461_v51 = vld [vmem:[%s11346_s0 + $0x30] ss:$8 sps:$4 sm:$0xff]  }
  0x86   :  { %2057 = vrot.lane.b32.xlu1 %v6918_v10, %s7535_s26  ;;  %v7073_v22 = vrot.slane %v3186_v1, 10  ;;  %v3263_v23 = vrot.slane %v3187_v8, 6  ;;  %v7074_v24 = vrot.slane %v3188_v9, 10  ;;  %v7063_v26 = vcombine.low %v3077_v12, %v3081_v21  ;;  %v7125_v57 = vld [vmem:[%s11346_s0 + $0x30] sm:$0xe] }
  0x87   :  { %v428_v27 = vsel %vm7593_vm2, %v6691_v16, %v427_v17  ;;  %v432_v28 = vsel %vm7593_vm2, %v6692_v18, %v431_v19  ;;  %v3267_v29 = vrot.slane %v3189_v14, 6  ;;  %v694_v34 = vshrl.u32 %v6723_v15, 16  ;;  %v7126_v63 = vld [vmem:[%s11346_s0 + $0x34] sm:$0x1]  ;;  %v7127_v0 = vld [vmem:[%s11346_s0 + $0x38] sm:$0xe] }
  0x88   :  { %v6703_v30 = vcombine.low %v428_v27, %v432_v28  ;;  %v3264_v31 = vsel %vm7889_vm11, %v7073_v22, %v3263_v23  ;;  %v697_v35 = vshll.u32 %v6723_v15, 16  ;;  %3150 = vrot.lane.b32.xlu0 %v7063_v26, %s7530_s12  ;;  %v703_v38 = vshrl.u32 %v6724_v20, 16  ;;  %v7128_v7 = vld [vmem:[%s11346_s0 + $0x3c] sm:$0x1]  ;;  %v6803_v12 = vld [vmem:[%s11346_s0 + $0x70] sm:$0xe]  ;;  %v8380_v26 = vpop.permute.xlu0 %481 }
  0x89   :  { %v3268_v37 = vsel %vm7889_vm11, %v7074_v24, %v3267_v29  ;;  %v706_v39 = vshll.u32 %v6724_v20, 16  ;;  %v712_v40 = vshrl.u32 %v6725_v25, 16  ;;  %v696_v43 = vrot.slane %v694_v34, 5  ;;  %v6804_v13 = vld [vmem:[%s11346_s0 + $0x74] sm:$0x1] }
  0x8a   :  { %2242 = vrot.lane.b32.xlu1 %v6974_v11, %s7531_s21  ;;  %v7087_v42 = vcombine.low %v3264_v31, %v3268_v37  ;;  %v699_v44 = vrot.slane %v697_v35, 6  ;;  %v715_v45 = vshll.u32 %v6725_v25, 16  ;;  %v705_v47 = vrot.slane %v703_v38, 5  ;;  %v6805_v18 = vld [vmem:[%s11346_s0 + $0x78] sm:$0xe] }
  0x8b   :  { %v708_v48 = vrot.slane %v706_v39, 6  ;;  %v714_v49 = vrot.slane %v712_v40, 5  ;;  %v721_v50 = vshrl.u32 %v6726_v33, 16  ;;  %v724_v55 = vshll.u32 %v6726_v33, 16  ;;  %v6806_v19 = vld [vmem:[%s11346_s0 + $0x7c] sm:$0x1] }
  0x8c   :  { %v700_v53 = vor.u32 %v699_v44, %v696_v43  ;;  %v717_v54 = vrot.slane %v715_v45, 6  ;;  %v1040_v56 = vshrl.u32 %v6763_v36, 16  ;;  %3337 = vrot.lane.b32.xlu0 %v7087_v42, %s7532_s9  ;;  %v1043_v61 = vshll.u32 %v6763_v36, 16  ;;  %v7181_v24 = vld [vmem:[%s11346_s0 + $0x30] sm:$0xc] }
  0x8d   :  { %v709_v59 = vor.u32 %v708_v48, %v705_v47  ;;  %v723_v60 = vrot.slane %v721_v50, 5  ;;  %v1049_v62 = vshll.u32 %v6764_v41, 16  ;;  %v726_v4 = vrot.slane %v724_v55, 6  ;;  %v7182_v25 = vld [vmem:[%s11346_s0 + $0x34] sm:$0x3] }
  0x8e   :  { %489 = vrot.lane.b32.xlu1 %v6703_v30, %s7530_s12  ;;  %v701_v1 = vrot.slane %v700_v53, 4  ;;  %v718_v3 = vor.u32 %v717_v54, %v714_v49  ;;  %v1042_v5 = vrot.slane %v1040_v56, 4  ;;  %v1045_v8 = vrot.slane %v1043_v61, 5  ;;  %v7183_v31 = vld [vmem:[%s11346_s0 + $0x38] sm:$0xc] }
  0x8f   :  { %v1051_v9 = vrot.slane %v1049_v62, 5  ;;  %v1054_v10 = vshrl.u32 %v6765_v46, 16  ;;  %v1057_v11 = vshll.u32 %v6765_v46, 16  ;;  %v727_v16 = vor.u32 %v726_v4, %v723_v60  ;;  %v7184_v33 = vld [vmem:[%s11346_s0 + $0x3c] sm:$0x3] }
  0x90   :  { %v710_v14 = vsel %vm7682_vm7, %v701_v1, %v709_v59  ;;  %v719_v15 = vrot.slane %v718_v3, 4  ;;  %v1063_v17 = vshll.u32 %v6766_v52, 16  ;;  %3425 = vrot.lane.b32.xlu0 %v7461_v51, %s7533_s22  ;;  %v1046_v20 = vor.u32 %v1045_v8, %v1042_v5  ;;  %v6859_v46 = vld [vmem:[%s11346_s0 + $0x70] sm:$0xe]  ;;  %v6860_v51 = vld [vmem:[%s11346_s0 + $0x74] sm:$0x3]  ;;  %v8428_v8 = vpop.permute.xlu1 %1360 }
  0x91   :  { %v1056_v21 = vrot.slane %v1054_v10, 4  ;;  %v1059_v22 = vrot.slane %v1057_v11, 5  ;;  %v7153_v23 = vrot.slane %v7125_v57, 9  ;;  %v3535_v29 = vrot.slane %v7126_v63, 5  ;;  %v6861_v56 = vld [vmem:[%s11346_s0 + $0x78] sm:$0xe]  ;;  %v8412_v57 = vpop.permute.xlu0 %2236 }
  0x92   :  { %v728_v27 = vsel %vm7682_vm7, %v719_v15, %v727_v16  ;;  %v1065_v28 = vrot.slane %v1063_v17, 5  ;;  %v7154_v30 = vrot.slane %v7127_v0, 9  ;;  %v1047_v35 = vrot.slane %v1046_v20, 4  ;;  %v6862_v62 = vld [vmem:[%s11346_s0 + $0x7c] sm:$0x3]  ;;  %v7462_v5 = vld [vmem:[%s11347_s1] sm:$0xff]  }
  0x93   :  { %v6743_v34 = vcombine.low %v710_v14, %v728_v27  ;;  %v1060_v36 = vor.u32 %v1059_v22, %v1056_v21  ;;  %v3539_v37 = vrot.slane %v7128_v7, 5  ;;  %v3536_v38 = vsel %vm7593_vm2, %v7153_v23, %v3535_v29  ;;  %v6899_v7 = vld [vmem:[%s11346_s0 + $0x78] sm:$0xf]  ;;  %v6900_v14 = vld [vmem:[%s11346_s0 + $0x7c] sm:$0x1]  ;;  %v7474_v15 = vld [vmem:[%s11347_s1 + $0x48] sm:$0xff]  }
  0x94   :  { %v6827_v39 = vrot.slane %v6803_v12, 9  ;;  %v1306_v40 = vrot.slane %v6804_v13, 5  ;;  %v6828_v41 = vrot.slane %v6805_v18, 9  ;;  %v1052_v42 = vsel %vm7704_vm8, %v1047_v35, %v1051_v9  ;;  %v7463_v13 = vld [vmem:[%s11346_s0 + $0x40] ss:$8 sps:$4 sm:$0xff]  }
  0x95   :  { %869 = vrot.lane.b32.xlu1 %v6743_v34, %s7532_s9  ;;  %v1061_v43 = vrot.slane %v1060_v36, 4  ;;  %v3540_v44 = vsel %vm7593_vm2, %v7154_v30, %v3539_v37  ;;  %v1310_v45 = vrot.slane %v6806_v19, 5  ;;  %v7209_v49 = vrot.slane %v7181_v24, 10  ;;  %v6901_v20 = vld [vmem:[%s11346_s0 + $0x80] sm:$0xf]  ;;  %v8457_v35 = vpop.permute.xlu0 %861 }
  0x96   :  { %v7167_v47 = vcombine.low %v3536_v38, %v3540_v44  ;;  %v1307_v48 = vsel %vm7593_vm2, %v6827_v39, %v1306_v40  ;;  %v3719_v50 = vrot.slane %v7182_v25, 6  ;;  %v7210_v54 = vrot.slane %v7183_v31, 10  ;;  %v6902_v24 = vld [vmem:[%s11346_s0 + $0x84] sm:$0x1]  ;;  %v7464_v25 = vld [vmem:[%s11347_s1 + $0x8] sm:$0xff]  }
  0x97   :  { %v1066_v52 = vsel %vm7704_vm8, %v1061_v43, %v1065_v28  ;;  %v1311_v53 = vsel %vm7593_vm2, %v6828_v41, %v1310_v45  ;;  %v3723_v55 = vrot.slane %v7184_v33, 6  ;;  %v1570_v63 = vshrl.u32 %v6859_v46, 16  ;;  %v7261_v33 = vld [vmem:[%s11346_s0 + $0x40] sm:$0xe]  ;;  %v7262_v34 = vld [vmem:[%s11346_s0 + $0x44] sm:$0x1] }
  0x98   :  { %v6783_v59 = vcombine.low %v1052_v42, %v1066_v52  ;;  %3609 = vrot.lane.b32.xlu0 %v7167_v47, %s7529_s23  ;;  %v6839_v60 = vcombine.low %v1307_v48, %v1311_v53  ;;  %v3720_v61 = vsel %vm7889_vm11, %v7209_v49, %v3719_v50  ;;  %v1573_v1 = vshll.u32 %v6859_v46, 16  ;;  %v7263_v40 = vld [vmem:[%s11346_s0 + $0x48] sm:$0xe]  ;;  %v7476_v41 = vld [vmem:[%s11347_s1 + $0x50] sm:$0xff]   ;;  %v7264_v46 = vld [vmem:[%s11346_s0 + $0x4c] sm:$0x1]  ;;  %v8474_v48 = vpop.permute.xlu1 %483 }
  0x99   :  { %v3724_v0 = vsel %vm7889_vm11, %v7210_v54, %v3723_v55  ;;  %v1579_v3 = vshrl.u32 %v6860_v51, 16  ;;  %v1582_v4 = vshll.u32 %v6860_v51, 16  ;;  %v1572_v10 = vrot.slane %v1570_v63, 5  ;;  %v6939_v47 = vld [vmem:[%s11346_s0 + $0x78] sm:$0xe] }
  0x9a   :  { %1183 = vrot.lane.b32.xlu1 %v6783_v59, %s7533_s22  ;;  %v7223_v9 = vcombine.low %v3720_v61, %v3724_v0  ;;  %v1588_v11 = vshrl.u32 %v6861_v56, 16  ;;  %v1591_v12 = vshll.u32 %v6861_v56, 16  ;;  %v1575_v16 = vrot.slane %v1573_v1, 6  ;;  %v6940_v53 = vld [vmem:[%s11346_s0 + $0x7c] sm:$0x1]  ;;  %v7465_v61 = vld [vmem:[%s11347_s1 + $0x10] sm:$0xff]  }
  0x9b   :  { %v1581_v17 = vrot.slane %v1579_v3, 5  ;;  %v1584_v18 = vrot.slane %v1582_v4, 6  ;;  %v1597_v19 = vshrl.u32 %v6862_v62, 16  ;;  %v1600_v23 = vshll.u32 %v6862_v62, 16  ;;  %v6942_v3 = vld [vmem:[%s11346_s0 + $0x84] sm:$0x1] }
  0x9c   :  { %3793 = vrot.lane.b32.xlu0 %v7223_v9, %s7534_s30  ;;  %v1590_v21 = vrot.slane %v1588_v11, 5  ;;  %v1593_v22 = vrot.slane %v1591_v12, 6  ;;  %v1576_v27 = vor.u32 %v1575_v16, %v1572_v10  ;;  %v7536_v30 = vmov 0   ;;  %v3006_v4 = vld [vmem:[%s11346_s0 + $0x30] sm:$0xe] }
  0x9d   :  { %v1585_v28 = vor.u32 %v1584_v18, %v1581_v17  ;;  %v1599_v29 = vrot.slane %v1597_v19, 5  ;;  %2748 = vmatprep.subr.bf16.mxu0 %v7536_v30  ;;  %v1916_v31 = vshrl.u32 %v6899_v7, 16  ;;  %4383 = vmatprep.subr.bf16.mxu1 %v7536_v30  ;;  %v1602_v37 = vrot.slane %v1600_v23, 6  ;;  %v3007_v11 = vld [vmem:[%s11346_s0 + $0x34] sm:$0x1] }
  0x9e   :  { %1368 = vrot.lane.b32.xlu1 %v6839_v60, %s7529_s23  ;;  %v1594_v36 = vor.u32 %v1593_v22, %v1590_v21  ;;  %2749 = vmatpush1.bf16.msra.mxu0 %v7462_v5  ;;  %v1919_v38 = vshll.u32 %v6899_v7, 16  ;;  %v1925_v39 = vshll.u32 %v6900_v14, 16  ;;  %v1577_v42 = vrot.slane %v1576_v27, 4  ;;  %v6941_v60 = vld [vmem:[%s11346_s0 + $0x80] sm:$0xe]  ;;  %v7477_v21 = vld [vmem:[%s11347_s1 + $0x58] sm:$0xff]  }
  0x9f   :  { %v1918_v43 = vrot.slane %v1916_v31, 4  ;;  %v1930_v44 = vshrl.u32 %v6901_v20, 16  ;;  %v1933_v45 = vshll.u32 %v6901_v20, 16  ;;  %2750 = vmatprep.subr.bf16.mxu0 %v7536_v30  ;;  %4384 = vmatpush1.bf16.msra.mxu1 %v7474_v15  ;;  %v1603_v50 = vor.u32 %v1602_v37, %v1599_v29  ;;  %v3008_v12 = vld [vmem:[%s11346_s0 + $0x38] sm:$0xe] }
  0xa0   :  { %v1595_v49 = vrot.slane %v1594_v36, 4  ;;  %3882 = vrot.lane.b32.xlu0 %v7463_v13, %s7535_s26  ;;  %v1921_v51 = vrot.slane %v1919_v38, 5  ;;  %v1927_v52 = vrot.slane %v1925_v39, 5  ;;  %4385 = vmatprep.subr.bf16.mxu1 %v7536_v30  ;;  %v1586_v54 = vsel %vm7682_vm7, %v1577_v42, %v1585_v28  ;;  %v8504_v13 = vpop.permute.xlu0 %1737  ;;  %v3009_v18 = vld [vmem:[%s11346_s0 + $0x3c] sm:$0x1]  ;;  %v8525_v28 = vpop.permute.xlu1 %1175 }
  0xa1   :  { %v1932_v55 = vrot.slane %v1930_v44, 4  ;;  %v1935_v56 = vrot.slane %v1933_v45, 5  ;;  %v1939_v59 = vshll.u32 %v6902_v24, 16  ;;  %v7289_v0 = vrot.slane %v7261_v33, 9  ;;  %v6671_v19 = vld [vmem:[%s11346_s0 + $0x78] sm:$0xe] }
  0xa2   :  { %v1604_v62 = vsel %vm7682_vm7, %v1595_v49, %v1603_v50  ;;  %v1922_v63 = vor.u32 %v1921_v51, %v1918_v43  ;;  %2751 = vmatpush1.bf16.msra.mxu0 %v7464_v25  ;;  %v3992_v1 = vrot.slane %v7262_v34, 5  ;;  %v7290_v10 = vrot.slane %v7263_v40, 9  ;;  %v7466_v20 = vld [vmem:[%s11347_s1 + $0x18] sm:$0xff]   ;;  %v6673_v36 = vld [vmem:[%s11346_s0 + $0x80] sm:$0xe] }
  0xa3   :  { %v6879_v5 = vcombine.low %v1586_v54, %v1604_v62  ;;  %v1936_v7 = vor.u32 %v1935_v56, %v1932_v55  ;;  %v1941_v9 = vrot.slane %v1939_v59, 5  ;;  %2752 = vmatprep.subr.bf16.mxu0 %v7536_v30  ;;  %4386 = vmatpush1.bf16.msra.mxu1 %v7476_v41  ;;  %v3996_v16 = vrot.slane %v7264_v46, 5  ;;  %v6672_v27 = vld [vmem:[%s11346_s0 + $0x7c] sm:$0x1]  ;;  %v6674_v41 = vld [vmem:[%s11346_s0 + $0x84] sm:$0x1] }
  0xa4   :  { %v1923_v14 = vrot.slane %v1922_v63, 4  ;;  %v3993_v15 = vsel %vm7593_vm2, %v7289_v0, %v3992_v1  ;;  %v6963_v17 = vrot.slane %v6939_v47, 9  ;;  %4387 = vmatprep.subr.bf16.mxu1 %v7536_v30  ;;  %v2182_v23 = vrot.slane %v6940_v53, 5  ;;  %v6611_v42 = vld [vmem:[%s11346_s0 + $0x8] sm:$0xf]  ;;  %v7479_v49 = vld [vmem:[%s11347_s1 + $0x60] sm:$0xff]   ;;  %v8565_v56 = vpop.permute.xlu0 %863 }
  0xa5   :  { %1745 = vrot.lane.b32.xlu1 %v6879_v5, %s7534_s30  ;;  %v1937_v22 = vrot.slane %v1936_v7, 4  ;;  %v6964_v24 = vrot.slane %v6941_v60, 9  ;;  %v2186_v25 = vrot.slane %v6942_v3, 5  ;;  %v3997_v31 = vsel %vm7593_vm2, %v7290_v10, %v3996_v16  ;;  %v6612_v46 = vld [vmem:[%s11346_s0 + $0xc] sm:$0x1]  ;;  %v7467_v55 = vld [vmem:[%s11347_s1 + $0x20] sm:$0xff]   ;;  %v8586_v10 = vpop.permute.xlu1 %2051 }
  0xa6   :  { %v1928_v29 = vsel %vm7704_vm8, %v1923_v14, %v1927_v52  ;;  %2753 = vmatpush1.bf16.msra.mxu0 %v7465_v61  ;;  %v7051_v33 = vrot.slane %v3006_v4, 9  ;;  %v3084_v34 = vrot.slane %v3007_v11, 5  ;;  %v7303_v38 = vcombine.low %v3993_v15, %v3997_v31  ;;  %v6613_v47 = vld [vmem:[%s11346_s0 + $0x10] sm:$0xf]  ;;  %v6614_v54 = vld [vmem:[%s11346_s0 + $0x14] sm:$0x1] }
  0xa7   :  { %v1942_v37 = vsel %vm7704_vm8, %v1937_v22, %v1941_v9  ;;  %v2183_v39 = vsel %vm7593_vm2, %v6963_v17, %v2182_v23  ;;  %v2187_v40 = vsel %vm7593_vm2, %v6964_v24, %v2186_v25  ;;  %2754 = vmatprep.subr.bf16.mxu0 %v7536_v30  ;;  %v7052_v45 = vrot.slane %v3008_v12, 9  ;;  %4388 = vmatpush1.bf16.msra.mxu1 %v7477_v21  ;;  %v3190_v63 = vld [vmem:[%s11346_s0 + $0x30] sm:$0xc]  ;;  %v7480_v0 = vld [vmem:[%s11347_s1 + $0x68] sm:$0xff]   ;;  %v3191_v7 = vld [vmem:[%s11346_s0 + $0x34] sm:$0x3] }
  0xa8   :  { %v6919_v43 = vcombine.low %v1928_v29, %v1942_v37  ;;  %v3085_v44 = vsel %vm7593_vm2, %v7051_v33, %v3084_v34  ;;  %4066 = vrot.lane.b32.xlu0 %v7303_v38, %s7531_s21  ;;  %v3088_v50 = vrot.slane %v3009_v18, 5  ;;  %v6693_v51 = vrot.slane %v6671_v19, 9  ;;  %4389 = vmatprep.subr.bf16.mxu1 %v7536_v30  ;;  %v3192_v9 = vld [vmem:[%s11346_s0 + $0x38] sm:$0xc]  ;;  %v3193_v16 = vld [vmem:[%s11346_s0 + $0x3c] sm:$0x3]  ;;  %v8610_v37 = vpop.permute.xlu0 %1362 }
  0xa9   :  { %v435_v52 = vrot.slane %v6672_v27, 5  ;;  %v6694_v53 = vrot.slane %v6673_v36, 9  ;;  %v6975_v59 = vcombine.low %v2183_v39, %v2187_v40  ;;  %v439_v60 = vrot.slane %v6674_v41, 5  ;;  %v6727_v17 = vld [vmem:[%s11346_s0 + $0x78] sm:$0xe]  ;;  %v7469_v29 = vld [vmem:[%s11347_s1 + $0x28] sm:$0xff]  }
  0xaa   :  { %2059 = vrot.lane.b32.xlu1 %v6919_v43, %s7535_s26  ;;  %2755 = vmatpush1.bf16.msra.mxu0 %v7466_v20  ;;  %v62_v61 = vshrl.u32 %v6611_v42, 16  ;;  %v65_v62 = vshll.u32 %v6611_v42, 16  ;;  %v3089_v1 = vsel %vm7593_vm2, %v7052_v45, %v3088_v50  ;;  %v71_v4 = vshll.u32 %v6612_v46, 16  ;;  %v6728_v22 = vld [vmem:[%s11346_s0 + $0x7c] sm:$0x3] }
  0xab   :  { %v436_v3 = vsel %vm7593_vm2, %v6693_v51, %v435_v52  ;;  %v76_v5 = vshrl.u32 %v6613_v47, 16  ;;  %2756 = vmatprep.subr.bf16.mxu0 %v7536_v30  ;;  %v7064_v11 = vcombine.low %v3085_v44, %v3089_v1  ;;  %v440_v12 = vsel %vm7593_vm2, %v6694_v53, %v439_v60  ;;  %4390 = vmatpush1.bf16.msra.mxu1 %v7479_v49  ;;  %v6729_v27 = vld [vmem:[%s11346_s0 + $0x80] sm:$0xe]  ;;  %v6730_v45 = vld [vmem:[%s11346_s0 + $0x84] sm:$0x3]  ;;  %v7481_v49 = vld [vmem:[%s11347_s1 + $0x70] sm:$0xff]  }
  0xac   :  { %v64_v14 = vrot.slane %v62_v61, 4  ;;  %v67_v15 = vrot.slane %v65_v62, 5  ;;  %v6704_v18 = vcombine.low %v436_v3, %v440_v12  ;;  %v8596_v19 = vrot.slane %v71_v4, 5  ;;  %4391 = vmatprep.subr.bf16.mxu1 %v7536_v30 }
  0xad   :  { %v78_v20 = vrot.slane %v76_v5, 4  ;;  %v79_v21 = vshll.u32 %v6613_v47, 16  ;;  %3152 = vrot.lane.b32.xlu0 %v7064_v11, %s7530_s12  ;;  %vm505_vm12 = vcmask 261248   ;;  %v85_v24 = vshll.u32 %v6614_v54, 16  ;;  %v8620_v47 = vpop.permute.xlu1 %1177  ;;  %v6615_v54 = vld [vmem:[%s11346_s0 + $0x18] sm:$0xf] }
  0xae   :  { %2244 = vrot.lane.b32.xlu1 %v6975_v59, %s7531_s21  ;;  %v68_v23 = vor.u32 %v67_v15, %v64_v14  ;;  %vm317_vm13 = vcmask 130048   ;;  %v7075_v25 = vrot.slane %v3190_v63, 10  ;;  %v3271_v33 = vrot.slane %v3191_v7, 6  ;;  %2757 = vmatpush1.bf16.msra.mxu0 %v7467_v55  ;;  %v7470_v55 = vld [vmem:[%s11347_s1 + $0x30] sm:$0xff]   ;;  %v6616_v63 = vld [vmem:[%s11346_s0 + $0x1c] sm:$0x1] }
  0xaf   :  { %v81_v31 = vrot.slane %v79_v21, 5  ;;  %v7076_v34 = vrot.slane %v3192_v9, 10  ;;  %v3275_v36 = vrot.slane %v3193_v16, 6  ;;  %v87_v39 = vrot.slane %v85_v24, 5  ;;  %2758 = vmatprep.subr.bf16.mxu0 %v7536_v30  ;;  %4392 = vmatpush1.bf16.msra.mxu1 %v7480_v0  ;;  %v6617_v0 = vld [vmem:[%s11346_s0 + $0x20] sm:$0xf] }
  0xb0   :  { %v69_v38 = vrot.slane %v68_v23, 4  ;;  %v730_v40 = vshrl.u32 %v6727_v17, 16  ;;  %v733_v41 = vshll.u32 %v6727_v17, 16  ;;  %v3272_v43 = vsel %vm7889_vm11, %v7075_v25, %v3271_v33  ;;  %4393 = vmatprep.subr.bf16.mxu1 %v7536_v30  ;;  %v7468_v14 = vld [vmem:[%s11346_s0 + $0x40] ss:$8 sps:$4 sm:$0xff]   ;;  %v7483_v16 = vld [vmem:[%s11347_s1 + $0x78] sm:$0xff]  }
  0xb1   :  { %v82_v42 = vor.u32 %v81_v31, %v78_v20  ;;  %v3276_v44 = vsel %vm7889_vm11, %v7076_v34, %v3275_v36  ;;  %v739_v46 = vshrl.u32 %v6728_v22, 16  ;;  %v742_v61 = vshll.u32 %v6728_v22, 16  ;;  %v6618_v21 = vld [vmem:[%s11346_s0 + $0x24] sm:$0x1]  ;;  %v8664_v31 = vpop.permute.xlu1 %1739 }
  0xb2   :  { %491 = vrot.lane.b32.xlu1 %v6704_v18, %s7530_s12  ;;  %v74_v50 = vsel %vm7704_vm8, %v69_v38, %v8596_v19  ;;  %v7088_v51 = vcombine.low %v3272_v43, %v3276_v44  ;;  %v732_v52 = vrot.slane %v730_v40, 5  ;;  %v735_v53 = vrot.slane %v733_v41, 6  ;;  %2759 = vmatpush1.bf16.msra.mxu0 %v7469_v29  ;;  %v8649_v15 = vpop.permute.xlu0 %2053  ;;  %v7471_v29 = vld [vmem:[%s11347_s1 + $0x38] sm:$0xff]   ;;  %v7484_v40 = vld [vmem:[%s11347_s1 + $0x80] sm:$0xff]  }
  0xb3   :  { %v83_v59 = vrot.slane %v82_v42, 4  ;;  %v741_v60 = vrot.slane %v739_v46, 5  ;;  %v748_v62 = vshrl.u32 %v6729_v27, 16  ;;  %v751_v3 = vshll.u32 %v6729_v27, 16  ;;  %2760 = vmatprep.subr.bf16.mxu0 %v7536_v30  ;;  %4394 = vmatpush1.bf16.msra.mxu1 %v7481_v49  ;;  %v6767_v27 = vld [vmem:[%s11346_s0 + $0x80] sm:$0xf] }
  0xb4   :  { %3339 = vrot.lane.b32.xlu0 %v7088_v51, %s7532_s9  ;;  %v736_v1 = vor.u32 %v735_v53, %v732_v52  ;;  %v757_v4 = vshrl.u32 %v6730_v45, 16  ;;  %v760_v5 = vshll.u32 %v6730_v45, 16  ;;  %v744_v9 = vrot.slane %v742_v61, 6  ;;  %4395 = vmatprep.subr.bf16.mxu1 %v7536_v30  ;;  %v6769_v45 = vld [vmem:[%s11346_s0 + $0x88] sm:$0xf] }
  0xb5   :  { %v88_v7 = vsel %vm7704_vm8, %v83_v59, %v87_v39  ;;  %v750_v11 = vrot.slane %v748_v62, 5  ;;  %v90_v12 = vshrl.u32 %v6615_v54, 16  ;;  %v753_v19 = vrot.slane %v751_v3, 6  ;;  %v6768_v39 = vld [vmem:[%s11346_s0 + $0x84] sm:$0x1] }
  0xb6   :  { %v6643_v17 = vcombine.low %v74_v50, %v88_v7  ;;  %v737_v18 = vrot.slane %v736_v1, 4  ;;  %v759_v20 = vrot.slane %v757_v4, 5  ;;  %v745_v22 = vor.u32 %v744_v9, %v741_v60  ;;  %2761 = vmatpush1.bf16.msra.mxu0 %v7470_v55  ;;  %v7473_v59 = vld [vmem:[%s11347_s1 + $0x40] sm:$0xff]   ;;  %v8689_v60 = vpop.permute.xlu0 %3146 }
  0xb7   :  { %v762_v23 = vrot.slane %v760_v5, 6  ;;  %v92_v24 = vrot.slane %v90_v12, 4  ;;  %v93_v25 = vshll.u32 %v6615_v54, 16  ;;  %v754_v33 = vor.u32 %v753_v19, %v750_v11  ;;  %2762 = vmatprep.subr.bf16.mxu0 %v7536_v30  ;;  %4396 = vmatpush1.bf16.msra.mxu1 %v7483_v16  ;;  %v7129_v1 = vld [vmem:[%s11346_s0 + $0x40] sm:$0xe]  ;;  %v7486_v16 = vld [vmem:[%s11347_s1 + $0x88] sm:$0xff]  }
  0xb8   :  { %318 = vst.msk [vmem:[#allocation3] sm:$0xff] %vm317_vm13, %v6643_v17  ;;  %v99_v34 = vshll.u32 %v6616_v63, 16  ;;  %v104_v36 = vshrl.u32 %v6617_v0, 16  ;;  %v107_v38 = vshll.u32 %v6617_v0, 16  ;;  %3427 = vrot.lane.b32.xlu0 %v7468_v14, %s7533_s22  ;;  %v746_v41 = vsel %vm7682_vm7, %v737_v18, %v745_v22  ;;  %4397 = vmatprep.subr.bf16.mxu1 %v7536_v30  ;;  %v7130_v3 = vld [vmem:[%s11346_s0 + $0x44] sm:$0x1]  ;;  %v8706_v14 = vpop.permute.xlu1 %2238 }
  0xb9   :  { %506 = vst.msk [vmem:[#allocation3] sm:$0xff] %vm505_vm12, %v8380_v26  ;;  %v763_v42 = vor.u32 %v762_v23, %v759_v20  ;;  %v95_v43 = vrot.slane %v93_v25, 5  ;;  %v113_v44 = vshll.u32 %v6618_v21, 16  ;;  %v755_v46 = vrot.slane %v754_v33, 4  ;;  %v6770_v26 = vld [vmem:[%s11346_s0 + $0x8c] sm:$0x1] }
  0xba   :  { %v101_v49 = vrot.slane %v99_v34, 5  ;;  %v106_v50 = vrot.slane %v104_v36, 4  ;;  %v109_v51 = vrot.slane %v107_v38, 5  ;;  %v1068_v54 = vshrl.u32 %v6767_v27, 16  ;;  %2763 = vmatpush1.bf16.msra.mxu0 %v7471_v29  ;;  %v7131_v11 = vld [vmem:[%s11346_s0 + $0x48] sm:$0xe] }
  0xbb   :  { %v96_v52 = vor.u32 %v95_v43, %v92_v24  ;;  %v115_v53 = vrot.slane %v113_v44, 5  ;;  %v1071_v55 = vshll.u32 %v6767_v27, 16  ;;  %v764_v61 = vsel %vm7682_vm7, %v755_v46, %v763_v42  ;;  %2764 = vmatprep.subr.bf16.mxu0 %v7536_v30  ;;  %v7132_v12 = vld [vmem:[%s11346_s0 + $0x4c] sm:$0x1]  ;;  %4398 = vmatpush1.bf16.msra.mxu1 %v7484_v40  ;;  %v6807_v21 = vld [vmem:[%s11346_s0 + $0x80] sm:$0xe] }
  0xbc   :  { %v110_v62 = vor.u32 %v109_v51, %v106_v50  ;;  %v1077_v63 = vshll.u32 %v6768_v39, 16  ;;  %v1082_v0 = vshrl.u32 %v6769_v45, 16  ;;  %v6744_v4 = vcombine.low %v746_v41, %v764_v61  ;;  %4399 = vmatprep.subr.bf16.mxu1 %v7536_v30  ;;  %v6808_v25 = vld [vmem:[%s11346_s0 + $0x84] sm:$0x1]  ;;  %v6809_v27 = vld [vmem:[%s11346_s0 + $0x88] sm:$0xe]  ;;  %v8733_v41 = vpop.permute.xlu0 %3333 }
  0xbd   :  { %v97_v5 = vrot.slane %v96_v52, 4  ;;  %v1070_v7 = vrot.slane %v1068_v54, 4  ;;  %v1073_v9 = vrot.slane %v1071_v55, 5  ;;  %v1085_v20 = vshll.u32 %v6769_v45, 16  ;;  %v6810_v34 = vld [vmem:[%s11346_s0 + $0x8c] sm:$0x1]  ;;  %v8746_v52 = vpop.permute.xlu1 %485 }
  0xbe   :  { %v111_v17 = vrot.slane %v110_v62, 4  ;;  %v1079_v18 = vrot.slane %v1077_v63, 5  ;;  %v1084_v19 = vrot.slane %v1082_v0, 4  ;;  %871 = vrot.lane.b32.xlu1 %v6744_v4, %s7532_s9  ;;  %v1091_v24 = vshll.u32 %v6770_v26, 16  ;;  %2765 = vmatpush1.bf16.msra.mxu0 %v7473_v59  ;;  %v7186_v51 = vld [vmem:[%s11346_s0 + $0x44] sm:$0x3] }
  0xbf   :  { %v102_v22 = vsel %vm7704_vm8, %v97_v5, %v101_v49  ;;  %v1074_v23 = vor.u32 %v1073_v9, %v1070_v7  ;;  %vm885_vm14 = vcmask 392448   ;;  %v1087_v29 = vrot.slane %v1085_v20, 5  ;;  %4400 = vmatpush1.bf16.msra.mxu1 %v7486_v16  ;;  %v7187_v55 = vld [vmem:[%s11346_s0 + $0x48] sm:$0xc]  ;;  %v6863_v62 = vld [vmem:[%s11346_s0 + $0x80] sm:$0xe] }
  0xc0   :  { %v116_v30 = vsel %vm7704_vm8, %v111_v17, %v115_v53  ;;  %886 = vst.msk [vmem:[#allocation3] sm:$0xff] %vm885_vm14, %v8457_v35  ;;  %vm1199_vm15 = vcmask 523648   ;;  %v7155_v33 = vrot.slane %v7129_v1, 9  ;;  %v1093_v39 = vrot.slane %v1091_v24, 5  ;;  %v6864_v1 = vld [vmem:[%s11346_s0 + $0x84] sm:$0x3]  ;;  %v8789_v9 = vpop.permute.xlu0 %3421 }
  0xc1   :  { %v6644_v36 = vcombine.low %v102_v22, %v116_v30  ;;  %v1075_v38 = vrot.slane %v1074_v23, 4  ;;  %1200 = vst.msk [vmem:[#allocation3] sm:$0xff] %vm1199_vm15, %v8525_v28  ;;  %v3543_v40 = vrot.slane %v7130_v3, 5  ;;  %v1088_v42 = vor.u32 %v1087_v29, %v1084_v19  ;;  %v7185_v28 = vld [vmem:[%s11346_s0 + $0x40] sm:$0xc]  ;;  %v8800_v19 = vpop.permute.xlu1 %865 }
  0xc2   :  { %v7156_v43 = vrot.slane %v7131_v11, 9  ;;  %v3547_v44 = vrot.slane %v7132_v12, 5  ;;  %v6829_v35 = vrot.slane %v6807_v21, 9  ;;  %v1314_v49 = vrot.slane %v6808_v25, 5  ;;  %v6865_v3 = vld [vmem:[%s11346_s0 + $0x88] sm:$0xe] }
  0xc3   :  { %319 = vst.msk [vmem:[#allocation3 + $0x10] sm:$0xff] %vm317_vm13, %v6644_v36  ;;  %v1080_v45 = vsel %vm7704_vm8, %v1075_v38, %v1079_v18  ;;  %v3544_v46 = vsel %vm7593_vm2, %v7155_v33, %v3543_v40  ;;  %v6830_v50 = vrot.slane %v6809_v27, 9  ;;  %v1089_v53 = vrot.slane %v1088_v42, 4  ;;  %v6866_v7 = vld [vmem:[%s11346_s0 + $0x8c] sm:$0x3] }
  0xc4   :  { %507 = vst.msk [vmem:[#allocation3 + $0x10] sm:$0xff] %vm505_vm12, %v8474_v48  ;;  %v3548_v26 = vsel %vm7593_vm2, %v7156_v43, %v3547_v44  ;;  %v1318_v54 = vrot.slane %v6810_v34, 5  ;;  %vm1384_vm0 = vcmask 654848   ;;  %v1315_v61 = vsel %vm7593_vm2, %v6829_v35, %v1314_v49  ;;  %v7188_v48 = vld [vmem:[%s11346_s0 + $0x4c] sm:$0x3]  ;;  %v8823_v43 = vpop.permute.xlu0 %3605 }
  0xc5   :  { %v7168_v59 = vcombine.low %v3544_v46, %v3548_v26  ;;  %vm1761_vm1 = vcmask 786048   ;;  %1385 = vst.msk [vmem:[#allocation3] sm:$0xff] %vm1384_vm0, %v8428_v8  ;;  %vm2075_vm3 = vcmask 917248   ;;  %v1094_v63 = vsel %vm7704_vm8, %v1089_v53, %v1093_v39  ;;  %v7472_v27 = vld [vmem:[%s11346_s0 + $0x50] ss:$8 sps:$4 sm:$0xff]   ;;  %v8825_v53 = vpop.permute.xlu1 %1179 }
  0xc6   :  { %887 = vst.msk [vmem:[#allocation3 + $0x10] sm:$0xff] %vm885_vm14, %v8565_v56  ;;  %v1319_v0 = vsel %vm7593_vm2, %v6830_v50, %v1318_v54  ;;  %vm2260_vm4 = vcmask 1048448   ;;  %v7211_v8 = vrot.slane %v7185_v28, 10  ;;  %v6784_v56 = vcombine.low %v1080_v45, %v1094_v63  ;;  %v6903_v33 = vld [vmem:[%s11346_s0 + $0x88] sm:$0xf] }
  0xc7   :  { %1762 = vst.msk [vmem:[#allocation3] sm:$0xff] %vm1761_vm1, %v8504_v13  ;;  %3611 = vrot.lane.b32.xlu0 %v7168_v59, %s7529_s23  ;;  %v6840_v4 = vcombine.low %v1315_v61, %v1319_v0  ;;  %v3727_v13 = vrot.slane %v7186_v51, 6  ;;  %v7212_v5 = vrot.slane %v7187_v55, 10  ;;  %v1606_v11 = vshrl.u32 %v6863_v62, 16  ;;  %v6904_v34 = vld [vmem:[%s11346_s0 + $0x8c] sm:$0x1] }
  0xc8   :  { %1201 = vst.msk [vmem:[#allocation3 + $0x10] sm:$0xff] %vm1199_vm15, %v8620_v47  ;;  %v3731_v47 = vrot.slane %v7188_v48, 6  ;;  %v1609_v12 = vshll.u32 %v6863_v62, 16  ;;  %v1615_v16 = vshrl.u32 %v6864_v1, 16  ;;  %1185 = vrot.lane.b32.xlu1 %v6784_v56, %s7533_s22  ;;  %v1618_v17 = vshll.u32 %v6864_v1, 16 }
  0xc9   :  { %2076 = vst.msk [vmem:[#allocation3] sm:$0xff] %vm2075_vm3, %v8586_v10  ;;  %v3728_v10 = vsel %vm7889_vm11, %v7211_v8, %v3727_v13  ;;  %v1624_v18 = vshrl.u32 %v6865_v3, 16  ;;  %v1608_v20 = vrot.slane %v1606_v11, 5  ;;  %v1633_v30 = vshrl.u32 %v6866_v7, 16  ;;  %v6905_v38 = vld [vmem:[%s11346_s0 + $0x90] sm:$0xf] }
  0xca   :  { %1386 = vst.msk [vmem:[#allocation3 + $0x10] sm:$0xff] %vm1384_vm0, %v8610_v37  ;;  %v1627_v37 = vshll.u32 %v6865_v3, 16  ;;  %v1611_v21 = vrot.slane %v1609_v12, 6  ;;  %v1617_v22 = vrot.slane %v1615_v16, 5  ;;  %v1620_v23 = vrot.slane %v1618_v17, 6  ;;  %v8844_v12 = vpop.permute.xlu0 %3789 }
  0xcb   :  { %2261 = vst.msk [vmem:[#allocation3] sm:$0xff] %vm2260_vm4, %v8412_v57  ;;  %v3732_v57 = vsel %vm7889_vm11, %v7212_v5, %v3731_v47  ;;  %v1626_v24 = vrot.slane %v1624_v18, 5  ;;  %v1636_v29 = vshll.u32 %v6866_v7, 16  ;;  %v6906_v39 = vld [vmem:[%s11346_s0 + $0x94] sm:$0x1]  ;;  %v1944_v40 = vshrl.u32 %v6903_v33, 16 }
  0xcc   :  { %1763 = vst.msk [vmem:[#allocation3 + $0x10] sm:$0xff] %vm1761_vm1, %v8664_v31  ;;  %v7224_v31 = vcombine.low %v3728_v10, %v3732_v57  ;;  %v1629_v25 = vrot.slane %v1627_v37, 6  ;;  %1370 = vrot.lane.b32.xlu1 %v6840_v4, %s7529_s23  ;;  %v1947_v42 = vshll.u32 %v6903_v33, 16  ;;  %v1635_v35 = vrot.slane %v1633_v30, 5  ;;  %v6979_v59 = vld [vmem:[%s11346_s0 + $0x18] sm:$0xe] }
  0xcd   :  { %2077 = vst.msk [vmem:[#allocation3 + $0x10] sm:$0xff] %vm2075_vm3, %v8649_v15  ;;  %v1612_v15 = vor.u32 %v1611_v21, %v1608_v20  ;;  %v1638_v45 = vrot.slane %v1636_v29, 6  ;;  %v1953_v46 = vshll.u32 %v6904_v34, 16  ;;  %v1946_v50 = vrot.slane %v1944_v40, 4  ;;  %v6980_v61 = vld [vmem:[%s11346_s0 + $0x1c] sm:$0x3] }
  0xce   :  { %2262 = vst.msk [vmem:[#allocation3 + $0x10] sm:$0xff] %vm2260_vm4, %v8706_v14  ;;  %3795 = vrot.lane.b32.xlu0 %v7224_v31, %s7534_s30  ;;  %v1621_v14 = vor.u32 %v1620_v23, %v1617_v22  ;;  %v1630_v36 = vor.u32 %v1629_v25, %v1626_v24  ;;  %v1949_v28 = vrot.slane %v1947_v42, 5  ;;  %v1958_v51 = vshrl.u32 %v6905_v38, 16  ;;  %v6981_v3 = vld [vmem:[%s11346_s0 + $0x20] sm:$0xe]  ;;  %v8855_v23 = vpop.permute.xlu1 %1364 }
  0xcf   :  { %v1613_v44 = vrot.slane %v1612_v15, 4  ;;  %v1639_v54 = vor.u32 %v1638_v45, %v1635_v35  ;;  %v1961_v55 = vshll.u32 %v6905_v38, 16  ;;  %v1955_v62 = vrot.slane %v1953_v46, 5  ;;  %v6982_v47 = vld [vmem:[%s11346_s0 + $0x24] sm:$0x3] }
  0xd0   :  { %v1631_v49 = vrot.slane %v1630_v36, 4  ;;  %v1950_v48 = vor.u32 %v1949_v28, %v1946_v50  ;;  %v1960_v63 = vrot.slane %v1958_v51, 4  ;;  %v1967_v0 = vshll.u32 %v6906_v39, 16  ;;  %v7309_v37 = vld [vmem:[%s11346_s0 + $0x20] sm:$0xc] }
  0xd1   :  { %v1622_v26 = vsel %vm7682_vm7, %v1613_v44, %v1621_v14  ;;  %v1963_v1 = vrot.slane %v1961_v55, 5  ;;  %v2302_v56 = vshrl.u32 %v6979_v59, 16  ;;  %v2305_v4 = vshll.u32 %v6979_v59, 16  ;;  %v7310_v31 = vld [vmem:[%s11346_s0 + $0x24] sm:$0x3] }
  0xd2   :  { %3884 = vrot.lane.b32.xlu0 %v7472_v27, %s7535_s26  ;;  %v1640_v8 = vsel %vm7682_vm7, %v1631_v49, %v1639_v54  ;;  %v1951_v5 = vrot.slane %v1950_v48, 4  ;;  %v1969_v7 = vrot.slane %v1967_v0, 5  ;;  %v2311_v11 = vshrl.u32 %v6980_v61, 16  ;;  %v7311_v30 = vld [vmem:[%s11346_s0 + $0x28] sm:$0xc]  ;;  %v8880_v54 = vpop.permute.xlu0 %3878 }
  0xd3   :  { %v6880_v13 = vcombine.low %v1622_v26, %v1640_v8  ;;  %v1964_v16 = vor.u32 %v1963_v1, %v1960_v63  ;;  %v2304_v10 = vrot.slane %v2302_v56, 5  ;;  %v2307_v17 = vrot.slane %v2305_v4, 6  ;;  %v7312_v14 = vld [vmem:[%s11346_s0 + $0x2c] sm:$0x3]  ;;  %v7265_v38 = vld [vmem:[%s11346_s0 + $0x50] sm:$0xe] }
  0xd4   :  { %v2314_v18 = vshll.u32 %v6980_v61, 16  ;;  %v1956_v57 = vsel %vm7704_vm8, %v1951_v5, %v1955_v62  ;;  %v2313_v20 = vrot.slane %v2311_v11, 5  ;;  %v2320_v21 = vshrl.u32 %v6981_v3, 16  ;;  %v7266_v35 = vld [vmem:[%s11346_s0 + $0x54] sm:$0x1] }
  0xd5   :  { %1747 = vrot.lane.b32.xlu1 %v6880_v13, %s7534_s30  ;;  %v2323_v22 = vshll.u32 %v6981_v3, 16  ;;  %v1965_v24 = vrot.slane %v1964_v16, 4  ;;  %v2308_v25 = vor.u32 %v2307_v17, %v2304_v10  ;;  %v2329_v15 = vshrl.u32 %v6982_v47, 16  ;;  %v7267_v45 = vld [vmem:[%s11346_s0 + $0x58] sm:$0xe]  ;;  %v8894_v3 = vpop.permute.xlu1 %1741 }
  0xd6   :  { %v2316_v27 = vrot.slane %v2314_v18, 6  ;;  %v2322_v29 = vrot.slane %v2320_v21, 5  ;;  %v2332_v34 = vshll.u32 %v6982_v47, 16  ;;  %v7341_v36 = vrot.slane %v7309_v37, 10  ;;  %v7268_v51 = vld [vmem:[%s11346_s0 + $0x5c] sm:$0x1] }
  0xd7   :  { %v2325_v33 = vrot.slane %v2323_v22, 6  ;;  %v1970_v39 = vsel %vm7704_vm8, %v1965_v24, %v1969_v7  ;;  %v2309_v40 = vrot.slane %v2308_v25, 4  ;;  %v2331_v44 = vrot.slane %v2329_v15, 5  ;;  %v6943_v26 = vld [vmem:[%s11346_s0 + $0x88] sm:$0xe] }
  0xd8   :  { %v2317_v42 = vor.u32 %v2316_v27, %v2313_v20  ;;  %v6920_v46 = vcombine.low %v1956_v57, %v1970_v39  ;;  %v2334_v50 = vrot.slane %v2332_v34, 6  ;;  %v4160_v28 = vrot.slane %v7310_v31, 6  ;;  %v6944_v61 = vld [vmem:[%s11346_s0 + $0x8c] sm:$0x1]  ;;  %v6945_v48 = vld [vmem:[%s11346_s0 + $0x90] sm:$0xe] }
  0xd9   :  { %v2326_v49 = vor.u32 %v2325_v33, %v2322_v29  ;;  %v7342_v55 = vrot.slane %v7311_v30, 10  ;;  %v7291_v59 = vrot.slane %v7265_v38, 9  ;;  %v4000_v8 = vrot.slane %v7266_v35, 5  ;;  %v6946_v1 = vld [vmem:[%s11346_s0 + $0x94] sm:$0x1]  ;;  %v8926_v29 = vpop.permute.xlu0 %4062 }
  0xda   :  { %2061 = vrot.lane.b32.xlu1 %v6920_v46, %s7535_s26  ;;  %v2318_v62 = vsel %vm7682_vm7, %v2309_v40, %v2317_v42  ;;  %v2335_v0 = vor.u32 %v2334_v50, %v2331_v44  ;;  %v4164_v56 = vrot.slane %v7312_v14, 6  ;;  %v7292_v4 = vrot.slane %v7267_v45, 9  ;;  %v3010_v10 = vld [vmem:[%s11346_s0 + $0x60] sm:$0xe]  ;;  %v3011_v17 = vld [vmem:[%s11346_s0 + $0x64] sm:$0x1]  ;;  %v8942_v46 = vpop.permute.xlu1 %2055 }
  0xdb   :  { %v2327_v63 = vrot.slane %v2326_v49, 4  ;;  %v4004_v13 = vrot.slane %v7268_v51, 5  ;;  %v6965_v5 = vrot.slane %v6943_v26, 9  ;;  %v8900_v47 = vsel %vm7889_vm11, %v7341_v36, %v4160_v28  ;;  %v3012_v21 = vld [vmem:[%s11346_s0 + $0x68] sm:$0xe]  ;;  %v2629_v42 = vld [vmem:[#allocation3] sm:$0xff] }
  0xdc   :  { %v4001_v11 = vsel %vm7593_vm2, %v7291_v59, %v4000_v8  ;;  %v2190_v16 = vrot.slane %v6944_v61, 5  ;;  %v6966_v57 = vrot.slane %v6945_v48, 9  ;;  %v2194_v20 = vrot.slane %v6946_v1, 5  ;;  %v3013_v22 = vld [vmem:[%s11346_s0 + $0x6c] sm:$0x1] }
  0xdd   :  { %v2336_v7 = vsel %vm7682_vm7, %v2327_v63, %v2335_v0  ;;  %v4005_v37 = vsel %vm7593_vm2, %v7292_v4, %v4004_v13  ;;  %v7053_v25 = vrot.slane %v3010_v10, 9  ;;  %v3092_v27 = vrot.slane %v3011_v17, 5  ;;  %v6675_v15 = vld [vmem:[%s11346_s0 + $0x88] sm:$0xe]  ;;  %v6676_v30 = vld [vmem:[%s11346_s0 + $0x8c] sm:$0x1] }
  0xde   :  { %v7011_v18 = vcombine.low %v2318_v62, %v2336_v7  ;;  %v7304_v31 = vcombine.low %v4001_v11, %v4005_v37  ;;  %v2191_v24 = vsel %vm7593_vm2, %v6965_v5, %v2190_v16  ;;  %v4165_v33 = vsel %vm7889_vm11, %v7342_v55, %v4164_v56  ;;  %v6677_v38 = vld [vmem:[%s11346_s0 + $0x90] sm:$0xe]  ;;  %v6678_v39 = vld [vmem:[%s11346_s0 + $0x94] sm:$0x1]  ;;  %v7475_v51 = vld [vmem:[%s11346_s0] ss:$8 sps:$4 sm:$0xff]  }
  0xdf   :  { %v2195_v34 = vsel %vm7593_vm2, %v6966_v57, %v2194_v20  ;;  %v7054_v14 = vrot.slane %v3012_v21, 9  ;;  %v3096_v36 = vrot.slane %v3013_v22, 5  ;;  %v3093_v44 = vsel %vm7593_vm2, %v7053_v25, %v3092_v27  ;;  %v6619_v26 = vld [vmem:[%s11346_s0 + $0x28] sm:$0xf]  ;;  %v6620_v48 = vld [vmem:[%s11346_s0 + $0x2c] sm:$0x1]  ;;  %v8984_v21 = vpop.permute.xlu1 %2240 }
  0xe0   :  { %2621 = vst.msk [vmem:[#allocation3 + $0x8] sm:$0xff] %vm317_vm13, %v7011_v18  ;;  %4068 = vrot.lane.b32.xlu0 %v7304_v31, %s7531_s21  ;;  %v6976_v40 = vcombine.low %v2191_v24, %v2195_v34  ;;  %v6695_v35 = vrot.slane %v6675_v15, 9  ;;  %v443_v45 = vrot.slane %v6676_v30, 5  ;;  %v6696_v50 = vrot.slane %v6677_v38, 9  ;;  %v6621_v62 = vld [vmem:[%s11346_s0 + $0x30] sm:$0xf] }
  0xe1   :  { %v3097_v49 = vsel %vm7593_vm2, %v7054_v14, %v3096_v36  ;;  %v447_v28 = vrot.slane %v6678_v39, 5  ;;  %v7357_v55 = vcombine.low %v8900_v47, %v4165_v33  ;;  %v6622_v63 = vld [vmem:[%s11346_s0 + $0x34] sm:$0x1]  ;;  %2986 = vst.msk [vmem:[#allocation3] sm:$0xff] %vm317_vm13, %v7475_v51  ;;  %v118_v8 = vshrl.u32 %v6619_v26, 16  ;;  %v8971_v47 = vpop.permute.xlu0 %3148 }
  0xe2   :  { %2246 = vrot.lane.b32.xlu1 %v6976_v40, %s7531_s21  ;;  %v7065_v59 = vcombine.low %v3093_v44, %v3097_v49  ;;  %v444_v61 = vsel %vm7593_vm2, %v6695_v35, %v443_v45  ;;  %v121_v1 = vshll.u32 %v6619_v26, 16  ;;  %v127_v56 = vshll.u32 %v6620_v48, 16  ;;  %3170 = vst.msk [vmem:[#allocation3] sm:$0xff] %vm505_vm12, %v8689_v60  ;;  %v3194_v17 = vld [vmem:[%s11346_s0 + $0x60] sm:$0xc] }
  0xe3   :  { %v448_v0 = vsel %vm7593_vm2, %v6696_v50, %v447_v28  ;;  %v132_v13 = vshrl.u32 %v6621_v62, 16  ;;  %v135_v5 = vshll.u32 %v6621_v62, 16  ;;  %v141_v7 = vshll.u32 %v6622_v63, 16  ;;  %3357 = vst.msk [vmem:[#allocation3] sm:$0xff] %vm885_vm14, %v8733_v41  ;;  %v3195_v20 = vld [vmem:[%s11346_s0 + $0x64] sm:$0x3] }
  0xe4   :  { %3154 = vrot.lane.b32.xlu0 %v7065_v59, %s7530_s12  ;;  %v6705_v4 = vcombine.low %v444_v61, %v448_v0  ;;  %v120_v11 = vrot.slane %v118_v8, 4  ;;  %v123_v16 = vrot.slane %v121_v1, 5  ;;  %v129_v10 = vrot.slane %v127_v56, 5  ;;  %3445 = vst.msk [vmem:[#allocation3] sm:$0xff] %vm1199_vm15, %v8789_v9  ;;  %v3196_v22 = vld [vmem:[%s11346_s0 + $0x68] sm:$0xc]  ;;  %v9027_v59 = vpop.permute.xlu1 %487 }
  0xe5   :  { %v134_v37 = vrot.slane %v132_v13, 4  ;;  %v137_v60 = vrot.slane %v135_v5, 5  ;;  %v143_v57 = vrot.slane %v141_v7, 5  ;;  %v3197_v31 = vld [vmem:[%s11346_s0 + $0x6c] sm:$0x3]  ;;  %v7077_v24 = vrot.slane %v3194_v17, 10  ;;  %v9018_v44 = vpop.permute.xlu0 %3335 }
  0xe6   :  { %493 = vrot.lane.b32.xlu1 %v6705_v4, %s7530_s12  ;;  %v124_v41 = vor.u32 %v123_v16, %v120_v11  ;;  %v3279_v25 = vrot.slane %v3195_v20, 6  ;;  %3629 = vst.msk [vmem:[#allocation3] sm:$0xff] %vm1384_vm0, %v8823_v43  ;;  %v7078_v27 = vrot.slane %v3196_v22, 10  ;;  %v3283_v15 = vrot.slane %v3197_v31, 6  ;;  %v6731_v30 = vld [vmem:[%s11346_s0 + $0x88] sm:$0xe] }
  0xe7   :  { %v2630_v18 = vld [vmem:[#allocation3 + $0x8] sm:$0xff]  ;;  %v138_v9 = vor.u32 %v137_v60, %v134_v37  ;;  %3813 = vst.msk [vmem:[#allocation3] sm:$0xff] %vm1761_vm1, %v8844_v12  ;;  %v6733_v43 = vld [vmem:[%s11346_s0 + $0x90] sm:$0xe]  ;;  %v766_v36 = vshrl.u32 %v6731_v30, 16  ;;  %v769_v40 = vshll.u32 %v6731_v30, 16 }
  0xe8   :  { %7029 = vmatprep.mubr.msk.bf16.mxu0 %vm317_vm13, %v2630_v18  ;;  %4254 = vst.msk [vmem:[#allocation3 + $0x8] sm:$0xff] %vm317_vm13, %v7357_v55  ;;  %v6732_v33 = vld [vmem:[%s11346_s0 + $0x8c] sm:$0x3]  ;;  %v125_v34 = vrot.slane %v124_v41, 4  ;;  %v3280_v14 = vsel %vm7889_vm11, %v7077_v24, %v3279_v25  ;;  %v3284_v39 = vsel %vm7889_vm11, %v7078_v27, %v3283_v15  ;;  %v6734_v12 = vld [vmem:[%s11346_s0 + $0x94] sm:$0x3] }
  0xe9   :  { %2781 = vmatmul.mubr.bf16.vlgmr.msra.gmra.mrb[0].mxu0 %v2629_v42  ;;  %3902 = vst.msk [vmem:[#allocation3] sm:$0xff] %vm2075_vm3, %v8880_v54  ;;  %v139_v38 = vrot.slane %v138_v9, 4  ;;  %v775_v42 = vshrl.u32 %v6732_v33, 16  ;;  %v7089_v45 = vcombine.low %v3280_v14, %v3284_v39  ;;  %v768_v54 = vrot.slane %v766_v36, 5  ;;  %v6983_v50 = vld [vmem:[%s11346_s0 + $0x28] sm:$0xe]  ;;  %v9051_v41 = vpop.permute.xlu0 %3423 }
  0xea   :  { %4086 = vst.msk [vmem:[#allocation3] sm:$0xff] %vm2260_vm4, %v8926_v29  ;;  %v130_v35 = vsel %vm7704_vm8, %v125_v34, %v129_v10  ;;  %v778_v49 = vshll.u32 %v6732_v33, 16  ;;  %v771_v51 = vrot.slane %v769_v40, 6  ;;  %v784_v55 = vshrl.u32 %v6733_v43, 16  ;;  %v6984_v63 = vld [vmem:[%s11346_s0 + $0x2c] sm:$0x3]  ;;  %v9064_v34 = vpop.permute.xlu1 %867 }
  0xeb   :  { %v144_v28 = vsel %vm7704_vm8, %v139_v38, %v143_v57  ;;  %v777_v26 = vrot.slane %v775_v42, 5  ;;  %3341 = vrot.lane.b32.xlu0 %v7089_v45, %s7532_s9  ;;  %v787_v48 = vshll.u32 %v6733_v43, 16  ;;  %v793_v62 = vshrl.u32 %v6734_v12, 16  ;;  %v6985_v56 = vld [vmem:[%s11346_s0 + $0x30] sm:$0xe] }
  0xec   :  { %v6645_v29 = vcombine.low %v130_v35, %v144_v28  ;;  %v780_v61 = vrot.slane %v778_v49, 6  ;;  %v772_v0 = vor.u32 %v771_v51, %v768_v54  ;;  %v786_v8 = vrot.slane %v784_v55, 5  ;;  %v6986_v16 = vld [vmem:[%s11346_s0 + $0x34] sm:$0x3]  ;;  %v9043_v17 = vld [vmem:[%s11346_s0 + $0x30] sm:$0xc] }
  0xed   :  { %v796_v1 = vshll.u32 %v6734_v12, 16  ;;  %v2338_v4 = vshrl.u32 %v6983_v50, 16  ;;  %v789_v7 = vrot.slane %v787_v48, 6  ;;  %v795_v11 = vrot.slane %v793_v62, 5  ;;  %v7314_v20 = vld [vmem:[%s11346_s0 + $0x34] sm:$0x3] }
  0xee   :  { %320 = vst.msk [vmem:[#allocation3 + $0x20] sm:$0xff] %vm317_vm13, %v6645_v29  ;;  %v781_v5 = vor.u32 %v780_v61, %v777_v26  ;;  %v2341_v10 = vshll.u32 %v6983_v50, 16  ;;  %v773_v18 = vrot.slane %v772_v0, 4  ;;  %v2347_v57 = vshrl.u32 %v6984_v63, 16  ;;  %v9060_v33 = vld [vmem:[%s11346_s0 + $0x38] sm:$0xc]  ;;  %v9093_v29 = vpop.permute.xlu0 %3607 }
  0xef   :  { %v4263_v13 = vld [vmem:[#allocation3 + $0x8] sm:$0xff]  ;;  %508 = vst.msk [vmem:[#allocation3 + $0x20] sm:$0xff] %vm505_vm12, %v8746_v52  ;;  %v798_v37 = vrot.slane %v796_v1, 6  ;;  %v2340_v60 = vrot.slane %v2338_v4, 5  ;;  %v790_v22 = vor.u32 %v789_v7, %v786_v8  ;;  %v2350_v24 = vshll.u32 %v6984_v63, 16  ;;  %v9105_v1 = vpop.permute.xlu1 %1181 }
  0xf0   :  { %7394 = vmatprep.mubr.msk.bf16.mxu1 %vm317_vm13, %v4263_v13  ;;  %888 = vst.msk [vmem:[#allocation3 + $0x20] sm:$0xff] %vm885_vm14, %v8800_v19  ;;  %v2343_v31 = vrot.slane %v2341_v10, 6  ;;  %v2356_v25 = vshrl.u32 %v6985_v56, 16  ;;  %v782_v52 = vsel %vm7682_vm7, %v773_v18, %v781_v5  ;;  %v2349_v15 = vrot.slane %v2347_v57, 5  ;;  %v7478_v42 = vld [vmem:[%s11346_s0 + $0x70] ss:$8 sps:$4 sm:$0xff]  }
  0xf1   :  { %v4262_v9 = vld [vmem:[#allocation3] sm:$0xff]  ;;  %v799_v27 = vor.u32 %v798_v37, %v795_v11  ;;  %v2359_v30 = vshll.u32 %v6985_v56, 16  ;;  %1202 = vst.msk [vmem:[#allocation3 + $0x20] sm:$0xff] %vm1199_vm15, %v8825_v53  ;;  %v791_v19 = vrot.slane %v790_v22, 4  ;;  %v2352_v43 = vrot.slane %v2350_v24, 6  ;;  %3429 = vrot.lane.b32.xlu0 %v7478_v42, %s7533_s22 }
  0xf2   :  { %4416 = vmatmul.mubr.bf16.vlgmr.msra.gmra.mrb[0].mxu1 %v4262_v9  ;;  %v2344_v14 = vor.u32 %v2343_v31, %v2340_v60  ;;  %v2358_v36 = vrot.slane %v2356_v25, 5  ;;  %1387 = vst.msk [vmem:[#allocation3 + $0x20] sm:$0xff] %vm1384_vm0, %v8855_v23  ;;  %v2365_v39 = vshrl.u32 %v6986_v16, 16  ;;  %v2368_v12 = vshll.u32 %v6986_v16, 16  ;;  %v7316_v23 = vld [vmem:[%s11346_s0 + $0x3c] sm:$0x3] }
  0xf3   :  { %v2361_v38 = vrot.slane %v2359_v30, 6  ;;  %v7343_v40 = vrot.slane %v9043_v17, 10  ;;  %1764 = vst.msk [vmem:[#allocation3 + $0x20] sm:$0xff] %vm1761_vm1, %v8894_v3  ;;  %v800_v53 = vsel %vm7682_vm7, %v791_v19, %v799_v27  ;;  %v2353_v45 = vor.u32 %v2352_v43, %v2349_v15  ;;  %v6771_v49 = vld [vmem:[%s11346_s0 + $0x90] sm:$0xf]  ;;  %v9128_v15 = vpop.permute.xlu0 %3791  ;;  %v9141_v42 = vpop.permute.xlu1 %1366 }
  0xf4   :  { %v2345_v35 = vrot.slane %v2344_v14, 4  ;;  %v4168_v54 = vrot.slane %v7314_v20, 6  ;;  %2078 = vst.msk [vmem:[#allocation3 + $0x20] sm:$0xff] %vm2075_vm3, %v8942_v46  ;;  %v6745_v50 = vcombine.low %v782_v52, %v800_v53  ;;  %v2367_v3 = vrot.slane %v2365_v39, 5  ;;  %v6772_v26 = vld [vmem:[%s11346_s0 + $0x94] sm:$0x1] }
  0xf5   :  { %v2362_v28 = vor.u32 %v2361_v38, %v2358_v36  ;;  %v2370_v51 = vrot.slane %v2368_v12, 6  ;;  %v6773_v55 = vld [vmem:[%s11346_s0 + $0x98] sm:$0xf]  ;;  %2263 = vst.msk [vmem:[#allocation3 + $0x20] sm:$0xff] %vm2260_vm4, %v8984_v21  ;;  %v7344_v61 = vrot.slane %v9060_v33, 10  ;;  %v1096_v0 = vshrl.u32 %v6771_v49, 16 }
  0xf6   :  { %v2354_v46 = vsel %vm7682_vm7, %v2345_v35, %v2353_v45  ;;  %v6774_v48 = vld [vmem:[%s11346_s0 + $0x9c] sm:$0x1]  ;;  %873 = vrot.lane.b32.xlu1 %v6745_v50, %s7532_s9  ;;  %v1099_v8 = vshll.u32 %v6771_v49, 16  ;;  %v7133_v21 = vld [vmem:[%s11346_s0 + $0x70] sm:$0xe]  ;;  %v4172_v56 = vrot.slane %v7316_v23, 6  ;;  %v9114_v16 = vsel %vm7889_vm11, %v7343_v40, %v4168_v54 }
  0xf7   :  { %v2363_v62 = vrot.slane %v2362_v28, 4  ;;  %v2371_v63 = vor.u32 %v2370_v51, %v2367_v3  ;;  %v1105_v4 = vshll.u32 %v6772_v26, 16  ;;  %v1110_v13 = vshrl.u32 %v6773_v55, 16  ;;  %v7134_v7 = vld [vmem:[%s11346_s0 + $0x74] sm:$0x1] }
  0xf8   :  { %v1113_v5 = vshll.u32 %v6773_v55, 16  ;;  %v1098_v10 = vrot.slane %v1096_v0, 4  ;;  %v1101_v17 = vrot.slane %v1099_v8, 5  ;;  %v7135_v18 = vld [vmem:[%s11346_s0 + $0x78] sm:$0xe]  ;;  %v1119_v25 = vshll.u32 %v6774_v48, 16 }
  0xf9   :  { %v2372_v11 = vsel %vm7682_vm7, %v2363_v62, %v2371_v63  ;;  %v7136_v37 = vld [vmem:[%s11346_s0 + $0x7c] sm:$0x1]  ;;  %v1107_v57 = vrot.slane %v1105_v4, 5  ;;  %v1112_v20 = vrot.slane %v1110_v13, 4  ;;  %v6811_v31 = vld [vmem:[%s11346_s0 + $0x90] sm:$0xe]  ;;  %v4173_v30 = vsel %vm7889_vm11, %v7344_v61, %v4172_v56 }
  0xfa   :  { %v7012_v60 = vcombine.low %v2354_v46, %v2372_v11  ;;  %v1115_v22 = vrot.slane %v1113_v5, 5  ;;  %v1102_v24 = vor.u32 %v1101_v17, %v1098_v10  ;;  %v7157_v9 = vrot.slane %v7133_v21, 9  ;;  %v6812_v27 = vld [vmem:[%s11346_s0 + $0x94] sm:$0x1]  ;;  %v6813_v43 = vld [vmem:[%s11346_s0 + $0x98] sm:$0xe]  ;;  %v9173_v5 = vpop.permute.xlu0 %3880 }
  0xfb   :  { %v3551_v52 = vrot.slane %v7134_v7, 5  ;;  %v7158_v19 = vrot.slane %v7135_v18, 9  ;;  %v3555_v14 = vrot.slane %v7136_v37, 5  ;;  %v6814_v36 = vld [vmem:[%s11346_s0 + $0x9c] sm:$0x1]  ;;  %v1121_v39 = vrot.slane %v1119_v25, 5 }
  0xfc   :  { %2622 = vst.msk [vmem:[#allocation3 + $0x18] sm:$0xff] %vm317_vm13, %v7012_v60  ;;  %v1116_v33 = vor.u32 %v1115_v22, %v1112_v20  ;;  %v1103_v38 = vrot.slane %v1102_v24, 4  ;;  %v6831_v40 = vrot.slane %v6811_v31, 9  ;;  %v1322_v45 = vrot.slane %v6812_v27, 5  ;;  %v7189_v3 = vld [vmem:[%s11346_s0 + $0x70] sm:$0xc]  ;;  %v9186_v31 = vpop.permute.xlu1 %1743 }
  0xfd   :  { %v3552_v12 = vsel %vm7593_vm2, %v7157_v9, %v3551_v52  ;;  %v3556_v35 = vsel %vm7593_vm2, %v7158_v19, %v3555_v14  ;;  %v6832_v23 = vrot.slane %v6813_v43, 9  ;;  %v7358_v54 = vcombine.low %v9114_v16, %v4173_v30  ;;  %v7190_v51 = vld [vmem:[%s11346_s0 + $0x74] sm:$0x3]  ;;  %v7191_v61 = vld [vmem:[%s11346_s0 + $0x78] sm:$0xc] }
  0xfe   :  { %v1117_v53 = vrot.slane %v1116_v33, 4  ;;  %v1108_v49 = vsel %vm7704_vm8, %v1103_v38, %v1107_v57  ;;  %v7169_v50 = vcombine.low %v3552_v12, %v3556_v35  ;;  %v1326_v28 = vrot.slane %v6814_v36, 5  ;;  %v2631_v55 = vld [vmem:[#allocation3 + $0x10] sm:$0xff]  ;;  %v7192_v48 = vld [vmem:[%s11346_s0 + $0x7c] sm:$0x3]  ;;  %v9201_v35 = vpop.permute.xlu0 %4064 }
  0xff   :  { %v1323_v46 = vsel %vm7593_vm2, %v6831_v40, %v1322_v45  ;;  %v7213_v62 = vrot.slane %v7189_v3, 10  ;;  %v3735_v63 = vrot.slane %v7190_v51, 6  ;;  %v7214_v21 = vrot.slane %v7191_v61, 10  ;;  %v6867_v4 = vld [vmem:[%s11346_s0 + $0x90] sm:$0xe] }
 0x100   :  { %v1122_v26 = vsel %vm7704_vm8, %v1117_v53, %v1121_v39  ;;  %3613 = vrot.lane.b32.xlu0 %v7169_v50, %s7529_s23  ;;  %v1327_v8 = vsel %vm7593_vm2, %v6832_v23, %v1326_v28  ;;  %v3739_v56 = vrot.slane %v7192_v48, 6  ;;  %v6868_v13 = vld [vmem:[%s11346_s0 + $0x94] sm:$0x3]  ;;  %v6869_v16 = vld [vmem:[%s11346_s0 + $0x98] sm:$0xe]  ;;  %v1642_v17 = vshrl.u32 %v6867_v4, 16 }
 0x101   :  { %v6785_v0 = vcombine.low %v1108_v49, %v1122_v26  ;;  %v6841_v7 = vcombine.low %v1323_v46, %v1327_v8  ;;  %v3736_v11 = vsel %vm7889_vm11, %v7213_v62, %v3735_v63  ;;  %v6870_v10 = vld [vmem:[%s11346_s0 + $0x9c] sm:$0x3]  ;;  %v1645_v18 = vshll.u32 %v6867_v4, 16  ;;  %v7482_v38 = vld [vmem:[%s11346_s0 + $0x80] ss:$8 sps:$4 sm:$0xff]  }
 0x102   :  { %v3740_v60 = vsel %vm7889_vm11, %v7214_v21, %v3739_v56  ;;  %v1651_v57 = vshrl.u32 %v6868_v13, 16  ;;  %v1654_v20 = vshll.u32 %v6868_v13, 16  ;;  %v1660_v22 = vshrl.u32 %v6869_v16, 16  ;;  %v6907_v40 = vld [vmem:[%s11346_s0 + $0x98] sm:$0xf] }
 0x103   :  { %v2632_v37 = vld [vmem:[#allocation3 + $0x18] sm:$0xff]  ;;  %1187 = vrot.lane.b32.xlu1 %v6785_v0, %s7533_s22  ;;  %v7225_v24 = vcombine.low %v3736_v11, %v3740_v60  ;;  %v1644_v25 = vrot.slane %v1642_v17, 5  ;;  %v1647_v9 = vrot.slane %v1645_v18, 6  ;;  %v1663_v52 = vshll.u32 %v6869_v16, 16  ;;  %v6909_v49 = vld [vmem:[%s11346_s0 + $0xa0] sm:$0xf] }
 0x104   :  { %7030 = vmatprep.mubr.msk.bf16.mxu0 %vm317_vm13, %v2632_v37  ;;  %4255 = vst.msk [vmem:[#allocation3 + $0x18] sm:$0xff] %vm317_vm13, %v7358_v54  ;;  %v1653_v27 = vrot.slane %v1651_v57, 5  ;;  %v1656_v30 = vrot.slane %v1654_v20, 6  ;;  %v1662_v33 = vrot.slane %v1660_v22, 5  ;;  %v1669_v19 = vshrl.u32 %v6870_v10, 16  ;;  %v9234_v22 = vpop.permute.xlu0 %3150 }
 0x105   :  { %2789 = vmatmul.mubr.bf16.gmra.mrb[4].mxu0 %v2631_v55  ;;  %3797 = vrot.lane.b32.xlu0 %v7225_v24, %s7534_s30  ;;  %v1648_v14 = vor.u32 %v1647_v9, %v1644_v25  ;;  %v1665_v43 = vrot.slane %v1663_v52, 6  ;;  %v1672_v36 = vshll.u32 %v6870_v10, 16  ;;  %v6908_v53 = vld [vmem:[%s11346_s0 + $0x9c] sm:$0x1]  ;;  %v6910_v50 = vld [vmem:[%s11346_s0 + $0xa4] sm:$0x1]  ;;  %v9209_v55 = vpop.permute.xlu1 %2057 }
 0x106   :  { %v1657_v39 = vor.u32 %v1656_v30, %v1653_v27  ;;  %v1671_v12 = vrot.slane %v1669_v19, 5  ;;  %v1972_v28 = vshrl.u32 %v6907_v40, 16  ;;  %v1975_v3 = vshll.u32 %v6907_v40, 16  ;;  %v7269_v63 = vld [vmem:[%s11346_s0 + $0x80] sm:$0xe] }
 0x107   :  { %1372 = vrot.lane.b32.xlu1 %v6841_v7, %s7529_s23  ;;  %v1649_v45 = vrot.slane %v1648_v14, 4  ;;  %v1666_v23 = vor.u32 %v1665_v43, %v1662_v33  ;;  %v1674_v54 = vrot.slane %v1672_v36, 6  ;;  %v1981_v51 = vshll.u32 %v6908_v53, 16  ;;  %v7270_v4 = vld [vmem:[%s11346_s0 + $0x84] sm:$0x1] }
 0x108   :  { %v1986_v26 = vshrl.u32 %v6909_v49, 16  ;;  %v1989_v62 = vshll.u32 %v6909_v49, 16  ;;  %v1974_v0 = vrot.slane %v1972_v28, 4  ;;  %v1977_v8 = vrot.slane %v1975_v3, 5  ;;  %v7271_v16 = vld [vmem:[%s11346_s0 + $0x88] sm:$0xe] }
 0x109   :  { %v1658_v46 = vsel %vm7682_vm7, %v1649_v45, %v1657_v39  ;;  %v1667_v61 = vrot.slane %v1666_v23, 4  ;;  %v1675_v48 = vor.u32 %v1674_v54, %v1671_v12  ;;  %3886 = vrot.lane.b32.xlu0 %v7482_v38, %s7535_s26  ;;  %v1983_v21 = vrot.slane %v1981_v51, 5  ;;  %v7272_v10 = vld [vmem:[%s11346_s0 + $0x8c] sm:$0x1]  ;;  %v6947_v57 = vld [vmem:[%s11346_s0 + $0x98] sm:$0xe]  ;;  %v9245_v38 = vpop.permute.xlu1 %2242 }
 0x10a   :  { %v1988_v56 = vrot.slane %v1986_v26, 4  ;;  %v1991_v7 = vrot.slane %v1989_v62, 5  ;;  %v1995_v11 = vshll.u32 %v6910_v50, 16  ;;  %v1978_v18 = vor.u32 %v1977_v8, %v1974_v0  ;;  %v6948_v20 = vld [vmem:[%s11346_s0 + $0x9c] sm:$0x1] }
 0x10b   :  { %v1676_v13 = vsel %vm7682_vm7, %v1667_v61, %v1675_v48  ;;  %v7293_v37 = vrot.slane %v7269_v63, 9  ;;  %v4008_v60 = vrot.slane %v7270_v4, 5  ;;  %v7294_v9 = vrot.slane %v7271_v16, 9  ;;  %v6949_v27 = vld [vmem:[%s11346_s0 + $0xa0] sm:$0xe]  ;;  %v4265_v30 = vld [vmem:[#allocation3 + $0x18] sm:$0xff] }
 0x10c   :  { %v6881_v17 = vcombine.low %v1658_v46, %v1676_v13  ;;  %v1992_v24 = vor.u32 %v1991_v7, %v1988_v56  ;;  %v1997_v25 = vrot.slane %v1995_v11, 5  ;;  %v4012_v52 = vrot.slane %v7272_v10, 5  ;;  %v6950_v14 = vld [vmem:[%s11346_s0 + $0xa4] sm:$0x1]  ;;  %7395 = vmatprep.mubr.msk.bf16.mxu1 %vm317_vm13, %v4265_v30  ;;  %v3014_v49 = vld [vmem:[%s11346_s0 + $0x70] sm:$0xe] }
 0x10d   :  { %v1979_v33 = vrot.slane %v1978_v18, 4  ;;  %v4009_v19 = vsel %vm7593_vm2, %v7293_v37, %v4008_v60  ;;  %v6967_v43 = vrot.slane %v6947_v57, 9  ;;  %v2198_v36 = vrot.slane %v6948_v20, 5  ;;  %v3015_v50 = vld [vmem:[%s11346_s0 + $0x74] sm:$0x1]  ;;  %v9290_v37 = vpop.permute.xlu1 %489 }
 0x10e   :  { %1749 = vrot.lane.b32.xlu1 %v6881_v17, %s7534_s30  ;;  %v1993_v39 = vrot.slane %v1992_v24, 4  ;;  %v4013_v12 = vsel %vm7593_vm2, %v7294_v9, %v4012_v52  ;;  %v6968_v40 = vrot.slane %v6949_v27, 9  ;;  %v2202_v53 = vrot.slane %v6950_v14, 5  ;;  %v3016_v51 = vld [vmem:[%s11346_s0 + $0x78] sm:$0xe] }
 0x10f   :  { %v1984_v45 = vsel %vm7704_vm8, %v1979_v33, %v1983_v21  ;;  %v7305_v23 = vcombine.low %v4009_v19, %v4013_v12  ;;  %v2199_v54 = vsel %vm7593_vm2, %v6967_v43, %v2198_v36  ;;  %v3017_v26 = vld [vmem:[%s11346_s0 + $0x7c] sm:$0x1]  ;;  %v7055_v46 = vrot.slane %v3014_v49, 9  ;;  %v6679_v0 = vld [vmem:[%s11346_s0 + $0x98] sm:$0xe]  ;;  %v9277_v21 = vpop.permute.xlu0 %3337 }
 0x110   :  { %v1998_v28 = vsel %vm7704_vm8, %v1993_v39, %v1997_v25  ;;  %v2203_v3 = vsel %vm7593_vm2, %v6968_v40, %v2202_v53  ;;  %v3100_v61 = vrot.slane %v3015_v50, 5  ;;  %v7056_v62 = vrot.slane %v3016_v51, 9  ;;  %v6680_v8 = vld [vmem:[%s11346_s0 + $0x9c] sm:$0x1]  ;;  %v6681_v4 = vld [vmem:[%s11346_s0 + $0xa0] sm:$0xe] }
 0x111   :  { %v6921_v48 = vcombine.low %v1984_v45, %v1998_v28  ;;  %4070 = vrot.lane.b32.xlu0 %v7305_v23, %s7531_s21  ;;  %v3104_v63 = vrot.slane %v3017_v26, 5  ;;  %v6682_v13 = vld [vmem:[%s11346_s0 + $0xa4] sm:$0x1]  ;;  %v6697_v7 = vrot.slane %v6679_v0, 9  ;;  %v451_v11 = vrot.slane %v6680_v8, 5  ;;  %v9331_v26 = vpop.permute.xlu1 %869 }
 0x112   :  { %v3101_v56 = vsel %vm7593_vm2, %v7055_v46, %v3100_v61  ;;  %v6977_v16 = vcombine.low %v2199_v54, %v2203_v3  ;;  %v6698_v17 = vrot.slane %v6681_v4, 9  ;;  %v455_v18 = vrot.slane %v6682_v13, 5  ;;  %v7485_v20 = vld [vmem:[%s11346_s0 + $0x10] ss:$8 sps:$4 sm:$0xff]   ;;  %v6624_v25 = vld [vmem:[%s11346_s0 + $0x3c] sm:$0x1] }
 0x113   :  { %2063 = vrot.lane.b32.xlu1 %v6921_v48, %s7535_s26  ;;  %v3105_v10 = vsel %vm7593_vm2, %v7056_v62, %v3104_v63  ;;  %v452_v57 = vsel %vm7593_vm2, %v6697_v7, %v451_v11  ;;  %v6623_v24 = vld [vmem:[%s11346_s0 + $0x38] sm:$0xf]  ;;  %v6625_v52 = vld [vmem:[%s11346_s0 + $0x40] sm:$0xf]  ;;  %v6626_v27 = vld [vmem:[%s11346_s0 + $0x44] sm:$0x1]  ;;  %v9316_v53 = vpop.permute.xlu0 %3425 }
 0x114   :  { %v7066_v60 = vcombine.low %v3101_v56, %v3105_v10  ;;  %v456_v9 = vsel %vm7593_vm2, %v6698_v17, %v455_v18  ;;  %v146_v30 = vshrl.u32 %v6623_v24, 16  ;;  %v149_v33 = vshll.u32 %v6623_v24, 16  ;;  %2987 = vst.msk [vmem:[#allocation3 + $0x10] sm:$0xff] %vm317_vm13, %v7485_v20  ;;  %v3198_v49 = vld [vmem:[%s11346_s0 + $0x70] sm:$0xc] }
 0x115   :  { %v155_v19 = vshll.u32 %v6624_v25, 16  ;;  %v160_v14 = vshrl.u32 %v6625_v52, 16  ;;  %v163_v43 = vshll.u32 %v6625_v52, 16  ;;  %v6706_v36 = vcombine.low %v452_v57, %v456_v9  ;;  %3171 = vst.msk [vmem:[#allocation3 + $0x10] sm:$0xff] %vm505_vm12, %v8971_v47  ;;  %v3199_v47 = vld [vmem:[%s11346_s0 + $0x74] sm:$0x3] }
 0x116   :  { %3156 = vrot.lane.b32.xlu0 %v7066_v60, %s7530_s12  ;;  %v148_v39 = vrot.slane %v146_v30, 4  ;;  %v151_v12 = vrot.slane %v149_v33, 5  ;;  %v169_v40 = vshll.u32 %v6626_v27, 16  ;;  %3358 = vst.msk [vmem:[#allocation3 + $0x10] sm:$0xff] %vm885_vm14, %v9018_v44  ;;  %v3200_v3 = vld [vmem:[%s11346_s0 + $0x78] sm:$0xc]  ;;  %v9373_v27 = vpop.permute.xlu1 %1183 }
 0x117   :  { %2248 = vrot.lane.b32.xlu1 %v6977_v16, %s7531_s21  ;;  %v157_v45 = vrot.slane %v155_v19, 5  ;;  %v162_v23 = vrot.slane %v160_v14, 4  ;;  %v165_v54 = vrot.slane %v163_v43, 5  ;;  %v7079_v51 = vrot.slane %v3198_v49, 10  ;;  %3446 = vst.msk [vmem:[#allocation3 + $0x10] sm:$0xff] %vm1199_vm15, %v9051_v41  ;;  %v9363_v17 = vpop.permute.xlu0 %3609 }
 0x118   :  { %v152_v50 = vor.u32 %v151_v12, %v148_v39  ;;  %v171_v28 = vrot.slane %v169_v40, 5  ;;  %v3201_v44 = vld [vmem:[%s11346_s0 + $0x7c] sm:$0x3]  ;;  %v3287_v61 = vrot.slane %v3199_v47, 6  ;;  %v7080_v48 = vrot.slane %v3200_v3, 10  ;;  %3630 = vst.msk [vmem:[#allocation3 + $0x10] sm:$0xff] %vm1384_vm0, %v9093_v29 }
 0x119   :  { %v166_v46 = vor.u32 %v165_v54, %v162_v23  ;;  %v6735_v62 = vld [vmem:[%s11346_s0 + $0x98] sm:$0xe]  ;;  %v3291_v41 = vrot.slane %v3201_v44, 6  ;;  %v6736_v0 = vld [vmem:[%s11346_s0 + $0x9c] sm:$0x3]  ;;  %3814 = vst.msk [vmem:[#allocation3 + $0x10] sm:$0xff] %vm1761_vm1, %v9128_v15 }
 0x11a   :  { %v153_v63 = vrot.slane %v152_v50, 4  ;;  %v3288_v56 = vsel %vm7889_vm11, %v7079_v51, %v3287_v61  ;;  %v6737_v4 = vld [vmem:[%s11346_s0 + $0xa0] sm:$0xe]  ;;  %v802_v29 = vshrl.u32 %v6735_v62, 16  ;;  %v805_v13 = vshll.u32 %v6735_v62, 16  ;;  %3903 = vst.msk [vmem:[#allocation3 + $0x10] sm:$0xff] %vm2075_vm3, %v9173_v5 }
 0x11b   :  { %495 = vrot.lane.b32.xlu1 %v6706_v36, %s7530_s12  ;;  %v167_v8 = vrot.slane %v166_v46, 4  ;;  %v3292_v11 = vsel %vm7889_vm11, %v7080_v48, %v3291_v41  ;;  %v6738_v15 = vld [vmem:[%s11346_s0 + $0xa4] sm:$0x3]  ;;  %v811_v16 = vshrl.u32 %v6736_v0, 16  ;;  %v814_v10 = vshll.u32 %v6736_v0, 16  ;;  %4087 = vst.msk [vmem:[#allocation3 + $0x10] sm:$0xff] %vm2260_vm4, %v9201_v35 }
 0x11c   :  { %v158_v7 = vsel %vm7704_vm8, %v153_v63, %v157_v45  ;;  %v7090_v18 = vcombine.low %v3288_v56, %v3292_v11  ;;  %v804_v60 = vrot.slane %v802_v29, 5  ;;  %v807_v57 = vrot.slane %v805_v13, 6  ;;  %v6987_v20 = vld [vmem:[%s11346_s0 + $0x38] sm:$0xe]  ;;  %v6988_v35 = vld [vmem:[%s11346_s0 + $0x3c] sm:$0x3] }
 0x11d   :  { %v172_v5 = vsel %vm7704_vm8, %v167_v8, %v171_v28  ;;  %v813_v25 = vrot.slane %v811_v16, 5  ;;  %v816_v9 = vrot.slane %v814_v10, 6  ;;  %v820_v52 = vshrl.u32 %v6737_v4, 16  ;;  %v6989_v43 = vld [vmem:[%s11346_s0 + $0x40] sm:$0xe] }
 0x11e   :  { %v6646_v24 = vcombine.low %v158_v7, %v172_v5  ;;  %3343 = vrot.lane.b32.xlu0 %v7090_v18, %s7532_s9  ;;  %v808_v30 = vor.u32 %v807_v57, %v804_v60  ;;  %v823_v33 = vshll.u32 %v6737_v4, 16  ;;  %v829_v19 = vshrl.u32 %v6738_v15, 16  ;;  %v6990_v12 = vld [vmem:[%s11346_s0 + $0x44] sm:$0x3]  ;;  %v7317_v28 = vld [vmem:[%s11346_s0 + $0x40] sm:$0xc]  ;;  %v9410_v7 = vpop.permute.xlu1 %1368 }
 0x11f   :  { %v832_v14 = vshll.u32 %v6738_v15, 16  ;;  %v817_v36 = vor.u32 %v816_v9, %v813_v25  ;;  %v822_v39 = vrot.slane %v820_v52, 5  ;;  %v2374_v40 = vshrl.u32 %v6987_v20, 16  ;;  %v7318_v44 = vld [vmem:[%s11346_s0 + $0x44] sm:$0x3] }
 0x120   :  { %321 = vst.msk [vmem:[#allocation3 + $0x30] sm:$0xff] %vm317_vm13, %v6646_v24  ;;  %v2377_v45 = vshll.u32 %v6987_v20, 16  ;;  %v809_v23 = vrot.slane %v808_v30, 4  ;;  %v825_v54 = vrot.slane %v823_v33, 6  ;;  %v831_v49 = vrot.slane %v829_v19, 5 }
 0x121   :  { %509 = vst.msk [vmem:[#allocation3 + $0x30] sm:$0xff] %vm505_vm12, %v9027_v59  ;;  %v834_v50 = vrot.slane %v832_v14, 6  ;;  %v2376_v47 = vrot.slane %v2374_v40, 5  ;;  %v2383_v51 = vshrl.u32 %v6988_v35, 16  ;;  %v2386_v46 = vshll.u32 %v6988_v35, 16  ;;  %v9393_v59 = vpop.permute.xlu0 %3793 }
 0x122   :  { %889 = vst.msk [vmem:[#allocation3 + $0x30] sm:$0xff] %vm885_vm14, %v9064_v34  ;;  %v2379_v3 = vrot.slane %v2377_v45, 6  ;;  %v818_v61 = vsel %vm7682_vm7, %v809_v23, %v817_v36  ;;  %v826_v48 = vor.u32 %v825_v54, %v822_v39  ;;  %v2392_v63 = vshrl.u32 %v6989_v43, 16  ;;  %v7319_v34 = vld [vmem:[%s11346_s0 + $0x48] sm:$0xc]  ;;  %v4264_v0 = vld [vmem:[#allocation3 + $0x10] sm:$0xff] }
 0x123   :  { %v835_v62 = vor.u32 %v834_v50, %v831_v49  ;;  %v7487_v41 = vld [vmem:[%s11346_s0 + $0x80] ss:$8 sps:$4 sm:$0xff]   ;;  %1203 = vst.msk [vmem:[#allocation3 + $0x30] sm:$0xff] %vm1199_vm15, %v9105_v1  ;;  %v2385_v56 = vrot.slane %v2383_v51, 5  ;;  %v2388_v4 = vrot.slane %v2386_v46, 6  ;;  %v2395_v29 = vshll.u32 %v6989_v43, 16  ;;  %4424 = vmatmul.mubr.bf16.gmra.mrb[4].mxu1 %v4264_v0 }
 0x124   :  { %v2380_v8 = vor.u32 %v2379_v3, %v2376_v47  ;;  %v7320_v13 = vld [vmem:[%s11346_s0 + $0x4c] sm:$0x3]  ;;  %1388 = vst.msk [vmem:[#allocation3 + $0x30] sm:$0xff] %vm1384_vm0, %v9141_v42  ;;  %v827_v11 = vrot.slane %v826_v48, 4  ;;  %v2394_v15 = vrot.slane %v2392_v63, 5  ;;  %v2401_v16 = vshrl.u32 %v6990_v12, 16  ;;  %3431 = vrot.lane.b32.xlu0 %v7487_v41, %s7533_s22  ;;  %v9457_v47 = vpop.permute.xlu1 %1745 }
 0x125   :  { %v2404_v10 = vshll.u32 %v6990_v12, 16  ;;  %v6775_v1 = vld [vmem:[%s11346_s0 + $0xa0] sm:$0xf]  ;;  %1765 = vst.msk [vmem:[#allocation3 + $0x30] sm:$0xff] %vm1761_vm1, %v9186_v31  ;;  %v2389_v18 = vor.u32 %v2388_v4, %v2385_v56  ;;  %v2397_v60 = vrot.slane %v2395_v29, 6  ;;  %v7345_v42 = vrot.slane %v7317_v28, 10  ;;  %v9435_v19 = vpop.permute.xlu0 %3882 }
 0x126   :  { %v2381_v5 = vrot.slane %v2380_v8, 4  ;;  %v6776_v57 = vld [vmem:[%s11346_s0 + $0xa4] sm:$0x1]  ;;  %2079 = vst.msk [vmem:[#allocation3 + $0x30] sm:$0xff] %vm2075_vm3, %v9209_v55  ;;  %v836_v20 = vsel %vm7682_vm7, %v827_v11, %v835_v62  ;;  %v2403_v24 = vrot.slane %v2401_v16, 5  ;;  %v4176_v9 = vrot.slane %v7318_v44, 6 }
 0x127   :  { %v2406_v25 = vrot.slane %v2404_v10, 6  ;;  %v6777_v31 = vld [vmem:[%s11346_s0 + $0xa8] sm:$0xf]  ;;  %2264 = vst.msk [vmem:[#allocation3 + $0x30] sm:$0xff] %vm2260_vm4, %v9245_v38  ;;  %v6746_v52 = vcombine.low %v818_v61, %v836_v20  ;;  %v2398_v30 = vor.u32 %v2397_v60, %v2394_v15  ;;  %v7346_v33 = vrot.slane %v7319_v34, 10 }
 0x128   :  { %v2390_v35 = vsel %vm7682_vm7, %v2381_v5, %v2389_v18  ;;  %v6778_v55 = vld [vmem:[%s11346_s0 + $0xac] sm:$0x1]  ;;  %v9439_v43 = vsel %vm7889_vm11, %v7345_v42, %v4176_v9  ;;  %v4180_v36 = vrot.slane %v7320_v13, 6  ;;  %v1124_v39 = vshrl.u32 %v6775_v1, 16  ;;  %v7137_v38 = vld [vmem:[%s11346_s0 + $0x80] sm:$0xe] }
 0x129   :  { %v2407_v14 = vor.u32 %v2406_v25, %v2403_v24  ;;  %v7138_v12 = vld [vmem:[%s11346_s0 + $0x84] sm:$0x1]  ;;  %v7139_v40 = vld [vmem:[%s11346_s0 + $0x88] sm:$0xe]  ;;  %875 = vrot.lane.b32.xlu1 %v6746_v52, %s7532_s9  ;;  %v2399_v45 = vrot.slane %v2398_v30, 4  ;;  %v1127_v23 = vshll.u32 %v6775_v1, 16  ;;  %v9482_v5 = vpop.permute.xlu0 %4066 }
 0x12a   :  { %v1133_v54 = vshll.u32 %v6776_v57, 16  ;;  %v1138_v49 = vshrl.u32 %v6777_v31, 16  ;;  %v7140_v50 = vld [vmem:[%s11346_s0 + $0x8c] sm:$0x1]  ;;  %v6815_v28 = vld [vmem:[%s11346_s0 + $0xa0] sm:$0xe]  ;;  %v9461_v3 = vsel %vm7889_vm11, %v7346_v33, %v4180_v36 }
 0x12b   :  { %v1126_v51 = vrot.slane %v1124_v39, 4  ;;  %v1141_v46 = vshll.u32 %v6777_v31, 16  ;;  %v1147_v44 = vshll.u32 %v6778_v55, 16  ;;  %v6816_v61 = vld [vmem:[%s11346_s0 + $0xa4] sm:$0x1]  ;;  %v2408_v48 = vsel %vm7682_vm7, %v2399_v45, %v2407_v14 }
 0x12c   :  { %v7359_v62 = vcombine.low %v9439_v43, %v9461_v3  ;;  %v1129_v63 = vrot.slane %v1127_v23, 5  ;;  %v1135_v34 = vrot.slane %v1133_v54, 5  ;;  %v6817_v41 = vld [vmem:[%s11346_s0 + $0xa8] sm:$0xe]  ;;  %v6818_v0 = vld [vmem:[%s11346_s0 + $0xac] sm:$0x1]  ;;  %v7013_v8 = vcombine.low %v2390_v35, %v2408_v48  ;;  %v9493_v35 = vpop.permute.xlu1 %2059 }
 0x12d   :  { %v1140_v56 = vrot.slane %v1138_v49, 4  ;;  %v1143_v4 = vrot.slane %v1141_v46, 5  ;;  %v1149_v29 = vrot.slane %v1147_v44, 5  ;;  %v7193_v13 = vld [vmem:[%s11346_s0 + $0x80] sm:$0xc]  ;;  %v7159_v15 = vrot.slane %v7137_v38, 9 }
 0x12e   :  { %v1130_v11 = vor.u32 %v1129_v63, %v1126_v51  ;;  %v3559_v16 = vrot.slane %v7138_v12, 5  ;;  %v7160_v10 = vrot.slane %v7139_v40, 9  ;;  %v7194_v1 = vld [vmem:[%s11346_s0 + $0x84] sm:$0x3]  ;;  %2623 = vst.msk [vmem:[#allocation3 + $0x28] sm:$0xff] %vm317_vm13, %v7013_v8  ;;  %v3563_v60 = vrot.slane %v7140_v50, 5 }
 0x12f   :  { %v1144_v18 = vor.u32 %v1143_v4, %v1140_v56  ;;  %v6833_v42 = vrot.slane %v6815_v28, 9  ;;  %v1330_v57 = vrot.slane %v6816_v61, 5  ;;  %v7195_v20 = vld [vmem:[%s11346_s0 + $0x88] sm:$0xc]  ;;  %v6834_v9 = vrot.slane %v6817_v41, 9  ;;  %v2633_v41 = vld [vmem:[#allocation3 + $0x20] sm:$0xff] }
 0x130   :  { %v1131_v24 = vrot.slane %v1130_v11, 4  ;;  %v3560_v25 = vsel %vm7593_vm2, %v7159_v15, %v3559_v16  ;;  %v1334_v31 = vrot.slane %v6818_v0, 5  ;;  %v7196_v52 = vld [vmem:[%s11346_s0 + $0x8c] sm:$0x3]  ;;  %v3564_v33 = vsel %vm7593_vm2, %v7160_v10, %v3563_v60  ;;  %v6871_v36 = vld [vmem:[%s11346_s0 + $0xa0] sm:$0xe]  ;;  %v9537_v60 = vpop.permute.xlu1 %2244 }
 0x131   :  { %v1145_v30 = vrot.slane %v1144_v18, 4  ;;  %v1331_v55 = vsel %vm7593_vm2, %v6833_v42, %v1330_v57  ;;  %v7215_v14 = vrot.slane %v7193_v13, 10  ;;  %v7170_v38 = vcombine.low %v3560_v25, %v3564_v33  ;;  %v6872_v45 = vld [vmem:[%s11346_s0 + $0xa4] sm:$0x3]  ;;  %v6873_v23 = vld [vmem:[%s11346_s0 + $0xa8] sm:$0xe] }
 0x132   :  { %v1136_v39 = vsel %vm7704_vm8, %v1131_v24, %v1135_v34  ;;  %v1335_v12 = vsel %vm7593_vm2, %v6834_v9, %v1334_v31  ;;  %v3743_v40 = vrot.slane %v7194_v1, 6  ;;  %v7216_v50 = vrot.slane %v7195_v20, 10  ;;  %v6874_v44 = vld [vmem:[%s11346_s0 + $0xac] sm:$0x3]  ;;  %v6911_v63 = vld [vmem:[%s11346_s0 + $0xa8] sm:$0xf]  ;;  %v9523_v34 = vpop.permute.xlu0 %3152 }
 0x133   :  { %v1150_v54 = vsel %vm7704_vm8, %v1145_v30, %v1149_v29  ;;  %v6842_v49 = vcombine.low %v1331_v55, %v1335_v12  ;;  %v3747_v28 = vrot.slane %v7196_v52, 6  ;;  %3615 = vrot.lane.b32.xlu0 %v7170_v38, %s7529_s23  ;;  %v1678_v61 = vshrl.u32 %v6871_v36, 16  ;;  %v6912_v29 = vld [vmem:[%s11346_s0 + $0xac] sm:$0x1]  ;;  %v7488_v1 = vld [vmem:[%s11346_s0 + $0x90] ss:$8 sps:$4 sm:$0xff]  }
 0x134   :  { %v6786_v51 = vcombine.low %v1136_v39, %v1150_v54  ;;  %v3744_v46 = vsel %vm7889_vm11, %v7215_v14, %v3743_v40  ;;  %v1681_v48 = vshll.u32 %v6871_v36, 16  ;;  %v1687_v8 = vshrl.u32 %v6872_v45, 16  ;;  %v6913_v18 = vld [vmem:[%s11346_s0 + $0xb0] sm:$0xf]  ;;  %v6914_v25 = vld [vmem:[%s11346_s0 + $0xb4] sm:$0x1] }
 0x135   :  { %v3748_v0 = vsel %vm7889_vm11, %v7216_v50, %v3747_v28  ;;  %v1690_v56 = vshll.u32 %v6872_v45, 16  ;;  %v1696_v4 = vshrl.u32 %v6873_v23, 16  ;;  %v2634_v13 = vld [vmem:[#allocation3 + $0x28] sm:$0xff]  ;;  %v1680_v15 = vrot.slane %v1678_v61, 5  ;;  %v7273_v43 = vld [vmem:[%s11346_s0 + $0x90] sm:$0xe] }
 0x136   :  { %1189 = vrot.lane.b32.xlu1 %v6786_v51, %s7533_s22  ;;  %v7226_v11 = vcombine.low %v3744_v46, %v3748_v0  ;;  %v1683_v16 = vrot.slane %v1681_v48, 6  ;;  %v1699_v10 = vshll.u32 %v6873_v23, 16  ;;  %7031 = vmatprep.mubr.msk.bf16.mxu0 %vm317_vm13, %v2634_v13  ;;  %4256 = vst.msk [vmem:[#allocation3 + $0x28] sm:$0xff] %vm317_vm13, %v7359_v62  ;;  %v1689_v42 = vrot.slane %v1687_v8, 5  ;;  %v7274_v14 = vld [vmem:[%s11346_s0 + $0x94] sm:$0x1]  ;;  %v9558_v45 = vpop.permute.xlu0 %3339 }
 0x137   :  { %v1692_v57 = vrot.slane %v1690_v56, 6  ;;  %v1698_v20 = vrot.slane %v1696_v4, 5  ;;  %v1705_v24 = vshrl.u32 %v6874_v44, 16  ;;  %2797 = vmatmul.mubr.bf16.gmra.mrb[8].mxu0 %v2633_v41  ;;  %v1708_v52 = vshll.u32 %v6874_v44, 16  ;;  %v7275_v40 = vld [vmem:[%s11346_s0 + $0x98] sm:$0xe]  ;;  %v9572_v41 = vpop.permute.xlu1 %491 }
 0x138   :  { %3799 = vrot.lane.b32.xlu0 %v7226_v11, %s7534_s30  ;;  %v1684_v9 = vor.u32 %v1683_v16, %v1680_v15  ;;  %v1701_v31 = vrot.slane %v1699_v10, 6  ;;  %v2000_v30 = vshrl.u32 %v6911_v63, 16  ;;  %v2003_v33 = vshll.u32 %v6911_v63, 16  ;;  %v7276_v51 = vld [vmem:[%s11346_s0 + $0x9c] sm:$0x1] }
 0x139   :  { %v1693_v3 = vor.u32 %v1692_v57, %v1689_v42  ;;  %v1707_v62 = vrot.slane %v1705_v24, 5  ;;  %v2009_v55 = vshll.u32 %v6912_v29, 16  ;;  %v1710_v38 = vrot.slane %v1708_v52, 6  ;;  %v6951_v48 = vld [vmem:[%s11346_s0 + $0xa8] sm:$0xe] }
 0x13a   :  { %1374 = vrot.lane.b32.xlu1 %v6842_v49, %s7529_s23  ;;  %v1685_v36 = vrot.slane %v1684_v9, 4  ;;  %v1702_v39 = vor.u32 %v1701_v31, %v1698_v20  ;;  %v2002_v12 = vrot.slane %v2000_v30, 4  ;;  %v2005_v23 = vrot.slane %v2003_v33, 5  ;;  %v6952_v63 = vld [vmem:[%s11346_s0 + $0xac] sm:$0x1] }
 0x13b   :  { %v2011_v54 = vrot.slane %v2009_v55, 5  ;;  %v2014_v50 = vshrl.u32 %v6913_v18, 16  ;;  %v2017_v28 = vshll.u32 %v6913_v18, 16  ;;  %v1711_v44 = vor.u32 %v1710_v38, %v1707_v62  ;;  %v6953_v29 = vld [vmem:[%s11346_s0 + $0xb0] sm:$0xe] }
 0x13c   :  { %v1694_v49 = vsel %vm7682_vm7, %v1685_v36, %v1693_v3  ;;  %v1703_v46 = vrot.slane %v1702_v39, 4  ;;  %3888 = vrot.lane.b32.xlu0 %v7488_v1, %s7535_s26  ;;  %v2023_v61 = vshll.u32 %v6914_v25, 16  ;;  %v2006_v0 = vor.u32 %v2005_v23, %v2002_v12  ;;  %v6954_v10 = vld [vmem:[%s11346_s0 + $0xb4] sm:$0x1]  ;;  %v3018_v24 = vld [vmem:[%s11346_s0 + $0x80] sm:$0xe]  ;;  %v9594_v3 = vpop.permute.xlu0 %3427 }
 0x13d   :  { %v2016_v8 = vrot.slane %v2014_v50, 4  ;;  %v2019_v56 = vrot.slane %v2017_v28, 5  ;;  %v7295_v4 = vrot.slane %v7273_v43, 9  ;;  %v4016_v15 = vrot.slane %v7274_v14, 5  ;;  %v4267_v1 = vld [vmem:[#allocation3 + $0x28] sm:$0xff]  ;;  %v9615_v28 = vpop.permute.xlu1 %871 }
 0x13e   :  { %v1712_v13 = vsel %vm7682_vm7, %v1703_v46, %v1711_v44  ;;  %v2025_v11 = vrot.slane %v2023_v61, 5  ;;  %v7296_v16 = vrot.slane %v7275_v40, 9  ;;  %v2007_v42 = vrot.slane %v2006_v0, 4  ;;  %v3019_v25 = vld [vmem:[%s11346_s0 + $0x84] sm:$0x1]  ;;  %7396 = vmatprep.mubr.msk.bf16.mxu1 %vm317_vm13, %v4267_v1 }
 0x13f   :  { %v6882_v18 = vcombine.low %v1694_v49, %v1712_v13  ;;  %v2020_v57 = vor.u32 %v2019_v56, %v2016_v8  ;;  %v4020_v20 = vrot.slane %v7276_v51, 5  ;;  %v4017_v9 = vsel %vm7593_vm2, %v7295_v4, %v4016_v15  ;;  %v3020_v43 = vld [vmem:[%s11346_s0 + $0x88] sm:$0xe]  ;;  %v3021_v36 = vld [vmem:[%s11346_s0 + $0x8c] sm:$0x1] }
 0x140   :  { %v6969_v31 = vrot.slane %v6951_v48, 9  ;;  %v2206_v52 = vrot.slane %v6952_v63, 5  ;;  %v6970_v30 = vrot.slane %v6953_v29, 9  ;;  %v2012_v62 = vsel %vm7704_vm8, %v2007_v42, %v2011_v54  ;;  %v3202_v39 = vld [vmem:[%s11346_s0 + $0x80] sm:$0xc]  ;;  %v9646_v42 = vpop.permute.xlu0 %3611 }
 0x141   :  { %1751 = vrot.lane.b32.xlu1 %v6882_v18, %s7534_s30  ;;  %v2021_v33 = vrot.slane %v2020_v57, 4  ;;  %v4021_v55 = vsel %vm7593_vm2, %v7296_v16, %v4020_v20  ;;  %v2210_v14 = vrot.slane %v6954_v10, 5  ;;  %v7057_v40 = vrot.slane %v3018_v24, 9  ;;  %v3203_v54 = vld [vmem:[%s11346_s0 + $0x84] sm:$0x3] }
 0x142   :  { %v7306_v38 = vcombine.low %v4017_v9, %v4021_v55  ;;  %v2207_v12 = vsel %vm7593_vm2, %v6969_v31, %v2206_v52  ;;  %v3108_v23 = vrot.slane %v3019_v25, 5  ;;  %v3204_v50 = vld [vmem:[%s11346_s0 + $0x88] sm:$0xc]  ;;  %v7058_v46 = vrot.slane %v3020_v43, 9  ;;  %v3205_v61 = vld [vmem:[%s11346_s0 + $0x8c] sm:$0x3]  ;;  %v9660_v43 = vpop.permute.xlu1 %1185 }
 0x143   :  { %v2026_v51 = vsel %vm7704_vm8, %v2021_v33, %v2025_v11  ;;  %v2211_v49 = vsel %vm7593_vm2, %v6970_v30, %v2210_v14  ;;  %v3112_v44 = vrot.slane %v3021_v36, 5  ;;  %v7081_v0 = vrot.slane %v3202_v39, 10  ;;  %v7489_v8 = vld [vmem:[%s11346_s0 + $0x20] ss:$8 sps:$4 sm:$0xff]   ;;  %v6628_v10 = vld [vmem:[%s11346_s0 + $0x6c] sm:$0x1] }
 0x144   :  { %v6922_v48 = vcombine.low %v2012_v62, %v2026_v51  ;;  %4072 = vrot.lane.b32.xlu0 %v7306_v38, %s7531_s21  ;;  %v3109_v63 = vsel %vm7593_vm2, %v7057_v40, %v3108_v23  ;;  %v3295_v4 = vrot.slane %v3203_v54, 6  ;;  %v7082_v29 = vrot.slane %v3204_v50, 10  ;;  %v6627_v11 = vld [vmem:[%s11346_s0 + $0x68] sm:$0xf]  ;;  %2988 = vst.msk [vmem:[#allocation3 + $0x20] sm:$0xff] %vm317_vm13, %v7489_v8 }
 0x145   :  { %v3113_v56 = vsel %vm7593_vm2, %v7058_v46, %v3112_v44  ;;  %v3299_v13 = vrot.slane %v3205_v61, 6  ;;  %v6978_v15 = vcombine.low %v2207_v12, %v2211_v49  ;;  %v6629_v1 = vld [vmem:[%s11346_s0 + $0x70] sm:$0xf]  ;;  %v6630_v18 = vld [vmem:[%s11346_s0 + $0x74] sm:$0x1]  ;;  %3172 = vst.msk [vmem:[#allocation3 + $0x20] sm:$0xff] %vm505_vm12, %v9234_v22  ;;  %v9690_v61 = vpop.permute.xlu0 %3795 }
 0x146   :  { %2065 = vrot.lane.b32.xlu1 %v6922_v48, %s7535_s26  ;;  %v7067_v16 = vcombine.low %v3109_v63, %v3113_v56  ;;  %v3296_v57 = vsel %vm7889_vm11, %v7081_v0, %v3295_v4  ;;  %v174_v24 = vshrl.u32 %v6627_v11, 16  ;;  %v177_v25 = vshll.u32 %v6627_v11, 16  ;;  %v7490_v30 = vld [vmem:[%s11346_s0 + $0x90] ss:$8 sps:$4 sm:$0xff]   ;;  %3359 = vst.msk [vmem:[#allocation3 + $0x20] sm:$0xff] %vm885_vm14, %v9277_v21 }
 0x147   :  { %v3300_v20 = vsel %vm7889_vm11, %v7082_v29, %v3299_v13  ;;  %v183_v9 = vshll.u32 %v6628_v10, 16  ;;  %v188_v31 = vshrl.u32 %v6629_v1, 16  ;;  %v191_v52 = vshll.u32 %v6629_v1, 16  ;;  %v7141_v14 = vld [vmem:[%s11346_s0 + $0x90] sm:$0xe]  ;;  %3447 = vst.msk [vmem:[#allocation3 + $0x20] sm:$0xff] %vm1199_vm15, %v9316_v53  ;;  %v9705_v13 = vpop.permute.xlu1 %1370 }
 0x148   :  { %3158 = vrot.lane.b32.xlu0 %v7067_v16, %s7530_s12  ;;  %v7091_v62 = vcombine.low %v3296_v57, %v3300_v20  ;;  %v176_v33 = vrot.slane %v174_v24, 4  ;;  %v179_v55 = vrot.slane %v177_v25, 5  ;;  %v197_v22 = vshll.u32 %v6630_v18, 16  ;;  %v7142_v21 = vld [vmem:[%s11346_s0 + $0x94] sm:$0x1]  ;;  %3631 = vst.msk [vmem:[#allocation3 + $0x20] sm:$0xff] %vm1384_vm0, %v9363_v17 }
 0x149   :  { %v185_v36 = vrot.slane %v183_v9, 5  ;;  %v190_v39 = vrot.slane %v188_v31, 4  ;;  %v193_v38 = vrot.slane %v191_v52, 5  ;;  %v7161_v12 = vrot.slane %v7141_v14, 9  ;;  %v7143_v54 = vld [vmem:[%s11346_s0 + $0x98] sm:$0xe] }
 0x14a   :  { %2250 = vrot.lane.b32.xlu1 %v6978_v15, %s7531_s21  ;;  %v180_v40 = vor.u32 %v179_v55, %v176_v33  ;;  %v199_v23 = vrot.slane %v197_v22, 5  ;;  %v7144_v53 = vld [vmem:[%s11346_s0 + $0x9c] sm:$0x1]  ;;  %v3567_v50 = vrot.slane %v7142_v21, 5  ;;  %3815 = vst.msk [vmem:[#allocation3 + $0x20] sm:$0xff] %vm1761_vm1, %v9393_v59  ;;  %v7162_v49 = vrot.slane %v7143_v54, 9 }
 0x14b   :  { %v194_v51 = vor.u32 %v193_v38, %v190_v39  ;;  %v3571_v46 = vrot.slane %v7144_v53, 5  ;;  %v6991_v17 = vld [vmem:[%s11346_s0 + $0x48] sm:$0xe]  ;;  %v6992_v44 = vld [vmem:[%s11346_s0 + $0x4c] sm:$0x3]  ;;  %3904 = vst.msk [vmem:[#allocation3 + $0x20] sm:$0xff] %vm2075_vm3, %v9435_v19 }
 0x14c   :  { %3433 = vrot.lane.b32.xlu0 %v7490_v30, %s7533_s22  ;;  %v181_v48 = vrot.slane %v180_v40, 4  ;;  %v3568_v59 = vsel %vm7593_vm2, %v7161_v12, %v3567_v50  ;;  %v6993_v63 = vld [vmem:[%s11346_s0 + $0x50] sm:$0xe]  ;;  %v2410_v0 = vshrl.u32 %v6991_v17, 16  ;;  %4088 = vst.msk [vmem:[#allocation3 + $0x20] sm:$0xff] %vm2260_vm4, %v9482_v5  ;;  %v2413_v4 = vshll.u32 %v6991_v17, 16 }
 0x14d   :  { %v195_v8 = vrot.slane %v194_v51, 4  ;;  %v3572_v19 = vsel %vm7593_vm2, %v7162_v49, %v3571_v46  ;;  %v6994_v56 = vld [vmem:[%s11346_s0 + $0x54] sm:$0x3]  ;;  %v2419_v29 = vshrl.u32 %v6992_v44, 16  ;;  %v2422_v5 = vshll.u32 %v6992_v44, 16  ;;  %v9750_v46 = vpop.permute.xlu1 %1747 }
 0x14e   :  { %3345 = vrot.lane.b32.xlu1 %v7091_v62, %s7532_s9  ;;  %v186_v11 = vsel %vm7704_vm8, %v181_v48, %v185_v36  ;;  %v7171_v15 = vcombine.low %v3568_v59, %v3572_v19  ;;  %v2412_v16 = vrot.slane %v2410_v0, 5  ;;  %v9712_v10 = vld [vmem:[%s11346_s0 + $0x50] sm:$0xc]  ;;  %v2415_v18 = vrot.slane %v2413_v4, 6  ;;  %v9719_v24 = vld [vmem:[%s11346_s0 + $0x54] sm:$0x3]  ;;  %v9733_v36 = vpop.permute.xlu0 %3884 }
 0x14f   :  { %v200_v1 = vsel %vm7704_vm8, %v195_v8, %v199_v23  ;;  %v2421_v57 = vrot.slane %v2419_v29, 5  ;;  %v2428_v20 = vshrl.u32 %v6993_v63, 16  ;;  %v2424_v9 = vrot.slane %v2422_v5, 6  ;;  %v9724_v30 = vld [vmem:[%s11346_s0 + $0x58] sm:$0xc] }
 0x150   :  { %v6647_v25 = vcombine.low %v186_v11, %v200_v1  ;;  %v2431_v31 = vshll.u32 %v6993_v63, 16  ;;  %v2437_v52 = vshrl.u32 %v6994_v56, 16  ;;  %v2416_v62 = vor.u32 %v2415_v18, %v2412_v16  ;;  %v7197_v22 = vld [vmem:[%s11346_s0 + $0x90] sm:$0xc]  ;;  %v7198_v14 = vld [vmem:[%s11346_s0 + $0x94] sm:$0x3] }
 0x151   :  { %v2430_v33 = vrot.slane %v2428_v20, 5  ;;  %v2440_v55 = vshll.u32 %v6994_v56, 16  ;;  %v2425_v39 = vor.u32 %v2424_v9, %v2421_v57  ;;  %v7324_v12 = vld [vmem:[%s11346_s0 + $0x5c] sm:$0x3]  ;;  %v7347_v40 = vrot.slane %v9712_v10, 10 }
 0x152   :  { %3617 = vrot.lane.b32.xlu1 %v7171_v15, %s7529_s23  ;;  %322 = vst.msk [vmem:[#allocation3 + $0x40] sm:$0xff] %vm317_vm13, %v6647_v25  ;;  %v2433_v38 = vrot.slane %v2431_v31, 6  ;;  %v2439_v21 = vrot.slane %v2437_v52, 5  ;;  %v7199_v23 = vld [vmem:[%s11346_s0 + $0x98] sm:$0xc]  ;;  %v2417_v54 = vrot.slane %v2416_v62, 4  ;;  %v9780_v1 = vpop.permute.xlu0 %4068  ;;  %v9804_v62 = vpop.permute.xlu1 %2061 }
 0x153   :  { %510 = vst.msk [vmem:[#allocation3 + $0x40] sm:$0xff] %vm505_vm12, %v9290_v37  ;;  %v2442_v53 = vrot.slane %v2440_v55, 6  ;;  %v4184_v50 = vrot.slane %v9719_v24, 6  ;;  %v7348_v51 = vrot.slane %v9724_v30, 10  ;;  %v7200_v49 = vld [vmem:[%s11346_s0 + $0x9c] sm:$0x3] }
 0x154   :  { %890 = vst.msk [vmem:[#allocation3 + $0x40] sm:$0xff] %vm885_vm14, %v9331_v26  ;;  %v2434_v17 = vor.u32 %v2433_v38, %v2430_v33  ;;  %v7217_v44 = vrot.slane %v7197_v22, 10  ;;  %v3751_v48 = vrot.slane %v7198_v14, 6  ;;  %v7218_v37 = vrot.slane %v7199_v23, 10  ;;  %v7491_v63 = vld [vmem:[%s11346_s0 + $0xa0] ss:$8 sps:$4 sm:$0xff]  }
 0x155   :  { %v2443_v59 = vor.u32 %v2442_v53, %v2439_v21  ;;  %1204 = vst.msk [vmem:[#allocation3 + $0x40] sm:$0xff] %vm1199_vm15, %v9373_v27  ;;  %v7277_v0 = vld [vmem:[%s11346_s0 + $0xa0] sm:$0xe]  ;;  %v2426_v26 = vsel %vm7682_vm7, %v2417_v54, %v2425_v39  ;;  %v3755_v4 = vrot.slane %v7200_v49, 6  ;;  %v7278_v29 = vld [vmem:[%s11346_s0 + $0xa4] sm:$0x1]  ;;  %v4185_v39 = vsel %vm7889_vm11, %v7347_v40, %v4184_v50 }
 0x156   :  { %v4266_v8 = vld [vmem:[#allocation3 + $0x20] sm:$0xff]  ;;  %v2435_v19 = vrot.slane %v2434_v17, 4  ;;  %v3752_v56 = vsel %vm7889_vm11, %v7217_v44, %v3751_v48  ;;  %v7279_v27 = vld [vmem:[%s11346_s0 + $0xa8] sm:$0xe]  ;;  %1389 = vst.msk [vmem:[#allocation3 + $0x40] sm:$0xff] %vm1384_vm0, %v9410_v7  ;;  %v4188_v11 = vrot.slane %v7324_v12, 6  ;;  %3890 = vrot.lane.b32.xlu1 %v7491_v63, %s7535_s26  ;;  %v9833_v48 = vpop.permute.xlu0 %3154 }
 0x157   :  { %4432 = vmatmul.mubr.bf16.gmra.mrb[8].mxu1 %v4266_v8  ;;  %v7280_v15 = vld [vmem:[%s11346_s0 + $0xac] sm:$0x1]  ;;  %v7297_v16 = vrot.slane %v7277_v0, 9  ;;  %v4024_v5 = vrot.slane %v7278_v29, 5  ;;  %v7298_v10 = vrot.slane %v7279_v27, 9  ;;  %1766 = vst.msk [vmem:[#allocation3 + $0x40] sm:$0xff] %vm1761_vm1, %v9457_v47  ;;  %v3756_v7 = vsel %vm7889_vm11, %v7218_v37, %v3755_v4 }
 0x158   :  { %v2444_v18 = vsel %vm7682_vm7, %v2435_v19, %v2443_v59  ;;  %v4028_v57 = vrot.slane %v7280_v15, 5  ;;  %v3022_v20 = vld [vmem:[%s11346_s0 + $0x90] sm:$0xe]  ;;  %v3023_v24 = vld [vmem:[%s11346_s0 + $0x94] sm:$0x1]  ;;  %2080 = vst.msk [vmem:[#allocation3 + $0x40] sm:$0xff] %vm2075_vm3, %v9493_v35  ;;  %v7227_v25 = vcombine.low %v3752_v56, %v3756_v7  ;;  %v9856_v15 = vpop.permute.xlu1 %2246 }
 0x159   :  { %v7014_v47 = vcombine.low %v2426_v26, %v2444_v18  ;;  %v4025_v9 = vsel %vm7593_vm2, %v7297_v16, %v4024_v5  ;;  %v3024_v31 = vld [vmem:[%s11346_s0 + $0x98] sm:$0xe]  ;;  %v3025_v52 = vld [vmem:[%s11346_s0 + $0x9c] sm:$0x1]  ;;  %v7059_v30 = vrot.slane %v3022_v20, 9  ;;  %2265 = vst.msk [vmem:[#allocation3 + $0x40] sm:$0xff] %vm2260_vm4, %v9537_v60  ;;  %v4189_v60 = vsel %vm7889_vm11, %v7348_v51, %v4188_v11 }
 0x15a   :  { %v4029_v35 = vsel %vm7593_vm2, %v7298_v10, %v4028_v57  ;;  %v3116_v33 = vrot.slane %v3023_v24, 5  ;;  %v7060_v55 = vrot.slane %v3024_v31, 9  ;;  %v3120_v22 = vrot.slane %v3025_v52, 5  ;;  %v3206_v14 = vld [vmem:[%s11346_s0 + $0x90] sm:$0xc]  ;;  %3801 = vrot.lane.b32.xlu0 %v7227_v25, %s7534_s30 }
 0x15b   :  { %2624 = vst.msk [vmem:[#allocation3 + $0x38] sm:$0xff] %vm317_vm13, %v7014_v47  ;;  %v7307_v38 = vcombine.low %v4025_v9, %v4029_v35  ;;  %v3207_v21 = vld [vmem:[%s11346_s0 + $0x94] sm:$0x3]  ;;  %v3208_v12 = vld [vmem:[%s11346_s0 + $0x98] sm:$0xc]  ;;  %v7083_v53 = vrot.slane %v3206_v14, 10  ;;  %v7360_v59 = vcombine.low %v4185_v39, %v4189_v60 }
 0x15c   :  { %v3209_v23 = vld [vmem:[%s11346_s0 + $0x9c] sm:$0x3]  ;;  %v3117_v40 = vsel %vm7593_vm2, %v7059_v30, %v3116_v33  ;;  %v3121_v54 = vsel %vm7593_vm2, %v7060_v55, %v3120_v22  ;;  %v3303_v50 = vrot.slane %v3207_v21, 6  ;;  %v7084_v49 = vrot.slane %v3208_v12, 10  ;;  %v7145_v44 = vld [vmem:[%s11346_s0 + $0xa0] sm:$0xe] }
 0x15d   :  { %v7068_v51 = vcombine.low %v3117_v40, %v3121_v54  ;;  %v3307_v17 = vrot.slane %v3209_v23, 6  ;;  %v7492_v63 = vld [vmem:[%s11346_s0 + $0xa0] ss:$8 sps:$4 sm:$0xff]   ;;  %v7146_v0 = vld [vmem:[%s11346_s0 + $0xa4] sm:$0x1]  ;;  %v2635_v19 = vld [vmem:[#allocation3 + $0x30] sm:$0xff]  ;;  %v9885_v22 = vpop.permute.xlu0 %3341  ;;  %v9896_v54 = vpop.permute.xlu1 %493 }
 0x15e   :  { %v3304_v37 = vsel %vm7889_vm11, %v7083_v53, %v3303_v50  ;;  %v7147_v8 = vld [vmem:[%s11346_s0 + $0xa8] sm:$0xe]  ;;  %v7148_v26 = vld [vmem:[%s11346_s0 + $0xac] sm:$0x1]  ;;  %4074 = vrot.lane.b32.xlu0 %v7307_v38, %s7531_s21  ;;  %v7163_v4 = vrot.slane %v7145_v44, 9  ;;  %v3575_v29 = vrot.slane %v7146_v0, 5 }
 0x15f   :  { %3160 = vrot.lane.b32.xlu1 %v7068_v51, %s7530_s12  ;;  %v3308_v56 = vsel %vm7889_vm11, %v7084_v49, %v3307_v17  ;;  %v7164_v27 = vrot.slane %v7147_v8, 9  ;;  %v7201_v11 = vld [vmem:[%s11346_s0 + $0xa0] sm:$0xc]  ;;  %v3579_v5 = vrot.slane %v7148_v26, 5  ;;  %v7202_v10 = vld [vmem:[%s11346_s0 + $0xa4] sm:$0x3] }
 0x160   :  { %v7092_v16 = vcombine.low %v3304_v37, %v3308_v56  ;;  %v7203_v18 = vld [vmem:[%s11346_s0 + $0xa8] sm:$0xc]  ;;  %v7219_v7 = vrot.slane %v7201_v11, 10  ;;  %v3576_v57 = vsel %vm7593_vm2, %v7163_v4, %v3575_v29  ;;  %v7204_v20 = vld [vmem:[%s11346_s0 + $0xac] sm:$0x3]  ;;  %v3759_v24 = vrot.slane %v7202_v10, 6 }
 0x161   :  { %v7220_v47 = vrot.slane %v7203_v18, 10  ;;  %v3580_v9 = vsel %vm7593_vm2, %v7164_v27, %v3579_v5  ;;  %v3763_v31 = vrot.slane %v7204_v20, 6  ;;  %v7281_v35 = vld [vmem:[%s11346_s0 + $0xb0] sm:$0xe]  ;;  %v7282_v33 = vld [vmem:[%s11346_s0 + $0xb4] sm:$0x1] }
 0x162   :  { %v2636_v25 = vld [vmem:[#allocation3 + $0x38] sm:$0xff]  ;;  %3347 = vrot.lane.b32.xlu0 %v7092_v16, %s7532_s9  ;;  %v7172_v52 = vcombine.low %v3576_v57, %v3580_v9  ;;  %v3760_v30 = vsel %vm7889_vm11, %v7219_v7, %v3759_v24  ;;  %v7299_v60 = vrot.slane %v7281_v35, 9  ;;  %v4032_v38 = vrot.slane %v7282_v33, 5  ;;  %v6633_v44 = vld [vmem:[%s11346_s0 + $0x80] sm:$0xf] }
 0x163   :  { %7032 = vmatprep.mubr.msk.bf16.mxu0 %vm317_vm13, %v2636_v25  ;;  %4257 = vst.msk [vmem:[#allocation3 + $0x38] sm:$0xff] %vm317_vm13, %v7360_v59  ;;  %v7283_v55 = vld [vmem:[%s11346_s0 + $0xb8] sm:$0xe]  ;;  %3435 = vrot.lane.b32.xlu1 %v7492_v63, %s7533_s22  ;;  %v3764_v14 = vsel %vm7889_vm11, %v7220_v47, %v3763_v31  ;;  %v7284_v39 = vld [vmem:[%s11346_s0 + $0xbc] sm:$0x1]  ;;  %v216_v26 = vshrl.u32 %v6633_v44, 16  ;;  %v9928_v16 = vpop.permute.xlu0 %3429 }
 0x164   :  { %2805 = vmatmul.mubr.bf16.gmra.mrb[12].mxu0 %v2635_v19  ;;  %v7300_v21 = vrot.slane %v7283_v55, 9  ;;  %v7228_v12 = vcombine.low %v3760_v30, %v3764_v14  ;;  %v7493_v23 = vld [vmem:[%s11346_s0 + $0xb0] ss:$8 sps:$4 sm:$0xff]   ;;  %v4036_v40 = vrot.slane %v7284_v39, 5  ;;  %v4033_v53 = vsel %vm7593_vm2, %v7299_v60, %v4032_v38  ;;  %v6632_v49 = vld [vmem:[%s11346_s0 + $0x7c] sm:$0x1] }
 0x165   :  { %v7494_v50 = vld [vmem:[%s11346_s0 + $0x30] ss:$8 sps:$4 sm:$0xff]   ;;  %v6634_v59 = vld [vmem:[%s11346_s0 + $0x84] sm:$0x1]  ;;  %v211_v8 = vshll.u32 %v6632_v49, 16  ;;  %v219_v19 = vshll.u32 %v6633_v44, 16 }
 0x166   :  { %v6631_v51 = vld [vmem:[%s11346_s0 + $0x78] sm:$0xf]  ;;  %3619 = vrot.lane.b32.xlu0 %v7172_v52, %s7529_s23  ;;  %v4037_v17 = vsel %vm7593_vm2, %v7300_v21, %v4036_v40  ;;  %2989 = vst.msk [vmem:[#allocation3 + $0x30] sm:$0xff] %vm317_vm13, %v7494_v50  ;;  %v225_v29 = vshll.u32 %v6634_v59, 16  ;;  %v6996_v27 = vld [vmem:[%s11346_s0 + $0x7c] sm:$0x3] }
 0x167   :  { %v202_v37 = vshrl.u32 %v6631_v51, 16  ;;  %v205_v63 = vshll.u32 %v6631_v51, 16  ;;  %3803 = vrot.lane.b32.xlu1 %v7228_v12, %s7534_s30  ;;  %v7308_v0 = vcombine.low %v4033_v53, %v4037_v17  ;;  %3173 = vst.msk [vmem:[#allocation3 + $0x30] sm:$0xff] %vm505_vm12, %v9523_v34  ;;  %v2446_v11 = vshrl.u32 %v6995_v2, 16  ;;  %v6997_v34 = vld [vmem:[%s11346_s0 + $0x80] sm:$0xe] }
 0x168   :  { %v213_v5 = vrot.slane %v211_v8, 5  ;;  %v218_v10 = vrot.slane %v216_v26, 4  ;;  %v221_v18 = vrot.slane %v219_v19, 5  ;;  %3360 = vst.msk [vmem:[#allocation3 + $0x30] sm:$0xff] %vm885_vm14, %v9558_v45  ;;  %v2449_v7 = vshll.u32 %v6995_v2, 16  ;;  %v9941_v9 = vpop.permute.xlu1 %873 }
 0x169   :  { %v204_v56 = vrot.slane %v202_v37, 4  ;;  %v207_v4 = vrot.slane %v205_v63, 5  ;;  %v227_v20 = vrot.slane %v225_v29, 5  ;;  %v6998_v24 = vld [vmem:[%s11346_s0 + $0x84] sm:$0x3]  ;;  %v2448_v47 = vrot.slane %v2446_v11, 5 }
 0x16a   :  { %3892 = vrot.lane.b32.xlu0 %v7493_v23, %s7535_s26  ;;  %v2455_v25 = vshrl.u32 %v6996_v27, 16  ;;  %3448 = vst.msk [vmem:[#allocation3 + $0x30] sm:$0xff] %vm1199_vm15, %v9594_v3  ;;  %v4269_v45 = vld [vmem:[#allocation3 + $0x38] sm:$0xff]  ;;  %v222_v31 = vor.u32 %v221_v18, %v218_v10  ;;  %v2451_v52 = vrot.slane %v2449_v7, 6  ;;  %v2458_v30 = vshll.u32 %v6996_v27, 16  ;;  %v9969_v37 = vld [vmem:[#allocation3 + $0x40] sm:$0xff] }
 0x16b   :  { %v208_v57 = vor.u32 %v207_v4, %v204_v56  ;;  %4076 = vrot.lane.b32.xlu1 %v7308_v0, %s7531_s21  ;;  %v2464_v35 = vshrl.u32 %v6997_v34, 16  ;;  %v7325_v33 = vld [vmem:[%s11346_s0 + $0x80] sm:$0xc]  ;;  %3632 = vst.msk [vmem:[#allocation3 + $0x30] sm:$0xff] %vm1384_vm0, %v9646_v42  ;;  %7397 = vmatprep.mubr.msk.bf16.mxu1 %vm317_vm13, %v4269_v45  ;;  %v2467_v14 = vshll.u32 %v6997_v34, 16  ;;  %v2473_v39 = vshrl.u32 %v6998_v24, 16 }
 0x16c   :  { %v2457_v3 = vrot.slane %v2455_v25, 5  ;;  %v7326_v60 = vld [vmem:[%s11346_s0 + $0x84] sm:$0x3]  ;;  %3816 = vst.msk [vmem:[#allocation3 + $0x30] sm:$0xff] %vm1761_vm1, %v9690_v61  ;;  %v223_v38 = vrot.slane %v222_v31, 4  ;;  %v2452_v21 = vor.u32 %v2451_v52, %v2448_v47  ;;  %v2460_v12 = vrot.slane %v2458_v30, 6 }
 0x16d   :  { %v209_v55 = vrot.slane %v208_v57, 4  ;;  %v2466_v23 = vrot.slane %v2464_v35, 5  ;;  %v7327_v42 = vld [vmem:[%s11346_s0 + $0x88] sm:$0xc]  ;;  %3905 = vst.msk [vmem:[#allocation3 + $0x30] sm:$0xff] %vm2075_vm3, %v9733_v36  ;;  %v2469_v53 = vrot.slane %v2467_v14, 6 }
 0x16e   :  { %v2475_v50 = vrot.slane %v2473_v39, 5  ;;  %v2476_v51 = vshll.u32 %v6998_v24, 16  ;;  %v7328_v61 = vld [vmem:[%s11346_s0 + $0x8c] sm:$0x3]  ;;  %4089 = vst.msk [vmem:[#allocation3 + $0x30] sm:$0xff] %vm2260_vm4, %v9780_v1  ;;  %v228_v17 = vsel %vm7704_vm8, %v223_v38, %v227_v20  ;;  %v2453_v44 = vrot.slane %v2452_v21, 4 }
 0x16f   :  { %v214_v40 = vsel %vm7704_vm8, %v209_v55, %v213_v5  ;;  %v2461_v59 = vor.u32 %v2460_v12, %v2457_v3  ;;  %v7349_v36 = vrot.slane %v7325_v33, 10  ;;  %v2470_v0 = vor.u32 %v2469_v53, %v2466_v23  ;;  %v7495_v19 = vld [vmem:[%s11346_s0 + $0x60] ss:$8 sps:$4 sm:$0xff]   ;;  %v6636_v27 = vld [vmem:[%s11346_s0 + $0x8c] sm:$0x1] }
 0x170   :  { %v6648_v63 = vcombine.low %v214_v40, %v228_v17  ;;  %v2478_v8 = vrot.slane %v2476_v51, 6  ;;  %v4192_v26 = vrot.slane %v7326_v60, 6  ;;  %v6635_v1 = vld [vmem:[%s11346_s0 + $0x88] sm:$0xf]  ;;  %v7350_v4 = vrot.slane %v7327_v42, 10  ;;  %2990 = vst.msk [vmem:[#allocation3 + $0x40] sm:$0xff] %vm317_vm13, %v7495_v19 }
 0x171   :  { %v2462_v56 = vsel %vm7682_vm7, %v2453_v44, %v2461_v59  ;;  %v4196_v29 = vrot.slane %v7328_v61, 6  ;;  %v6637_v11 = vld [vmem:[%s11346_s0 + $0x90] sm:$0xf]  ;;  %v2471_v5 = vrot.slane %v2470_v0, 4  ;;  %v6638_v34 = vld [vmem:[%s11346_s0 + $0x94] sm:$0x1] }
 0x172   :  { %v3614_v49 = vpop.permute.xlu0 %3613  ;;  %323 = vst.msk [vmem:[#allocation3 + $0x50] sm:$0xff] %vm317_vm13, %v6648_v63  ;;  %v2479_v10 = vor.u32 %v2478_v8, %v2475_v50  ;;  %v9990_v18 = vsel %vm7889_vm11, %v7349_v36, %v4192_v26  ;;  %v230_v7 = vshrl.u32 %v6635_v1, 16  ;;  %v233_v20 = vshll.u32 %v6635_v1, 16  ;;  %v6999_v25 = vld [vmem:[%s11346_s0 + $0x88] sm:$0xe] }
 0x173   :  { %511 = vst.msk [vmem:[#allocation3 + $0x50] sm:$0xff] %vm505_vm12, %v9572_v41  ;;  %v10000_v57 = vsel %vm7889_vm11, %v7350_v4, %v4196_v29  ;;  %3174 = vst.msk [vmem:[#allocation3 + $0x40] sm:$0xff] %vm505_vm12, %v9833_v48  ;;  %v239_v24 = vshll.u32 %v6636_v27, 16  ;;  %v244_v47 = vshrl.u32 %v6637_v11, 16  ;;  %v247_v30 = vshll.u32 %v6637_v11, 16 }
 0x174   :  { %891 = vst.msk [vmem:[#allocation3 + $0x50] sm:$0xff] %vm885_vm14, %v9615_v28  ;;  %v2480_v41 = vsel %vm7682_vm7, %v2471_v5, %v2479_v10  ;;  %v7361_v31 = vcombine.low %v9990_v18, %v10000_v57  ;;  %v232_v52 = vrot.slane %v230_v7, 4  ;;  %3361 = vst.msk [vmem:[#allocation3 + $0x40] sm:$0xff] %vm885_vm14, %v9885_v22  ;;  %v7000_v48 = vld [vmem:[%s11346_s0 + $0x8c] sm:$0x3]  ;;  %v235_v33 = vrot.slane %v233_v20, 5 }
 0x175   :  { %v9977_v2 = vpop.permute.xlu1 %1187  ;;  %v7001_v35 = vld [vmem:[%s11346_s0 + $0x90] sm:$0xe]  ;;  %v7015_v28 = vcombine.low %v2462_v56, %v2480_v41  ;;  %1205 = vst.msk [vmem:[#allocation3 + $0x50] sm:$0xff] %vm1199_vm15, %v9660_v43  ;;  %v241_v55 = vrot.slane %v239_v24, 5  ;;  %v246_v3 = vrot.slane %v244_v47, 4  ;;  %3449 = vst.msk [vmem:[#allocation3 + $0x40] sm:$0xff] %vm1199_vm15, %v9928_v16 }
 0x176   :  { %v4268_v14 = vld [vmem:[#allocation3 + $0x30] sm:$0xff]  ;;  %1390 = vst.msk [vmem:[#allocation3 + $0x50] sm:$0xff] %vm1384_vm0, %v9705_v13  ;;  %v249_v22 = vrot.slane %v247_v30, 5  ;;  %v253_v39 = vshll.u32 %v6638_v34, 16  ;;  %v2482_v38 = vshrl.u32 %v6999_v25, 16  ;;  %v2485_v21 = vshll.u32 %v6999_v25, 16 }
 0x177   :  { %v3798_v45 = vpop.permute.xlu0 %3797  ;;  %v7002_v60 = vld [vmem:[%s11346_s0 + $0x94] sm:$0x3]  ;;  %4440 = vmatmul.mubr.bf16.gmra.mrb[12].mxu1 %v4268_v14  ;;  %3633 = vst.msk [vmem:[#allocation3 + $0x40] sm:$0xff] %vm1384_vm0, %v3614_v49  ;;  %v236_v16 = vor.u32 %v235_v33, %v232_v52  ;;  %v2491_v13 = vshrl.u32 %v7000_v48, 16  ;;  %v2494_v12 = vshll.u32 %v7000_v48, 16  ;;  %v2500_v23 = vshrl.u32 %v7001_v35, 16 }
 0x178   :  { %2625 = vst.msk [vmem:[#allocation3 + $0x48] sm:$0xff] %vm317_vm13, %v7015_v28  ;;  %v7329_v42 = vld [vmem:[%s11346_s0 + $0x90] sm:$0xc]  ;;  %v250_v53 = vor.u32 %v249_v22, %v246_v3  ;;  %v255_v50 = vrot.slane %v253_v39, 5  ;;  %v2484_v51 = vrot.slane %v2482_v38, 5  ;;  %v2487_v61 = vrot.slane %v2485_v21, 6 }
 0x179   :  { %v10031_v43 = vpop.permute.xlu1 %1372  ;;  %1767 = vst.msk [vmem:[#allocation3 + $0x50] sm:$0xff] %vm1761_vm1, %v9750_v46  ;;  %3817 = vst.msk [vmem:[#allocation3 + $0x40] sm:$0xff] %vm1761_vm1, %v3798_v45  ;;  %v7330_v46 = vld [vmem:[%s11346_s0 + $0x94] sm:$0x3]  ;;  %v7331_v49 = vld [vmem:[%s11346_s0 + $0x98] sm:$0xc] }
 0x17a   :  { %2081 = vst.msk [vmem:[#allocation3 + $0x50] sm:$0xff] %vm2075_vm3, %v9804_v62  ;;  %v237_v17 = vrot.slane %v236_v16, 4  ;;  %v2493_v44 = vrot.slane %v2491_v13, 5  ;;  %v2496_v62 = vrot.slane %v2494_v12, 6  ;;  %v2502_v59 = vrot.slane %v2500_v23, 5 }
 0x17b   :  { %v3887_v40 = vpop.permute.xlu0 %3886  ;;  %2266 = vst.msk [vmem:[#allocation3 + $0x50] sm:$0xff] %vm2260_vm4, %v9856_v15  ;;  %v7332_v36 = vld [vmem:[%s11346_s0 + $0x9c] sm:$0x3]  ;;  %v251_v63 = vrot.slane %v250_v53, 4  ;;  %v2488_v0 = vor.u32 %v2487_v61, %v2484_v51  ;;  %v2503_v8 = vshll.u32 %v7001_v35, 16  ;;  %v2509_v26 = vshrl.u32 %v7002_v60, 16 }
 0x17c   :  { %3906 = vst.msk [vmem:[#allocation3 + $0x40] sm:$0xff] %vm2075_vm3, %v3887_v40  ;;  %v242_v19 = vsel %vm7704_vm8, %v237_v17, %v241_v55  ;;  %v2497_v1 = vor.u32 %v2496_v62, %v2493_v44  ;;  %v2512_v56 = vshll.u32 %v7002_v60, 16  ;;  %v7351_v4 = vrot.slane %v7329_v42, 10  ;;  %v7496_v15 = vld [vmem:[%s11346_s0 + $0x70] ss:$8 sps:$4 sm:$0xff]  }
 0x17d   :  { %v6639_v29 = vld [vmem:[%s11346_s0 + $0x98] sm:$0xf]  ;;  %v256_v27 = vsel %vm7704_vm8, %v251_v63, %v255_v50  ;;  %v2489_v11 = vrot.slane %v2488_v0, 4  ;;  %v2505_v5 = vrot.slane %v2503_v8, 6  ;;  %v2511_v10 = vrot.slane %v2509_v26, 5 }
 0x17e   :  { %v6640_v7 = vld [vmem:[%s11346_s0 + $0x9c] sm:$0x1]  ;;  %v6649_v20 = vcombine.low %v242_v19, %v256_v27  ;;  %v2514_v24 = vrot.slane %v2512_v56, 6  ;;  %v4200_v47 = vrot.slane %v7330_v46, 6  ;;  %v7352_v25 = vrot.slane %v7331_v49, 10 }
 0x17f   :  { %v6641_v45 = vld [vmem:[%s11346_s0 + $0xa0] sm:$0xf]  ;;  %v2638_v41 = vld [vmem:[#allocation3 + $0x48] sm:$0xff]  ;;  %v2506_v52 = vor.u32 %v2505_v5, %v2502_v59  ;;  %v4204_v30 = vrot.slane %v7332_v36, 6  ;;  %v258_v48 = vshrl.u32 %v6639_v29, 16  ;;  %v2498_v35 = vsel %vm7682_vm7, %v2489_v11, %v2497_v1 }
 0x180   :  { %v1750_v34 = vpop.permute.xlu1 %1749  ;;  %7033 = vmatprep.mubr.msk.bf16.mxu0 %vm317_vm13, %v2638_v41  ;;  %4258 = vst.msk [vmem:[#allocation3 + $0x48] sm:$0xff] %vm317_vm13, %v7361_v31  ;;  %324 = vst.msk [vmem:[#allocation3 + $0x60] sm:$0xff] %vm317_vm13, %v6649_v20  ;;  %v2515_v28 = vor.u32 %v2514_v24, %v2511_v10  ;;  %v6642_v33 = vld [vmem:[%s11346_s0 + $0xa4] sm:$0x1]  ;;  %v261_v55 = vshll.u32 %v6639_v29, 16  ;;  %v267_v3 = vshll.u32 %v6640_v7, 16  ;;  %v10089_v57 = vsel %vm7889_vm11, %v7351_v4, %v4200_v47 }
 0x181   :  { %v7003_v14 = vld [vmem:[%s11346_s0 + $0x98] sm:$0xe]  ;;  %2813 = vmatmul.mubr.bf16.gmra.mrb[16].mxu0 %v9969_v37  ;;  %512 = vst.msk [vmem:[#allocation3 + $0x60] sm:$0xff] %vm505_vm12, %v9896_v54  ;;  %v2507_v18 = vrot.slane %v2506_v52, 4  ;;  %v260_v39 = vrot.slane %v258_v48, 4  ;;  %v272_v60 = vshrl.u32 %v6641_v45, 16  ;;  %v10097_v38 = vsel %vm7889_vm11, %v7352_v25, %v4204_v30 }
 0x182   :  { %v10091_v31 = vld [vmem:[#allocation3 + $0x50] sm:$0xff]  ;;  %892 = vst.msk [vmem:[#allocation3 + $0x60] sm:$0xff] %vm885_vm14, %v9941_v9  ;;  %v263_v54 = vrot.slane %v261_v55, 5  ;;  %v269_v37 = vrot.slane %v267_v3, 5  ;;  %v275_v21 = vshll.u32 %v6641_v45, 16  ;;  %v281_v23 = vshll.u32 %v6642_v33, 16 }
 0x183   :  { %v4071_v22 = vpop.permute.xlu0 %4070  ;;  %2991 = vst.msk [vmem:[#allocation3 + $0x50] sm:$0xff] %vm317_vm13, %v7496_v15  ;;  %v7004_v16 = vld [vmem:[%s11346_s0 + $0x9c] sm:$0x3]  ;;  %v2516_v13 = vsel %vm7682_vm7, %v2507_v18, %v2515_v28  ;;  %v274_v12 = vrot.slane %v272_v60, 4  ;;  %v7005_v42 = vld [vmem:[%s11346_s0 + $0xa0] sm:$0xe]  ;;  %v7362_v25 = vcombine.low %v10089_v57, %v10097_v38 }
 0x184   :  { %4090 = vst.msk [vmem:[#allocation3 + $0x40] sm:$0xff] %vm2260_vm4, %v4071_v22  ;;  %v2518_v40 = vshrl.u32 %v7003_v14, 16  ;;  %v7016_v53 = vcombine.low %v2498_v35, %v2516_v13  ;;  %v264_v50 = vor.u32 %v263_v54, %v260_v39  ;;  %v277_v51 = vrot.slane %v275_v21, 5  ;;  %v7006_v61 = vld [vmem:[%s11346_s0 + $0xa4] sm:$0x3] }
 0x185   :  { %1206 = vst.msk [vmem:[#allocation3 + $0x60] sm:$0xff] %vm1199_vm15, %v9977_v2  ;;  %v2064_v9 = vpop.permute.xlu1 %2063  ;;  %v2521_v46 = vshll.u32 %v7003_v14, 16  ;;  %v283_v2 = vrot.slane %v281_v23, 5  ;;  %v2527_v17 = vshrl.u32 %v7004_v16, 16  ;;  %v2530_v44 = vshll.u32 %v7004_v16, 16 }
 0x186   :  { %1391 = vst.msk [vmem:[#allocation3 + $0x60] sm:$0xff] %vm1384_vm0, %v10031_v43  ;;  %v2520_v49 = vrot.slane %v2518_v40, 5  ;;  %v265_v59 = vrot.slane %v264_v50, 4  ;;  %v278_v43 = vor.u32 %v277_v51, %v274_v12  ;;  %v2536_v63 = vshrl.u32 %v7005_v42, 16  ;;  %v10123_v56 = vld [vmem:[%s11346_s0 + $0xa0] sm:$0xc] }
 0x187   :  { %1768 = vst.msk [vmem:[#allocation3 + $0x60] sm:$0xff] %vm1761_vm1, %v1750_v34  ;;  %v2523_v36 = vrot.slane %v2521_v46, 6  ;;  %v2529_v8 = vrot.slane %v2527_v17, 5  ;;  %v2532_v26 = vrot.slane %v2530_v44, 6  ;;  %v2539_v19 = vshll.u32 %v7005_v42, 16  ;;  %v4271_v4 = vld [vmem:[#allocation3 + $0x48] sm:$0xff] }
 0x188   :  { %2626 = vst.msk [vmem:[#allocation3 + $0x58] sm:$0xff] %vm317_vm13, %v7016_v53  ;;  %v3157_v62 = vpop.permute.xlu0 %3156  ;;  %v2545_v1 = vshrl.u32 %v7006_v61, 16  ;;  %v270_v15 = vsel %vm7704_vm8, %v265_v59, %v269_v37  ;;  %v279_v29 = vrot.slane %v278_v43, 4  ;;  %v2538_v11 = vrot.slane %v2536_v63, 5  ;;  %v7334_v5 = vld [vmem:[%s11346_s0 + $0xa4] sm:$0x3]  ;;  %7398 = vmatprep.mubr.msk.bf16.mxu1 %vm317_vm13, %v4271_v4 }
 0x189   :  { %2082 = vst.msk [vmem:[#allocation3 + $0x60] sm:$0xff] %vm2075_vm3, %v2064_v9  ;;  %v2249_v0 = vpop.permute.xlu1 %2248  ;;  %v2524_v27 = vor.u32 %v2523_v36, %v2520_v49  ;;  %v2533_v10 = vor.u32 %v2532_v26, %v2529_v8  ;;  %v2541_v34 = vrot.slane %v2539_v19, 6  ;;  %v2548_v20 = vshll.u32 %v7006_v61, 16  ;;  %v7007_v47 = vld [vmem:[%s11346_s0 + $0xa8] sm:$0xe] }
 0x18a   :  { %3175 = vst.msk [vmem:[#allocation3 + $0x50] sm:$0xff] %vm505_vm12, %v3157_v62  ;;  %v2547_v7 = vrot.slane %v2545_v1, 5  ;;  %v284_v45 = vsel %vm7704_vm8, %v279_v29, %v283_v2  ;;  %v7335_v52 = vld [vmem:[%s11346_s0 + $0xa8] sm:$0xc]  ;;  %v7008_v30 = vld [vmem:[%s11346_s0 + $0xac] sm:$0x3] }
 0x18b   :  { %2267 = vst.msk [vmem:[#allocation3 + $0x60] sm:$0xff] %vm2260_vm4, %v2249_v0  ;;  %v4270_v24 = vld [vmem:[#allocation3 + $0x40] sm:$0xff]  ;;  %v2525_v41 = vrot.slane %v2524_v27, 4  ;;  %v6650_v35 = vcombine.low %v270_v15, %v284_v45  ;;  %v2542_v28 = vor.u32 %v2541_v34, %v2538_v11  ;;  %v2550_v33 = vrot.slane %v2548_v20, 6  ;;  %v7336_v55 = vld [vmem:[%s11346_s0 + $0xac] sm:$0x3] }
 0x18c   :  { %4448 = vmatmul.mubr.bf16.gmra.mrb[16].mxu1 %v4270_v24  ;;  %v7353_v14 = vrot.slane %v10123_v56, 10  ;;  %v4208_v18 = vrot.slane %v7334_v5, 6  ;;  %v7497_v57 = vld [vmem:[%s11346_s0 + $0x80] ss:$8 sps:$4 sm:$0xff]   ;;  %v2554_v22 = vshrl.u32 %v7007_v47, 16  ;;  %v2557_v54 = vshll.u32 %v7007_v47, 16 }
 0x18d   :  { %v496_v48 = vpop.permute.xlu1 %495  ;;  %v2534_v3 = vsel %vm7682_vm7, %v2525_v41, %v2533_v10  ;;  %325 = vst.msk [vmem:[#allocation3 + $0x70] sm:$0xff] %vm317_vm13, %v6650_v35  ;;  %v2543_v60 = vrot.slane %v2542_v28, 4  ;;  %v2551_v38 = vor.u32 %v2550_v33, %v2547_v7  ;;  %v2563_v37 = vshrl.u32 %v7008_v30, 16  ;;  %v7010_v16 = vld [vmem:[%s11346_s0 + $0xb4] sm:$0x3] }
 0x18e   :  { %513 = vst.msk [vmem:[#allocation3 + $0x70] sm:$0xff] %vm505_vm12, %v496_v48  ;;  %v7354_v21 = vrot.slane %v7335_v52, 10  ;;  %v2556_v13 = vrot.slane %v2554_v22, 5  ;;  %v2566_v9 = vshll.u32 %v7008_v30, 16  ;;  %v2572_v12 = vshrl.u32 %v7009_v32, 16 }
 0x18f   :  { %v2640_v39 = vld [vmem:[#allocation3 + $0x58] sm:$0xff]  ;;  %v2552_v23 = vsel %vm7682_vm7, %v2543_v60, %v2551_v38  ;;  %v4212_v42 = vrot.slane %v7336_v55, 6  ;;  %v2559_v53 = vrot.slane %v2557_v54, 6  ;;  %v2565_v50 = vrot.slane %v2563_v37, 5  ;;  %v7337_v19 = vld [vmem:[%s11346_s0 + $0xb0] sm:$0xc] }
 0x190   :  { %7034 = vmatprep.mubr.msk.bf16.mxu0 %vm317_vm13, %v2640_v39  ;;  %4259 = vst.msk [vmem:[#allocation3 + $0x58] sm:$0xff] %vm317_vm13, %v7362_v25  ;;  %v3344_v51 = vpop.permute.xlu0 %3343  ;;  %v7017_v61 = vcombine.low %v2534_v3, %v2552_v23  ;;  %v2568_v46 = vrot.slane %v2566_v9, 6  ;;  %v2574_v2 = vrot.slane %v2572_v12, 5  ;;  %v2575_v49 = vshll.u32 %v7009_v32, 16  ;;  %v7338_v1 = vld [vmem:[%s11346_s0 + $0xb4] sm:$0x3] }
 0x191   :  { %2821 = vmatmul.mubr.bf16.gmra.mrb[20].mxu0 %v10091_v31  ;;  %3362 = vst.msk [vmem:[#allocation3 + $0x50] sm:$0xff] %vm885_vm14, %v3344_v51  ;;  %v2560_v17 = vor.u32 %v2559_v53, %v2556_v13  ;;  %v2581_v44 = vshrl.u32 %v7010_v16, 16  ;;  %v2584_v62 = vshll.u32 %v7010_v16, 16  ;;  %v4209_v31 = vsel %vm7889_vm11, %v7353_v14, %v4208_v18 }
 0x192   :  { %v2641_v40 = vld [vmem:[#allocation3 + $0x60] sm:$0xff]  ;;  %2627 = vst.msk [vmem:[#allocation3 + $0x68] sm:$0xff] %vm317_vm13, %v7017_v61  ;;  %v2569_v59 = vor.u32 %v2568_v46, %v2565_v50  ;;  %v2577_v43 = vrot.slane %v2575_v49, 6  ;;  %v4213_v36 = vsel %vm7889_vm11, %v7354_v21, %v4212_v42 }
 0x193   :  { %2992 = vst.msk [vmem:[#allocation3 + $0x60] sm:$0xff] %vm317_vm13, %v7497_v57  ;;  %v2561_v63 = vrot.slane %v2560_v17, 4  ;;  %v2583_v0 = vrot.slane %v2581_v44, 5  ;;  %v2586_v8 = vrot.slane %v2584_v62, 6 }
 0x194   :  { %v2578_v26 = vor.u32 %v2577_v43, %v2574_v2 }
 0x195   :  { %11 = vsyncpa [#allocation5], 0  ;;  %v2587_v56 = vor.u32 %v2586_v8, %v2583_v0  ;;  %v7339_v4 = vld [vmem:[%s11346_s0 + $0xb8] sm:$0xc]  ;;  %v7340_v15 = vld [vmem:[%s11346_s0 + $0xbc] sm:$0x3]  ;;  %v7363_v27 = vcombine.low %v4209_v31, %v4213_v36  ;;  %v2570_v5 = vsel %vm7682_vm7, %v2561_v63, %v2569_v59 }
 0x196   :  { %v3432_v11 = vpop.permute.xlu0 %3431  ;;  %v2579_v10 = vrot.slane %v2578_v26, 4  ;;  %v7355_v34 = vrot.slane %v7337_v19, 10  ;;  %v4216_v20 = vrot.slane %v7338_v1, 6  ;;  %v7356_v24 = vrot.slane %v7339_v4, 10  ;;  %v10211_v3 = vld [vmem:[%s11348_s2] ss:$0 sm:$0xff] }
 0x197   :  { %v4273_v29 = vld [vmem:[#allocation3 + $0x58] sm:$0xff]  ;;  %3450 = vst.msk [vmem:[#allocation3 + $0x50] sm:$0xff] %vm1199_vm15, %v3432_v11  ;;  %v4220_v47 = vrot.slane %v7340_v15, 6  ;;  %vm2861_vm2 = vcmask 64512   ;;  %v10226_v50 = vld [vmem:[%s11348_s2 + $0x1] ss:$0 sm:$0xff] }
 0x198   :  { %7399 = vmatprep.mubr.msk.bf16.mxu1 %vm317_vm13, %v4273_v29  ;;  %v2588_v7 = vsel %vm7682_vm7, %v2579_v10, %v2587_v56  ;;  %v4217_v52 = vsel %vm7889_vm11, %v7355_v34, %v4216_v20  ;;  %v7498_v61 = vld [vmem:[%s11346_s0 + $0x90] ss:$8 sps:$4 sm:$0xff]   ;;  %vm7538_vm5 = vmmov 0   ;;  %vm4569_vm6 = vcmask 1041409   ;;  %s7540_s10 = smov 120   ;;  %s7541_s1 = smov 8  }
 0x199   :  { %v2642_v25 = vld [vmem:[#allocation3 + $0x68] sm:$0xff]  ;;  %v7018_v45 = vcombine.low %v2570_v5, %v2588_v7  ;;  %v4221_v6 = vsel %vm7889_vm11, %v7356_v24, %v4220_v47  ;;  %vm4648_vm7 = vcmask 261120   ;;  %s7546_s11 = smov 72   ;;  %s7547_s13 = smov 88   ;;  %vm5579_vm8 = vcmask 195584  }
 0x19a   :  { %7035 = vmatprep.mubr.msk.bf16.mxu0 %vm317_vm13, %v2642_v25  ;;  %4260 = vst.msk [vmem:[#allocation3 + $0x68] sm:$0xff] %vm317_vm13, %v7363_v27  ;;  %v7364_v30 = vcombine.low %v4217_v52, %v4221_v6  ;;  %s7548_s14 = smov 40   ;;  %s7549_s15 = smov 56   ;;  %vm5582_vm9 = vcmask 326656   ;;  %vm5584_vm10 = vcmask 392192   ;;  %vm5586_vm11 = vcmask 457728  }
 0x19b   :  { %v876_v41 = vpop.permute.xlu1 %875  ;;  %2829 = vmatmul.mubr.bf16.gmra.mrb[24].mxu0 %v2641_v40  ;;  %2628 = vst.msk [vmem:[#allocation3 + $0x78] sm:$0xff] %vm317_vm13, %v7018_v45  ;;  %s7550_s16 = smov 104  }
 0x19c   :  { %893 = vst.msk [vmem:[#allocation3 + $0x70] sm:$0xff] %vm885_vm14, %v876_v41 }
 0x1a1   :  { %v4275_v9 = vld [vmem:[#allocation3 + $0x68] sm:$0xff] }
 0x1a2   :  { %v2644_v48 = vld [vmem:[#allocation3 + $0x78] sm:$0xff] }
 0x1a3   :  { %7036 = vmatprep.mubr.msk.bf16.mxu0 %vm317_vm13, %v2644_v48  ;;  %4261 = vst.msk [vmem:[#allocation3 + $0x78] sm:$0xff] %vm317_vm13, %v7364_v30 }
 0x1a5   :  { %v3616_v35 = vpop.permute.xlu0 %3615 }
 0x1a6   :  { %3634 = vst.msk [vmem:[#allocation3 + $0x50] sm:$0xff] %vm1384_vm0, %v3616_v35 }
 0x1a8   :  { %v1190_v28 = vpop.permute.xlu1 %1189 }
 0x1a9   :  { %1207 = vst.msk [vmem:[#allocation3 + $0x70] sm:$0xff] %vm1199_vm15, %v1190_v28 }
 0x1aa   :  { %v3800_v33 = vpop.permute.xlu0 %3799  ;;  %v4277_v20 = vld [vmem:[#allocation3 + $0x78] sm:$0xff] }
 0x1ab   :  { %3818 = vst.msk [vmem:[#allocation3 + $0x50] sm:$0xff] %vm1761_vm1, %v3800_v33 }
 0x1ac   :  { %v1375_v55 = vpop.permute.xlu1 %1374 }
 0x1ad   :  { %1392 = vst.msk [vmem:[#allocation3 + $0x70] sm:$0xff] %vm1384_vm0, %v1375_v55  ;;  %v4559_v55 = vld [vmem:[%s11349_s3] sm:$0xff] }
 0x1ae   :  { %v3889_v58 = vpop.permute.xlu0 %3888 }
 0x1af   :  { %3907 = vst.msk [vmem:[#allocation3 + $0x50] sm:$0xff] %vm2075_vm3, %v3889_v58 }
 0x1b3   :  { %v1752_v32 = vpop.permute.xlu1 %1751 }
 0x1b4   :  { %1769 = vst.msk [vmem:[#allocation3 + $0x70] sm:$0xff] %vm1761_vm1, %v1752_v32 }
 0x1b6   :  { %v4073_v14 = vpop.permute.xlu0 %4072 }
 0x1b7   :  { %4091 = vst.msk [vmem:[#allocation3 + $0x50] sm:$0xff] %vm2260_vm4, %v4073_v14  ;;  %v7537_v14 = vmov 0.0  }
 0x1b8   :  { %v2066_v57 = vpop.permute.xlu1 %2065  ;;  %7412 = vmatprep.subr.mxu0 %v7537_v14 }
 0x1b9   :  { %2083 = vst.msk [vmem:[#allocation3 + $0x70] sm:$0xff] %vm2075_vm3, %v2066_v57  ;;  %7413 = vmatpush3.msra.mxu0 %v4559_v55 }
 0x1ba   :  { %v3159_v38 = vpop.permute.xlu0 %3158 }
 0x1bb   :  { %3176 = vst.msk [vmem:[#allocation3 + $0x60] sm:$0xff] %vm505_vm12, %v3159_v38 }
 0x1bc   :  { %v2782_v18 = vpop.f32.mrb[0].mxu0  ;;  %v2251_v16 = vpop.permute.xlu1 %2250 }
 0x1bd   :  { %v2783_v22 = vadd.f32 %v10211_v3, %v2782_v18  ;;  %v2784_v39 = vpop.f32.mrb[1].mxu0  ;;  %2268 = vst.msk [vmem:[#allocation3 + $0x70] sm:$0xff] %vm2260_vm4, %v2251_v16 }
 0x1be   :  { %v2785_v60 = vpop.f32.mrb[2].mxu0  ;;  %v4272_v12 = vld [vmem:[#allocation3 + $0x50] sm:$0xff]  ;;  %v3434_v40 = vpop.permute.xlu0 %3433 }
 0x1bf   :  { %v2845_v54 = vmax.f32 %v2783_v22, 0.0  ;;  %v2786_v37 = vadd.f32 %v10211_v3, %v2785_v60  ;;  %v2787_v21 = vpop.f32.mrb[3].mxu0  ;;  %4456 = vmatmul.mubr.bf16.gmra.mrb[20].mxu1 %v4272_v12 }
 0x1c0   :  { %v3346_v51 = vpop.permute.xlu1 %3345  ;;  %7400 = vmatprep.mubr.msk.bf16.mxu1 %vm317_vm13, %v4275_v9 }
 0x1c1   :  { %2862 = vst.msk [vmem:[#allocation2] sm:$0xff] %vm2861_vm2, %v2845_v54  ;;  %v2846_v13 = vmax.f32 %v2786_v37, 0.0  ;;  %v2878_v23 = vsel %vm2861_vm2, %v2845_v54, 0.0 }
 0x1c2   :  { %3363 = vst.msk [vmem:[#allocation3 + $0x60] sm:$0xff] %vm885_vm14, %v3346_v51 }
 0x1c3   :  { %2863 = vst.msk [vmem:[#allocation2 + $0x8] sm:$0xff] %vm2861_vm2, %v2846_v13  ;;  %v2879_v42 = vsel %vm2861_vm2, %v2846_v13, 0.0 }
 0x1c4   :  { %v2880_v53 = vadd.f32 %v2879_v42, %v2878_v23  ;;  %3451 = vst.msk [vmem:[#allocation3 + $0x60] sm:$0xff] %vm1199_vm15, %v3434_v40  ;;  %v3618_v44 = vpop.permute.xlu1 %3617  ;;  %v2643_v62 = vld [vmem:[#allocation3 + $0x70] sm:$0xff] }
 0x1c5   :  { %v4417_v46 = vpop.f32.mrb[0].mxu1  ;;  %3635 = vst.msk [vmem:[#allocation3 + $0x60] sm:$0xff] %vm1384_vm0, %v3618_v44  ;;  %2837 = vmatmul.mubr.bf16.gmra.mrb[28].mxu0 %v2643_v62 }
 0x1c6   :  { %v4418_v2 = vadd.f32 %v10226_v50, %v4417_v46  ;;  %v4419_v49 = vpop.f32.mrb[1].mxu1  ;;  %2993 = vst.msk [vmem:[#allocation3 + $0x70] sm:$0xff] %vm317_vm13, %v7498_v61  ;;  %7414 = vmatprep.mubr.msk.f32.mxu0 %vm7538_vm5, %v7537_v14 }
 0x1c7   :  { %v4420_v17 = vpop.f32.mrb[2].mxu1 }
 0x1c8   :  { %v4480_v31 = vmax.f32 %v4418_v2, 0.0  ;;  %v4421_v59 = vadd.f32 %v10226_v50, %v4420_v17  ;;  %v4422_v43 = vpop.f32.mrb[3].mxu1  ;;  %v3891_v26 = vpop.permute.xlu1 %3890 }
 0x1ca   :  { %4497 = vst.msk [vmem:[#allocation2 + $0x80] sm:$0xff] %vm2861_vm2, %v4480_v31  ;;  %v4481_v36 = vmax.f32 %v4421_v59, 0.0  ;;  %v4513_v63 = vsel %vm2861_vm2, %v4480_v31, 0.0 }
 0x1cc   :  { %4498 = vst.msk [vmem:[#allocation2 + $0x88] sm:$0xff] %vm2861_vm2, %v4481_v36  ;;  %v4514_v0 = vsel %vm2861_vm2, %v4481_v36, 0.0  ;;  %v3802_v19 = vpop.permute.xlu0 %3801 }
 0x1cd   :  { %v4515_v8 = vadd.f32 %v4514_v0, %v4513_v63  ;;  %3819 = vst.msk [vmem:[#allocation3 + $0x60] sm:$0xff] %vm1761_vm1, %v3802_v19 }
 0x1ce   :  { %3908 = vst.msk [vmem:[#allocation3 + $0x60] sm:$0xff] %vm2075_vm3, %v3891_v26 }
 0x1d0   :  { %v4075_v1 = vpop.permute.xlu0 %4074 }
 0x1d1   :  { %v3161_v56 = vpop.permute.xlu1 %3160  ;;  %4092 = vst.msk [vmem:[#allocation3 + $0x60] sm:$0xff] %vm2260_vm4, %v4075_v1 }
 0x1d2   :  { %3177 = vst.msk [vmem:[#allocation3 + $0x70] sm:$0xff] %vm505_vm12, %v3161_v56  ;;  %vm5588_vm12 = vcmask 523264  }
 0x1d4   :  { %v3348_v15 = vpop.permute.xlu0 %3347 }
 0x1d5   :  { %3364 = vst.msk [vmem:[#allocation3 + $0x70] sm:$0xff] %vm885_vm14, %v3348_v15  ;;  %v3436_v11 = vpop.permute.xlu1 %3435  ;;  %vm5590_vm14 = vcmask 588800  }
 0x1d6   :  { %3452 = vst.msk [vmem:[#allocation3 + $0x70] sm:$0xff] %vm1199_vm15, %v3436_v11  ;;  %vm5592_vm15 = vcmask 654336  }
 0x1d8   :  { %v2790_v4 = vpop.f32.mrb[4].mxu0  ;;  %v3620_v24 = vpop.permute.xlu0 %3619  ;;  %v4274_v47 = vld [vmem:[#allocation3 + $0x60] sm:$0xff] }
 0x1d9   :  { %v2791_v29 = vadd.f32 %v10211_v3, %v2790_v4  ;;  %v2792_v27 = vpop.f32.mrb[5].mxu0  ;;  %3636 = vst.msk [vmem:[#allocation3 + $0x70] sm:$0xff] %vm1384_vm0, %v3620_v24  ;;  %v3804_v41 = vpop.permute.xlu1 %3803  ;;  %4464 = vmatmul.mubr.bf16.gmra.mrb[24].mxu1 %v4274_v47  ;;  %vm5594_vm0 = vcmask 719872  }
 0x1da   :  { %v2793_v5 = vpop.f32.mrb[6].mxu0  ;;  %3820 = vst.msk [vmem:[#allocation3 + $0x70] sm:$0xff] %vm1761_vm1, %v3804_v41  ;;  %7401 = vmatprep.mubr.msk.bf16.mxu1 %vm317_vm13, %v4277_v20  ;;  %vm5596_vm1 = vcmask 785408  }
 0x1db   :  { %v2847_v10 = vmax.f32 %v2791_v29, 0.0  ;;  %v2794_v34 = vadd.f32 %v10211_v3, %v2793_v5  ;;  %v2795_v7 = vpop.f32.mrb[7].mxu0 }
 0x1dc   :  { %v3893_v48 = vpop.permute.xlu0 %3892 }
 0x1dd   :  { %2864 = vst.msk [vmem:[#allocation2 + $0x10] sm:$0xff] %vm2861_vm2, %v2847_v10  ;;  %v2881_v25 = vsel %vm2861_vm2, %v2847_v10, 0.0  ;;  %v2848_v45 = vmax.f32 %v2794_v34, 0.0  ;;  %v4077_v35 = vpop.permute.xlu1 %4076 }
 0x1de   :  { %v2882_v52 = vadd.f32 %v2881_v25, %v2880_v53  ;;  %3909 = vst.msk [vmem:[#allocation3 + $0x70] sm:$0xff] %vm2075_vm3, %v3893_v48  ;;  %vm5598_vm3 = vcmask 850944  }
 0x1df   :  { %2865 = vst.msk [vmem:[#allocation2 + $0x18] sm:$0xff] %vm2861_vm2, %v2848_v45  ;;  %v2883_v6 = vsel %vm2861_vm2, %v2848_v45, 0.0 }
 0x1e0   :  { %v2884_v30 = vadd.f32 %v2883_v6, %v2882_v52  ;;  %4093 = vst.msk [vmem:[#allocation3 + $0x70] sm:$0xff] %vm2260_vm4, %v4077_v35  ;;  %vm5600_vm4 = vcmask 916480  }
 0x1e7   :  { %v4276_v28 = vld [vmem:[#allocation3 + $0x70] sm:$0xff] }
 0x1e8   :  { %4472 = vmatmul.mubr.bf16.gmra.mrb[28].mxu1 %v4276_v28 }
 0x1e9   :  { %7425 = vmatprep.mubr.msk.f32.mxu1 %vm7538_vm5, %v7537_v14  ;;  %vm5602_vm5 = vcmask 982016  }
 0x1f6   :  { %v4425_v33 = vpop.f32.mrb[4].mxu1 }
 0x1f7   :  { %v4426_v58 = vadd.f32 %v10226_v50, %v4425_v33  ;;  %v4427_v32 = vpop.f32.mrb[5].mxu1 }
 0x1f8   :  { %v4428_v18 = vpop.f32.mrb[6].mxu1 }
 0x1f9   :  { %v4482_v57 = vmax.f32 %v4426_v58, 0.0  ;;  %v4429_v22 = vadd.f32 %v10226_v50, %v4428_v18  ;;  %v4430_v39 = vpop.f32.mrb[7].mxu1 }
 0x1fa   :  { %v4644_v39 = vld [vmem:[%s11351_s5] sm:$0xff] }
 0x1fb   :  { %4499 = vst.msk [vmem:[#allocation2 + $0x90] sm:$0xff] %vm2861_vm2, %v4482_v57  ;;  %v4516_v60 = vsel %vm2861_vm2, %v4482_v57, 0.0  ;;  %v4483_v38 = vmax.f32 %v4429_v22, 0.0 }
 0x1fc   :  { %v4517_v54 = vadd.f32 %v4516_v60, %v4515_v8  ;;  %v4645_v60 = vld [vmem:[%s11351_s5 + $0x8] sm:$0xff] }
 0x1fd   :  { %4500 = vst.msk [vmem:[#allocation2 + $0x98] sm:$0xff] %vm2861_vm2, %v4483_v38  ;;  %v4518_v37 = vsel %vm2861_vm2, %v4483_v38, 0.0  ;;  %v4646_v38 = vld [vmem:[%s11351_s5 + $0x10] sm:$0xff] }
 0x1fe   :  { %v4519_v21 = vadd.f32 %v4518_v37, %v4517_v54 }
 0x20a   :  { %v2798_v16 = vpop.f32.mrb[8].mxu0 }
 0x20b   :  { %v2799_v13 = vadd.f32 %v10211_v3, %v2798_v16  ;;  %v2800_v9 = vpop.f32.mrb[9].mxu0  ;;  %v7539_v16 = vmov 0.0|0.0  }
 0x20c   :  { %v2801_v12 = vpop.f32.mrb[10].mxu0  ;;  %7428 = vmatprep.subr.bf16.mxu1 %v7539_v16  ;;  %v4647_v9 = vld [vmem:[%s11351_s5 + $0x18] sm:$0xff] }
 0x20d   :  { %v2849_v23 = vmax.f32 %v2799_v13, 0.0  ;;  %v2802_v42 = vadd.f32 %v10211_v3, %v2801_v12  ;;  %v2803_v40 = vpop.f32.mrb[11].mxu0  ;;  %v7429_v13 = vpack.c.bf16 %v4645_v60, %v4644_v39 }
 0x20f   :  { %2866 = vst.msk [vmem:[#allocation2 + $0x20] sm:$0xff] %vm2861_vm2, %v2849_v23  ;;  %v2885_v53 = vsel %vm2861_vm2, %v2849_v23, 0.0  ;;  %v2850_v51 = vmax.f32 %v2802_v42, 0.0  ;;  %7430 = vmatpush3.bf16.msra.mxu1 %v7429_v13 }
 0x210   :  { %v2886_v61 = vadd.f32 %v2885_v53, %v2884_v30  ;;  %v7432_v53 = vpack.c.bf16 %v4647_v9, %v4646_v38  ;;  %7431 = vmatprep.subr.bf16.mxu1 %v7539_v16 }
 0x211   :  { %2867 = vst.msk [vmem:[#allocation2 + $0x28] sm:$0xff] %vm2861_vm2, %v2850_v51  ;;  %v2887_v46 = vsel %vm2861_vm2, %v2850_v51, 0.0 }
 0x212   :  { %v2888_v2 = vadd.f32 %v2887_v46, %v2886_v61 }
 0x213   :  { %7433 = vmatpush3.bf16.msra.mxu1 %v7432_v53 }
 0x22a   :  { %v4433_v49 = vpop.f32.mrb[8].mxu1 }
 0x22b   :  { %v4434_v17 = vadd.f32 %v10226_v50, %v4433_v49  ;;  %v4435_v44 = vpop.f32.mrb[9].mxu1 }
 0x22c   :  { %v4436_v62 = vpop.f32.mrb[10].mxu1 }
 0x22d   :  { %v4484_v31 = vmax.f32 %v4434_v17, 0.0  ;;  %v4437_v59 = vadd.f32 %v10226_v50, %v4436_v62  ;;  %v4438_v43 = vpop.f32.mrb[11].mxu1 }
 0x22f   :  { %4501 = vst.msk [vmem:[#allocation2 + $0xa0] sm:$0xff] %vm2861_vm2, %v4484_v31  ;;  %v4520_v36 = vsel %vm2861_vm2, %v4484_v31, 0.0  ;;  %v4485_v63 = vmax.f32 %v4437_v59, 0.0 }
 0x230   :  { %v4521_v0 = vadd.f32 %v4520_v36, %v4519_v21 }
 0x231   :  { %4502 = vst.msk [vmem:[#allocation2 + $0xa8] sm:$0xff] %vm2861_vm2, %v4485_v63  ;;  %v4522_v8 = vsel %vm2861_vm2, %v4485_v63, 0.0 }
 0x232   :  { %v4523_v26 = vadd.f32 %v4522_v8, %v4521_v0 }
 0x237   :  { %v2806_v19 = vpop.f32.mrb[12].mxu0 }
 0x238   :  { %v2807_v1 = vadd.f32 %v10211_v3, %v2806_v19  ;;  %v2808_v56 = vpop.f32.mrb[13].mxu0 }
 0x239   :  { %v2809_v4 = vpop.f32.mrb[14].mxu0 }
 0x23a   :  { %v2851_v15 = vmax.f32 %v2807_v1, 0.0  ;;  %v2810_v29 = vadd.f32 %v10211_v3, %v2809_v4  ;;  %v2811_v27 = vpop.f32.mrb[15].mxu0 }
 0x23c   :  { %2868 = vst.msk [vmem:[#allocation2 + $0x30] sm:$0xff] %vm2861_vm2, %v2851_v15  ;;  %v2889_v11 = vsel %vm2861_vm2, %v2851_v15, 0.0  ;;  %v2852_v5 = vmax.f32 %v2810_v29, 0.0 }
 0x23d   :  { %v2890_v10 = vadd.f32 %v2889_v11, %v2888_v2 }
 0x23e   :  { %2869 = vst.msk [vmem:[#allocation2 + $0x38] sm:$0xff] %vm2861_vm2, %v2852_v5  ;;  %v2891_v34 = vsel %vm2861_vm2, %v2852_v5, 0.0 }
 0x23f   :  { %v2892_v7 = vadd.f32 %v2891_v34, %v2890_v10 }
 0x241   :  { %v2893_v20 = vrot.slane %v2892_v7, 4 }
 0x243   :  { %v2894_v30 = vadd.f32 %v2893_v20, %v2892_v7 }
 0x245   :  { %v2895_v55 = vrot.slane %v2894_v30, 2 }
 0x247   :  { %v2896_v54 = vadd.f32 %v2895_v55, %v2894_v30 }
 0x249   :  { %v2897_v46 = vrot.slane %v2896_v54, 1 }
 0x24a   :  { %v4441_v24 = vpop.f32.mrb[12].mxu1 }
 0x24b   :  { %v4442_v47 = vadd.f32 %v10226_v50, %v4441_v24  ;;  %v4443_v25 = vpop.f32.mrb[13].mxu1  ;;  %v2898_v31 = vadd.f32 %v2897_v46, %v2896_v54 }
 0x24c   :  { %v4444_v45 = vpop.f32.mrb[14].mxu1 }
 0x24d   :  { %v4486_v41 = vmax.f32 %v4442_v47, 0.0  ;;  %v4445_v52 = vadd.f32 %v10226_v50, %v4444_v45  ;;  %v4446_v6 = vpop.f32.mrb[15].mxu1 }
 0x24f   :  { %4503 = vst.msk [vmem:[#allocation2 + $0xb0] sm:$0xff] %vm2861_vm2, %v4486_v41  ;;  %v4524_v48 = vsel %vm2861_vm2, %v4486_v41, 0.0  ;;  %v4487_v35 = vmax.f32 %v4445_v52, 0.0 }
 0x250   :  { %v4525_v28 = vadd.f32 %v4524_v48, %v4523_v26 }
 0x251   :  { %4504 = vst.msk [vmem:[#allocation2 + $0xb8] sm:$0xff] %vm2861_vm2, %v4487_v35  ;;  %v4526_v33 = vsel %vm2861_vm2, %v4487_v35, 0.0 }
 0x252   :  { %v4527_v58 = vadd.f32 %v4526_v33, %v4525_v28 }
 0x254   :  { %v2814_v32 = vpop.f32.mrb[16].mxu0  ;;  %v4528_v18 = vrot.slane %v4527_v58, 4 }
 0x255   :  { %v2815_v57 = vadd.f32 %v10211_v3, %v2814_v32  ;;  %v2816_v22 = vpop.f32.mrb[17].mxu0 }
 0x256   :  { %v2817_v37 = vpop.f32.mrb[18].mxu0  ;;  %v4529_v21 = vadd.f32 %v4528_v18, %v4527_v58 }
 0x257   :  { %v2853_v12 = vmax.f32 %v2815_v57, 0.0  ;;  %v2818_v23 = vadd.f32 %v10211_v3, %v2817_v37  ;;  %v2819_v42 = vpop.f32.mrb[19].mxu0 }
 0x258   :  { %v4530_v40 = vrot.slane %v4529_v21, 2 }
 0x259   :  { %2870 = vst.msk [vmem:[#allocation2 + $0x40] sm:$0xff] %vm2861_vm2, %v2853_v12  ;;  %v2899_v51 = vsel %vm2861_vm2, %v2853_v12, 0.0  ;;  %v2854_v61 = vmax.f32 %v2818_v23, 0.0 }
 0x25a   :  { %v4531_v2 = vadd.f32 %v4530_v40, %v4529_v21 }
 0x25b   :  { %2871 = vst.msk [vmem:[#allocation2 + $0x48] sm:$0xff] %vm2861_vm2, %v2854_v61  ;;  %v2900_v49 = vsel %vm2861_vm2, %v2854_v61, 0.0 }
 0x25c   :  { %v2901_v17 = vadd.f32 %v2900_v49, %v2899_v51  ;;  %v4532_v44 = vrot.slane %v4531_v2, 1 }
 0x25e   :  { %v4533_v59 = vadd.f32 %v4532_v44, %v4531_v2 }
 0x25f   :  { %v4449_v62 = vpop.f32.mrb[16].mxu1 }
 0x260   :  { %v4450_v43 = vadd.f32 %v10226_v50, %v4449_v62  ;;  %v4451_v36 = vpop.f32.mrb[17].mxu1  ;;  %v10314_v0 = vadd.f32 %v4533_v59, %v2898_v31 }
 0x261   :  { %v4452_v63 = vpop.f32.mrb[18].mxu1 }
 0x262   :  { %v4488_v8 = vmax.f32 %v4450_v43, 0.0  ;;  %v4453_v26 = vadd.f32 %v10226_v50, %v4452_v63  ;;  %v4454_v19 = vpop.f32.mrb[19].mxu1 }
 0x264   :  { %v2822_v1 = vpop.f32.mrb[20].mxu0  ;;  %4505 = vst.msk [vmem:[#allocation2 + $0xc0] sm:$0xff] %vm2861_vm2, %v4488_v8  ;;  %v4489_v56 = vmax.f32 %v4453_v26, 0.0  ;;  %v4534_v27 = vsel %vm2861_vm2, %v4488_v8, 0.0 }
 0x265   :  { %v2823_v4 = vadd.f32 %v10211_v3, %v2822_v1  ;;  %v2824_v15 = vpop.f32.mrb[21].mxu0 }
 0x266   :  { %v2825_v29 = vpop.f32.mrb[22].mxu0  ;;  %4506 = vst.msk [vmem:[#allocation2 + $0xc8] sm:$0xff] %vm2861_vm2, %v4489_v56  ;;  %v4535_v11 = vsel %vm2861_vm2, %v4489_v56, 0.0 }
 0x267   :  { %v2855_v5 = vmax.f32 %v2823_v4, 0.0  ;;  %v2826_v10 = vadd.f32 %v10211_v3, %v2825_v29  ;;  %v2827_v34 = vpop.f32.mrb[23].mxu0  ;;  %v4536_v7 = vadd.f32 %v4535_v11, %v4534_v27 }
 0x269   :  { %2872 = vst.msk [vmem:[#allocation2 + $0x50] sm:$0xff] %vm2861_vm2, %v2855_v5  ;;  %v2902_v20 = vsel %vm2861_vm2, %v2855_v5, 0.0  ;;  %v2856_v24 = vmax.f32 %v2826_v10, 0.0 }
 0x26a   :  { %v2903_v47 = vadd.f32 %v2902_v20, %v2901_v17 }
 0x26b   :  { %2873 = vst.msk [vmem:[#allocation2 + $0x58] sm:$0xff] %vm2861_vm2, %v2856_v24  ;;  %v2904_v25 = vsel %vm2861_vm2, %v2856_v24, 0.0 }
 0x26c   :  { %v2905_v45 = vadd.f32 %v2904_v25, %v2903_v47 }
 0x26e   :  { %v2830_v41 = vpop.f32.mrb[24].mxu0 }
 0x26f   :  { %v2831_v52 = vadd.f32 %v10211_v3, %v2830_v41  ;;  %v2832_v6 = vpop.f32.mrb[25].mxu0 }
 0x270   :  { %v2833_v30 = vpop.f32.mrb[26].mxu0 }
 0x271   :  { %v2857_v48 = vmax.f32 %v2831_v52, 0.0  ;;  %v2834_v35 = vadd.f32 %v10211_v3, %v2833_v30  ;;  %v2835_v28 = vpop.f32.mrb[27].mxu0 }
 0x273   :  { %2874 = vst.msk [vmem:[#allocation2 + $0x60] sm:$0xff] %vm2861_vm2, %v2857_v48  ;;  %v2906_v33 = vsel %vm2861_vm2, %v2857_v48, 0.0  ;;  %v2858_v55 = vmax.f32 %v2834_v35, 0.0 }
 0x274   :  { %v2907_v58 = vadd.f32 %v2906_v33, %v2905_v45 }
 0x275   :  { %2875 = vst.msk [vmem:[#allocation2 + $0x68] sm:$0xff] %vm2861_vm2, %v2858_v55  ;;  %v2908_v32 = vsel %vm2861_vm2, %v2858_v55, 0.0 }
 0x276   :  { %v2909_v18 = vadd.f32 %v2908_v32, %v2907_v58 }
 0x292   :  { %v4457_v57 = vpop.f32.mrb[20].mxu1 }
 0x293   :  { %v4458_v22 = vadd.f32 %v10226_v50, %v4457_v57  ;;  %v4459_v39 = vpop.f32.mrb[21].mxu1 }
 0x294   :  { %v4460_v60 = vpop.f32.mrb[22].mxu1  ;;  %v7402_v39 = vld [vmem:[%s11350_s4] ss:$0 sm:$0xff]  ;;  %s7545_s4 = smov 24  }
 0x295   :  { %v4490_v38 = vmax.f32 %v4458_v22, 0.0  ;;  %v4461_v54 = vadd.f32 %v10226_v50, %v4460_v60  ;;  %v4462_v37 = vpop.f32.mrb[23].mxu1 }
 0x297   :  { %4507 = vst.msk [vmem:[#allocation2 + $0xd0] sm:$0xff] %vm2861_vm2, %v4490_v38  ;;  %v4537_v21 = vsel %vm2861_vm2, %v4490_v38, 0.0  ;;  %v4491_v16 = vmax.f32 %v4461_v54, 0.0 }
 0x298   :  { %v2838_v13 = vpop.f32.mrb[28].mxu0  ;;  %v4538_v9 = vadd.f32 %v4537_v21, %v4536_v7 }
 0x299   :  { %v2839_v12 = vadd.f32 %v10211_v3, %v2838_v13  ;;  %v2840_v23 = vpop.f32.mrb[29].mxu0  ;;  %4508 = vst.msk [vmem:[#allocation2 + $0xd8] sm:$0xff] %vm2861_vm2, %v4491_v16  ;;  %v4539_v42 = vsel %vm2861_vm2, %v4491_v16, 0.0 }
 0x29a   :  { %v2841_v40 = vpop.f32.mrb[30].mxu0  ;;  %v4540_v53 = vadd.f32 %v4539_v42, %v4538_v9 }
 0x29b   :  { %v2859_v51 = vmax.f32 %v2839_v12, 0.0  ;;  %v2842_v61 = vadd.f32 %v10211_v3, %v2841_v40  ;;  %v2843_v46 = vpop.f32.mrb[31].mxu0 }
 0x29d   :  { %2876 = vst.msk [vmem:[#allocation2 + $0x70] sm:$0xff] %vm2861_vm2, %v2859_v51  ;;  %v2910_v2 = vsel %vm2861_vm2, %v2859_v51, 0.0  ;;  %v2860_v49 = vmax.f32 %v2842_v61, 0.0 }
 0x29e   :  { %v2911_v17 = vadd.f32 %v2910_v2, %v2909_v18  ;;  %v4557_v18 = vmul.f32 0.015625, %v10314_v0  ;;  %v7542_v2 = vmov 1966171168  }
 0x29f   :  { %2877 = vst.msk [vmem:[#allocation2 + $0x78] sm:$0xff] %vm2861_vm2, %v2860_v49  ;;  %v2912_v44 = vsel %vm2861_vm2, %v2860_v49, 0.0  ;;  %v4762_v49 = vunpack.c.l.s4 %v7542_v2 }
 0x2a0   :  { %v2913_v62 = vadd.f32 %v2912_v44, %v2911_v17  ;;  %v4764_v17 = vlaneseq }
 0x2a1   :  { %v4763_v44 = vunpack.c.0.s8 %v4762_v49 }
 0x2a2   :  { %v2914_v15 = vrot.slane %v2913_v62, 4 }
 0x2a4   :  { %v2915_v20 = vadd.f32 %v2914_v15, %v2913_v62  ;;  %v4765_v62 = vshrl.u32 %v4764_v17, 7 }
 0x2a6   :  { %v2916_v41 = vrot.slane %v2915_v20, 2 }
 0x2a8   :  { %v2917_v30 = vadd.f32 %v2916_v41, %v2915_v20 }
 0x2aa   :  { %v2918_v28 = vrot.slane %v2917_v30, 1 }
 0x2ac   :  { %v4465_v31 = vpop.f32.mrb[24].mxu1  ;;  %v2919_v55 = vadd.f32 %v2918_v28, %v2917_v30 }
 0x2ad   :  { %v4466_v59 = vadd.f32 %v10226_v50, %v4465_v31  ;;  %v4467_v43 = vpop.f32.mrb[25].mxu1  ;;  %v10369_v31 = vsub.s32 %v4763_v44, %v4765_v62 }
 0x2ae   :  { %v4468_v36 = vpop.f32.mrb[26].mxu1  ;;  %v7543_v43 = vmov 1983009808  }
 0x2af   :  { %v4492_v63 = vmax.f32 %v4466_v59, 0.0  ;;  %v4469_v3 = vadd.f32 %v10226_v50, %v4468_v36  ;;  %v4470_v8 = vpop.f32.mrb[27].mxu1  ;;  %v4811_v36 = vunpack.c.l.s4 %v7543_v43 }
 0x2b1   :  { %4509 = vst.msk [vmem:[#allocation2 + $0xe0] sm:$0xff] %vm2861_vm2, %v4492_v63  ;;  %v4541_v26 = vsel %vm2861_vm2, %v4492_v63, 0.0  ;;  %v4493_v19 = vmax.f32 %v4469_v3, 0.0  ;;  %v10372_v3 = vsub.s32 0, %v4765_v62 }
 0x2b2   :  { %v4542_v1 = vadd.f32 %v4541_v26, %v4540_v53  ;;  %v7544_v26 = vmov 1934713408  }
 0x2b3   :  { %4510 = vst.msk [vmem:[#allocation2 + $0xe8] sm:$0xff] %vm2861_vm2, %v4493_v19  ;;  %v4543_v56 = vsel %vm2861_vm2, %v4493_v19, 0.0  ;;  %v4842_v19 = vunpack.c.l.s4 %v7544_v26 }
 0x2b4   :  { %v4544_v4 = vadd.f32 %v4543_v56, %v4542_v1  ;;  %v4812_v1 = vunpack.c.0.s8 %v4811_v36 }
 0x2bb   :  { %v4473_v29 = vpop.f32.mrb[28].mxu1 }
 0x2bc   :  { %v4474_v27 = vadd.f32 %v10226_v50, %v4473_v29  ;;  %v4475_v11 = vpop.f32.mrb[29].mxu1 }
 0x2bd   :  { %v4476_v5 = vpop.f32.mrb[30].mxu1  ;;  %v4748_v11 = vld [vmem:[#allocation2 + $0x20] sm:$0xff] }
 0x2be   :  { %v4494_v10 = vmax.f32 %v4474_v27, 0.0  ;;  %v4477_v34 = vadd.f32 %v10226_v50, %v4476_v5  ;;  %v4478_v7 = vpop.f32.mrb[31].mxu1  ;;  %v4843_v27 = vunpack.c.0.s8 %v4842_v19  ;;  %v4744_v5 = vld [vmem:[#allocation2] sm:$0xff] }
 0x2c0   :  { %4511 = vst.msk [vmem:[#allocation2 + $0xf0] sm:$0xff] %vm2861_vm2, %v4494_v10  ;;  %v4545_v24 = vsel %vm2861_vm2, %v4494_v10, 0.0  ;;  %v4495_v47 = vmax.f32 %v4477_v34, 0.0  ;;  %v10380_v10 = vsub.s32 %v4812_v1, %v4765_v62  ;;  %v10403_v28 = vsub.s32 %v4843_v27, %v4765_v62  ;;  %v4747_v62 = vld [vmem:[#allocation2 + $0x18] sm:$0xff]  ;;  %v4758_v1 = vld [vmem:[#allocation2 + $0x70] sm:$0xff] }
 0x2c1   :  { %v4546_v25 = vadd.f32 %v4545_v24, %v4544_v4  ;;  %v4745_v24 = vld [vmem:[#allocation2 + $0x8] sm:$0xff] }
 0x2c2   :  { %4512 = vst.msk [vmem:[#allocation2 + $0xf8] sm:$0xff] %vm2861_vm2, %v4495_v47  ;;  %v4547_v45 = vsel %vm2861_vm2, %v4495_v47, 0.0  ;;  %v4756_v47 = vld [vmem:[#allocation2 + $0x60] sm:$0xff] }
 0x2c3   :  { %v4548_v52 = vadd.f32 %v4547_v45, %v4546_v25  ;;  %v4752_v25 = vld [vmem:[#allocation2 + $0x40] sm:$0xff]  ;;  %v4749_v45 = vld [vmem:[#allocation2 + $0x28] sm:$0xff] }
 0x2c5   :  { %v4549_v6 = vrot.slane %v4548_v52, 4 }
 0x2c7   :  { %v4550_v48 = vadd.f32 %v4549_v6, %v4548_v52  ;;  %v4757_v6 = vld [vmem:[#allocation2 + $0x68] sm:$0xff] }
 0x2c9   :  { %v4551_v35 = vrot.slane %v4550_v48, 2 }
 0x2cb   :  { %v4552_v50 = vadd.f32 %v4551_v35, %v4550_v48  ;;  %v4753_v48 = vld [vmem:[#allocation2 + $0x48] sm:$0xff] }
 0x2cd   :  { %v4553_v33 = vrot.slane %v4552_v50, 1 }
 0x2cf   :  { %v4554_v58 = vadd.f32 %v4553_v33, %v4552_v50 }
 0x2d1   :  { %v4556_v32 = vadd.f32 %v4554_v58, %v2919_v55 }
 0x2d3   :  { %v4558_v57 = vmul.f32 0.015625, %v4556_v32 }
 0x2d5   :  { %v4570_v22 = vsel %vm4569_vm6, %v4558_v57, %v4557_v18 }
 0x2d6   :  { %7415 = vmatmul.mubr.msk.f32.vlgmr.msra.gmra.mrb[32].mxu0 %vm2861_vm2, %v4570_v22 }
 0x3a9   :  { %v4639_v60 = vpop.f32.mrb[32].mxu0 }
 0x3aa   :  { %v4640_v38 = vadd.f32 %v7402_v39, %v4639_v60  ;;  %v7416_v54 = vpop.f32.mrb[33].mxu0 }
 0x3ac   :  { %v4643_v37 = vmax.f32 %v4640_v38, 0.0 }
 0x3ae   :  { %7426 = vmatmul.mubr.msk.f32.vlgmr.msra.gmra.mrb[32].mxu1 %vm4648_vm7, %v4643_v37  ;;  %v4754_v37 = vld [vmem:[#allocation2 + $0x50] sm:$0xff] }
 0x481   :  { %v4718_v21 = vpop.f32.mrb[32].mxu1 }
 0x482   :  { %4723 = vrot.lane.b32.xlu0 %v4718_v21, %s7540_s10  ;;  %v7427_v0 = vpop.f32.mrb[33].mxu1 }
 0x4f4   :  { %v4724_v16 = vpop.permute.xlu0 %4723 }
 0x4f5   :  { %v4726_v13 = vmax.f32 %v4718_v21, %v4724_v16 }
 0x4f7   :  { %v4727_v9 = vsub.f32 %v4718_v21, %v4726_v13  ;;  %4731 = vrot.lane.b32.xlu1 %v4726_v13, %s7541_s1 }
 0x4f9   :  { %v4728_v53 = vmul.f32 1.442695, %v4727_v9 }
 0x569   :  { %v4732_v12 = vpop.permute.xlu1 %4731 }
 0x56a   :  { %v4734_v23 = vsub.f32 %v4718_v21, %v4732_v12  ;;  %v4746_v12 = vld [vmem:[#allocation2 + $0x10] sm:$0xff] }
 0x56c   :  { %v4735_v42 = vmul.f32 1.442695, %v4734_v23 }
 0x56e   :  { %7499 = vpow2.f32 %v4735_v42  ;;  %v4755_v42 = vld [vmem:[#allocation2 + $0x58] sm:$0xff] }
 0x56f   :  { %7501 = vpow2.f32 %v4728_v53 }
 0x578   :  { %v10365_v40 = vpop.eup %7499 }
 0x579   :  { %4738 = vrot.lane.b32.xlu0 %v10365_v40, %s7540_s10  ;;  %v7502_v51 = vpop.eup %7501 }
 0x5eb   :  { %v4739_v61 = vpop.permute.xlu0 %4738 }
 0x5ec   :  { %v4741_v46 = vadd.f32 %v7502_v51, %v4739_v61 }
 0x5ee   :  { %7503 = vrcp.f32 %v4741_v46 }
 0x5f8   :  { %v7504_v59 = vpop.eup %7503 }
 0x5f9   :  { %v4743_v63 = vmul.f32 %v7504_v59, %v7502_v51  ;;  %5673 = vrot.lane.b32.xlu0 %v7504_v59, %s7541_s1 }
 0x5fb   :  { %v4767_v8 = vrot.slane %v4743_v63, %v10369_v31 }
 0x5fd   :  { %v4768_v56 = vcombine.high %v4767_v8, %v4767_v8  ;;  %v4775_v4 = vrot.slane %v4767_v8, %v10369_v31 }
 0x5ff   :  { %v4782_v15 = vrot.slane %v4768_v56, %v10369_v31  ;;  %v10378_v29 = vrot.slane %v4775_v4, %v10372_v3 }
 0x601   :  { %v10383_v34 = vrot.slane %v4782_v15, %v10372_v3  ;;  %v10386_v7 = vmul.f32 %v10378_v29, %v4748_v11  ;;  %v10389_v20 = vmul.f32 %v10378_v29, %v4744_v5  ;;  %v10398_v30 = vmul.f32 %v10378_v29, %v4749_v45  ;;  %v4750_v11 = vld [vmem:[#allocation2 + $0x30] sm:$0xff] }
 0x602   :  { %v10401_v35 = vmul.f32 %v10378_v29, %v4745_v24  ;;  %v10441_v23 = vmul.f32 %v10378_v29, %v4746_v12  ;;  %v10461_v59 = vmul.f32 %v10378_v29, %v4747_v62  ;;  %v10486_v5 = vmul.f32 %v10378_v29, %v4750_v11 }
 0x603   :  { %v10392_v41 = vmul.f32 %v10383_v34, %v4756_v47  ;;  %v10395_v52 = vmul.f32 %v10383_v34, %v4752_v25  ;;  %v10406_v50 = vmul.f32 %v10383_v34, %v4757_v6  ;;  %v10409_v33 = vmul.f32 %v10383_v34, %v4753_v48  ;;  %v4759_v47 = vld [vmem:[#allocation2 + $0x78] sm:$0xff] }
 0x604   :  { %v10413_v55 = vrot.slane %v10386_v7, %v10380_v10  ;;  %v4816_v32 = vrot.slane %v10389_v20, %v10380_v10  ;;  %v5146_v38 = vrot.slane %v10398_v30, %v10380_v10  ;;  %v4882_v54 = vrot.slane %v10401_v35, %v10380_v10 }
 0x605   :  { %v10417_v58 = vrot.slane %v10392_v41, %v10380_v10  ;;  %v4831_v18 = vrot.slane %v10395_v52, %v10380_v10  ;;  %v5161_v57 = vrot.slane %v10406_v50, %v10380_v10  ;;  %v4897_v22 = vrot.slane %v10409_v33, %v10380_v10 }
 0x606   :  { %v10434_v21 = vmul.f32 %v10383_v34, %v4754_v37  ;;  %v10449_v61 = vmul.f32 %v10383_v34, %v4755_v42  ;;  %v4948_v44 = vrot.slane %v10441_v23, %v10380_v10  ;;  %v5014_v19 = vrot.slane %v10461_v59, %v10380_v10 }
 0x607   :  { %v5104_v39 = vcombine.high %v10413_v55, %v10417_v58  ;;  %v4840_v60 = vcombine.high %v4816_v32, %v4831_v18  ;;  %v5169_v13 = vcombine.low %v5146_v38, %v5161_v57  ;;  %v4905_v9 = vcombine.low %v4882_v54, %v4897_v22 }
 0x608   :  { %v4963_v53 = vrot.slane %v10434_v21, %v10380_v10  ;;  %v4839_v51 = vcombine.low %v4816_v32, %v4831_v18  ;;  %v5170_v49 = vcombine.high %v5146_v38, %v5161_v57  ;;  %v4906_v17 = vcombine.high %v4882_v54, %v4897_v22  ;;  %v4751_v32 = vld [vmem:[#allocation2 + $0x38] sm:$0xff] }
 0x609   :  { %v10437_v0 = vrot.slane %v5104_v39, %v10403_v28  ;;  %v4854_v16 = vrot.slane %v4840_v60, %v10403_v28  ;;  %v10452_v46 = vrot.slane %v5169_v13, %v10403_v28  ;;  %v4913_v2 = vrot.slane %v4905_v9, %v10403_v28 }
 0x60a   :  { %v4972_v43 = vcombine.high %v4948_v44, %v4963_v53  ;;  %v10464_v36 = vrot.slane %v5170_v49, %v10403_v28  ;;  %v4920_v63 = vrot.slane %v4906_v17, %v10403_v28  ;;  %v10468_v8 = vrot.slane %v4839_v51, %v10403_v28 }
 0x60b   :  { %5462 = vrot.lane.b32.xlu1 %v10437_v0, %s7530_s12  ;;  %5342 = vrot.lane.b32.xlu0 %v4854_v16, %s7530_s12  ;;  %v5029_v26 = vrot.slane %v10449_v61, %v10380_v10  ;;  %v10481_v27 = vmul.f32 %v10383_v34, %v4758_v1  ;;  %v4872_v24 = vcombine.high %v4854_v16, %v7537_v14 }
 0x60c   :  { %v4986_v56 = vrot.slane %v4972_v43, %v10403_v28  ;;  %v4871_v4 = vcombine.high %v10468_v8, %v7537_v14  ;;  %v10495_v48 = vmul.f32 %v10383_v34, %v4759_v47  ;;  %v10501_v18 = vrot.slane %v10486_v5, %v10380_v10 }
 0x60d   :  { %v5037_v15 = vcombine.low %v5014_v19, %v5029_v26  ;;  %v5038_v45 = vcombine.high %v5014_v19, %v5029_v26  ;;  %v10492_v6 = vrot.slane %v10481_v27, %v10380_v10  ;;  %v10504_v57 = vmul.f32 %v10378_v29, %v4751_v32 }
 0x60e   :  { %v4937_v22 = vcombine.high %v4913_v2, %v7537_v14  ;;  %v5293_v60 = vrot.slane %v10495_v48, %v10380_v10  ;;  %v4971_v38 = vcombine.low %v4948_v44, %v4963_v53  ;;  %v5103_v54 = vcombine.low %v10413_v55, %v10417_v58 }
 0x60f   :  { %5486 = vrot.lane.b32.xlu1 %v10452_v46, %s7529_s23  ;;  %5366 = vrot.lane.b32.xlu0 %v4913_v2, %s7529_s23  ;;  %v5045_v25 = vrot.slane %v5037_v15, %v10403_v28  ;;  %v5052_v39 = vrot.slane %v5038_v45, %v10403_v28  ;;  %v5236_v34 = vcombine.high %v10501_v18, %v10492_v6 }
 0x610   :  { %v5278_v29 = vrot.slane %v10504_v57, %v10380_v10  ;;  %v4938_v37 = vcombine.high %v4920_v63, %v7537_v14  ;;  %v10523_v9 = vrot.slane %v4971_v38, %v10403_v28  ;;  %v4824_v12 = vcombine.high %v10395_v52, %v7537_v14 }
 0x611   :  { %v10520_v16 = vrot.slane %v5236_v34, %v10403_v28  ;;  %v4809_v42 = vcombine.high %v10389_v20, %v7537_v14  ;;  %v5004_v17 = vcombine.high %v4986_v56, %v7537_v14  ;;  %v5088_v62 = vcombine.high %v10392_v41, %v7537_v14 }
 0x612   :  { %v5301_v13 = vcombine.low %v5278_v29, %v5293_v60  ;;  %v5003_v51 = vcombine.high %v10523_v9, %v7537_v14  ;;  %v5302_v2 = vcombine.high %v5278_v29, %v5293_v60  ;;  %v4838_v49 = vrot.slane %v4824_v12, %v10380_v10 }
 0x613   :  { %5494 = vrot.lane.b32.xlu1 %v10464_v36, %s7534_s30  ;;  %5374 = vrot.lane.b32.xlu0 %v4920_v63, %s7534_s30  ;;  %v4823_v52 = vrot.slane %v4809_v42, %v10380_v10  ;;  %v4890_v43 = vcombine.high %v10409_v33, %v7537_v14  ;;  %v5073_v63 = vcombine.high %v10386_v7, %v7537_v14 }
 0x614   :  { %v10533_v53 = vrot.slane %v5301_v13, %v10403_v28  ;;  %v10544_v20 = vrot.slane %v5302_v2, %v10403_v28  ;;  %v4875_v26 = vcombine.high %v10401_v35, %v7537_v14  ;;  %v5069_v19 = vcombine.high %v5045_v25, %v7537_v14 }
 0x615   :  { %v4855_v44 = vcombine.low %v4823_v52, %v4838_v49  ;;  %v4856_v41 = vcombine.high %v4823_v52, %v4838_v49  ;;  %v4904_v33 = vrot.slane %v4890_v43, %v10380_v10  ;;  %v5087_v7 = vrot.slane %v5073_v63, %v10380_v10 }
 0x616   :  { %v5070_v35 = vcombine.high %v5052_v39, %v7537_v14  ;;  %v5154_v15 = vcombine.high %v10406_v50, %v7537_v14  ;;  %v5139_v45 = vcombine.high %v10398_v30, %v7537_v14  ;;  %v4941_v32 = vcombine.high %v10441_v23, %v7537_v14 }
 0x617   :  { %5402 = vrot.lane.b32.xlu0 %v4986_v56, %s7530_s12  ;;  %5338 = vrot.lane.b32.xlu1 %v4871_v4, %s7541_s1  ;;  %v10559_v1 = vrot.slane %v4855_v44, %v10403_v28  ;;  %v5102_v56 = vrot.slane %v5088_v62, %v10380_v10  ;;  %v4889_v4 = vrot.slane %v4875_v26, %v10380_v10 }
 0x618   :  { %v10572_v11 = vrot.slane %v4856_v41, %v10403_v28  ;;  %v5153_v60 = vrot.slane %v5139_v45, %v10380_v10  ;;  %v4955_v23 = vrot.slane %v4941_v32, %v10380_v10  ;;  %v5022_v12 = vcombine.high %v10449_v61, %v7537_v14 }
 0x619   :  { %v4921_v47 = vcombine.low %v4889_v4, %v4904_v33  ;;  %v5120_v50 = vcombine.high %v5087_v7, %v5102_v56  ;;  %v5007_v42 = vcombine.high %v10461_v59, %v7537_v14  ;;  %v5136_v55 = vcombine.high %v10437_v0, %v7537_v14 }
 0x61a   :  { %v5036_v61 = vrot.slane %v5022_v12, %v10380_v10  ;;  %v5220_v58 = vcombine.high %v10481_v27, %v7537_v14  ;;  %v5202_v27 = vcombine.high %v10464_v36, %v7537_v14 }
 0x61b   :  { %5426 = vrot.lane.b32.xlu0 %v5045_v25, %s7529_s23  ;;  %5346 = vrot.lane.b32.xlu1 %v4872_v24, %s7545_s4  ;;  %v5119_v24 = vcombine.low %v5087_v7, %v5102_v56  ;;  %v4956_v25 = vcombine.high %v10434_v21, %v7537_v14  ;;  %v10588_v34 = vrot.slane %v4921_v47, %v10403_v28 }
 0x61c   :  { %v4922_v21 = vcombine.high %v4889_v4, %v4904_v33  ;;  %v10598_v29 = vrot.slane %v5120_v50, %v10403_v28  ;;  %v5021_v44 = vrot.slane %v5007_v42, %v10380_v10  ;;  %v10644_v56 = vrot.slane %v5103_v54, %v10403_v28 }
 0x61d   :  { %v4970_v30 = vrot.slane %v4956_v25, %v10380_v10  ;;  %v5333_v33 = vcombine.high %v10533_v53, %v7537_v14  ;;  %v5205_v54 = vcombine.high %v10486_v5, %v7537_v14  ;;  %v4873_v4 = vcombine.high %v10559_v1, %v7537_v14 }
 0x61e   :  { %v5053_v63 = vcombine.low %v5021_v44, %v5036_v61  ;;  %v5054_v26 = vcombine.high %v5021_v44, %v5036_v61  ;;  %v5135_v7 = vcombine.high %v10644_v56, %v7537_v14  ;;  %v4874_v5 = vcombine.high %v10572_v11, %v7537_v14 }
 0x61f   :  { %5434 = vrot.lane.b32.xlu0 %v5052_v39, %s7534_s30  ;;  %5370 = vrot.lane.b32.xlu1 %v4937_v22, %s7546_s11  ;;  %v5168_v22 = vrot.slane %v5154_v15, %v10380_v10  ;;  %v10585_v39 = vrot.slane %v5119_v24, %v10403_v28  ;;  %v4987_v13 = vcombine.low %v4955_v23, %v4970_v30 }
 0x620   :  { %v4988_v52 = vcombine.high %v4955_v23, %v4970_v30  ;;  %v5068_v41 = vrot.slane %v5054_v26, %v10403_v28  ;;  %v5219_v0 = vrot.slane %v5205_v54, %v10380_v10  ;;  %v4939_v36 = vcombine.high %v10588_v34, %v7537_v14 }
 0x621   :  { %v5185_v38 = vcombine.low %v5153_v60, %v5168_v22  ;;  %v5186_v2 = vcombine.high %v5153_v60, %v5168_v22  ;;  %v4995_v49 = vrot.slane %v4987_v13, %v10403_v28 }
 0x622   :  { %v5002_v62 = vrot.slane %v4988_v52, %v10403_v28 }
 0x623   :  { %5522 = vrot.lane.b32.xlu0 %v10520_v16, %s7530_s12  ;;  %5378 = vrot.lane.b32.xlu1 %v4938_v37, %s7547_s13  ;;  %v10601_v37 = vrot.slane %v4922_v21, %v10403_v28  ;;  %v10623_v59 = vrot.slane %v5186_v2, %v10403_v28  ;;  %v5005_v32 = vcombine.high %v4995_v49, %v7537_v14 }
 0x624   :  { %v5137_v21 = vcombine.high %v10585_v39, %v7537_v14 }
 0x627   :  { %5546 = vrot.lane.b32.xlu0 %v10533_v53, %s7529_s23  ;;  %5398 = vrot.lane.b32.xlu1 %v5003_v51, %s7541_s1  ;;  %v10612_v51 = vrot.slane %v5185_v38, %v10403_v28  ;;  %v5201_v53 = vcombine.high %v10452_v46, %v7537_v14  ;;  %v5286_v46 = vcombine.high %v10495_v48, %v7537_v14 }
 0x628   :  { %v5138_v38 = vcombine.high %v10598_v29, %v7537_v14 }
 0x629   :  { %v5203_v13 = vcombine.high %v10612_v51, %v7537_v14 }
 0x62b   :  { %5554 = vrot.lane.b32.xlu0 %v10544_v20, %s7534_s30  ;;  %5406 = vrot.lane.b32.xlu1 %v5004_v17, %s7545_s4  ;;  %v5235_v17 = vcombine.low %v10501_v18, %v10492_v6  ;;  %v5061_v18 = vrot.slane %v5053_v63, %v10403_v28 }
 0x62d   :  { %v10627_v43 = vrot.slane %v5235_v17, %v10403_v28  ;;  %v5071_v30 = vcombine.high %v5061_v18, %v7537_v14 }
 0x62f   :  { %5430 = vrot.lane.b32.xlu1 %v5069_v19, %s7546_s11  ;;  %5350 = vrot.lane.b32.xlu0 %v10559_v1, %s7532_s9  ;;  %v5267_v6 = vcombine.high %v10627_v43, %v7537_v14  ;;  %v5268_v19 = vcombine.high %v10520_v16, %v7537_v14  ;;  %v5334_v16 = vcombine.high %v10544_v20, %v7537_v14 }
 0x630   :  { %v5234_v20 = vrot.slane %v5220_v58, %v10380_v10  ;;  %v5271_v1 = vcombine.high %v10504_v57, %v7537_v14  ;;  %v4940_v57 = vcombine.high %v10601_v37, %v7537_v14 }
 0x632   :  { %v5252_v24 = vcombine.high %v5219_v0, %v5234_v20  ;;  %v5285_v48 = vrot.slane %v5271_v1, %v10380_v10 }
 0x633   :  { %5438 = vrot.lane.b32.xlu1 %v5070_v35, %s7547_s13  ;;  %5358 = vrot.lane.b32.xlu0 %v10572_v11, %s7533_s22  ;;  %v5251_v35 = vcombine.low %v5219_v0, %v5234_v20  ;;  %v5300_v11 = vrot.slane %v5286_v46, %v10380_v10 }
 0x634   :  { %v5266_v47 = vrot.slane %v5252_v24, %v10403_v28 }
 0x635   :  { %v5259_v15 = vrot.slane %v5251_v35, %v10403_v28  ;;  %v5317_v25 = vcombine.low %v5285_v48, %v5300_v11  ;;  %v5318_v50 = vcombine.high %v5285_v48, %v5300_v11 }
 0x636   :  { %v5270_v42 = vcombine.high %v5266_v47, %v7537_v14 }
 0x637   :  { %5470 = vrot.lane.b32.xlu1 %v10585_v39, %s7532_s9  ;;  %5382 = vrot.lane.b32.xlu0 %v10588_v34, %s7535_s26  ;;  %v5325_v45 = vrot.slane %v5317_v25, %v10403_v28  ;;  %v5332_v22 = vrot.slane %v5318_v50, %v10403_v28  ;;  %v5006_v34 = vcombine.high %v5002_v62, %v7537_v14 }
 0x638   :  { %v5269_v12 = vcombine.high %v5259_v15, %v7537_v14 }
 0x639   :  { %v5335_v17 = vcombine.high %v5325_v45, %v7537_v14 }
 0x63b   :  { %5478 = vrot.lane.b32.xlu1 %v10598_v29, %s7533_s22  ;;  %5390 = vrot.lane.b32.xlu0 %v10601_v37, %s7531_s21  ;;  %v5072_v37 = vcombine.high %v5068_v41, %v7537_v14  ;;  %v5204_v29 = vcombine.high %v10623_v59, %v7537_v14 }
 0x63f   :  { %5502 = vrot.lane.b32.xlu1 %v10612_v51, %s7535_s26  ;;  %5410 = vrot.lane.b32.xlu0 %v4995_v49, %s7532_s9 }
 0x643   :  { %5510 = vrot.lane.b32.xlu1 %v10623_v59, %s7531_s21  ;;  %5418 = vrot.lane.b32.xlu0 %v5002_v62, %s7533_s22  ;;  %v5336_v62 = vcombine.high %v5332_v22, %v7537_v14 }
 0x647   :  { %5518 = vrot.lane.b32.xlu1 %v5267_v6, %s7541_s1  ;;  %5442 = vrot.lane.b32.xlu0 %v5061_v18, %s7535_s26 }
 0x64b   :  { %5526 = vrot.lane.b32.xlu1 %v5268_v19, %s7545_s4  ;;  %5450 = vrot.lane.b32.xlu0 %v5068_v41, %s7531_s21 }
 0x64f   :  { %5550 = vrot.lane.b32.xlu1 %v5333_v33, %s7546_s11  ;;  %5458 = vrot.lane.b32.xlu0 %v5135_v7, %s7541_s1 }
 0x653   :  { %5558 = vrot.lane.b32.xlu1 %v5334_v16, %s7547_s13  ;;  %5466 = vrot.lane.b32.xlu0 %v5136_v55, %s7545_s4 }
 0x657   :  { %5490 = vrot.lane.b32.xlu0 %v5201_v53, %s7546_s11  ;;  %5354 = vrot.lane.b32.xlu1 %v4873_v4, %s7548_s14 }
 0x65b   :  { %5498 = vrot.lane.b32.xlu0 %v5202_v27, %s7547_s13  ;;  %5362 = vrot.lane.b32.xlu1 %v4874_v5, %s7549_s15 }
 0x65f   :  { %5530 = vrot.lane.b32.xlu0 %v5259_v15, %s7532_s9  ;;  %5386 = vrot.lane.b32.xlu1 %v4939_v36, %s7550_s16 }
 0x663   :  { %5538 = vrot.lane.b32.xlu0 %v5266_v47, %s7533_s22  ;;  %5394 = vrot.lane.b32.xlu1 %v4940_v57, %s7540_s10 }
 0x667   :  { %5562 = vrot.lane.b32.xlu0 %v5325_v45, %s7535_s26  ;;  %5414 = vrot.lane.b32.xlu1 %v5005_v32, %s7548_s14 }
 0x66b   :  { %5570 = vrot.lane.b32.xlu0 %v5332_v22, %s7531_s21  ;;  %5422 = vrot.lane.b32.xlu1 %v5006_v34, %s7549_s15  ;;  %v5674_v60 = vpop.permute.xlu0 %5673 }
 0x66c   :  { %v5676_v23 = vmul.f32 %v10365_v40, %v5674_v60 }
 0x66e   :  { %v5700_v39 = vrot.slane %v5676_v23, %v10369_v31 }
 0x66f   :  { %5474 = vrot.lane.b32.xlu0 %v5137_v21, %s7548_s14  ;;  %5446 = vrot.lane.b32.xlu1 %v5071_v30, %s7550_s16 }
 0x670   :  { %v5708_v40 = vrot.slane %v5700_v39, %v10369_v31  ;;  %v5701_v2 = vcombine.high %v5700_v39, %v5700_v39 }
 0x672   :  { %v5719_v52 = vrot.slane %v5708_v40, %v10372_v3  ;;  %v5715_v61 = vrot.slane %v5701_v2, %v10369_v31 }
 0x673   :  { %5482 = vrot.lane.b32.xlu0 %v5138_v38, %s7549_s15  ;;  %5454 = vrot.lane.b32.xlu1 %v5072_v37, %s7540_s10 }
 0x674   :  { %v5723_v18 = vrot.slane %v5715_v61, %v10372_v3 }
 0x677   :  { %5506 = vrot.lane.b32.xlu0 %v5203_v13, %s7550_s16  ;;  %5534 = vrot.lane.b32.xlu1 %v5269_v12, %s7548_s14 }
 0x67b   :  { %5514 = vrot.lane.b32.xlu0 %v5204_v29, %s7540_s10  ;;  %5542 = vrot.lane.b32.xlu1 %v5270_v42, %s7549_s15 }
 0x67d   :  { %v10725_v49 = vpop.permute.xlu1 %5462  ;;  %v5343_v51 = vpop.permute.xlu0 %5342 }
 0x67f   :  { %5724 = vrot.lane.b32.xlu0 %v5719_v52, %s7540_s10  ;;  %5566 = vrot.lane.b32.xlu1 %v5335_v17, %s7550_s16 }
 0x681   :  { %v10732_v44 = vpop.permute.xlu1 %5486  ;;  %v5367_v59 = vpop.permute.xlu0 %5366 }
 0x683   :  { %5574 = vrot.lane.b32.xlu1 %v5336_v62, %s7540_s10 }
 0x685   :  { %v10736_v63 = vpop.permute.xlu1 %5494  ;;  %v5375_v6 = vpop.permute.xlu0 %5374 }
 0x687   :  { %5726 = vrot.lane.b32.xlu1 %v5723_v18, %s7540_s10 }
 0x689   :  { %v10740_v26 = vpop.permute.xlu0 %5402  ;;  %v5339_v19 = vpop.permute.xlu1 %5338 }
 0x68a   :  { %v5577_v21 = vsel %vm2861_vm2, %v10468_v8, %v5339_v19 }
 0x68d   :  { %v10742_v41 = vpop.permute.xlu0 %5426  ;;  %v5347_v31 = vpop.permute.xlu1 %5346 }
 0x691   :  { %v10744_v33 = vpop.permute.xlu0 %5434  ;;  %v5371_v7 = vpop.permute.xlu1 %5370 }
 0x695   :  { %v5523_v16 = vpop.permute.xlu0 %5522  ;;  %v5379_v55 = vpop.permute.xlu1 %5378 }
 0x699   :  { %v10746_v58 = vpop.permute.xlu0 %5546  ;;  %v5399_v54 = vpop.permute.xlu1 %5398 }
 0x69a   :  { %v5604_v18 = vsel %vm2861_vm2, %v10523_v9, %v5399_v54 }
 0x69d   :  { %v10748_v53 = vpop.permute.xlu0 %5554  ;;  %v5407_v4 = vpop.permute.xlu1 %5406 }
 0x6a1   :  { %v10750_v3 = vpop.permute.xlu1 %5430  ;;  %v5351_v20 = vpop.permute.xlu0 %5350 }
 0x6a5   :  { %v10752_v0 = vpop.permute.xlu1 %5438  ;;  %v5359_v27 = vpop.permute.xlu0 %5358 }
 0x6a9   :  { %v10754_v5 = vpop.permute.xlu1 %5470  ;;  %v5383_v35 = vpop.permute.xlu0 %5382 }
 0x6ad   :  { %v10756_v46 = vpop.permute.xlu1 %5478  ;;  %v5391_v1 = vpop.permute.xlu0 %5390 }
 0x6b1   :  { %v10758_v15 = vpop.permute.xlu1 %5502  ;;  %v5411_v36 = vpop.permute.xlu0 %5410 }
 0x6b5   :  { %v10760_v24 = vpop.permute.xlu1 %5510  ;;  %v5419_v11 = vpop.permute.xlu0 %5418 }
 0x6b9   :  { %v5519_v48 = vpop.permute.xlu1 %5518  ;;  %v10762_v47 = vpop.permute.xlu0 %5442 }
 0x6ba   :  { %v5634_v57 = vsel %vm2861_vm2, %v10627_v43, %v5519_v48  ;;  %v5578_v43 = vsel %vm317_vm13, %v5577_v21, %v5343_v51 }
 0x6bb   :  { %v5635_v25 = vsel %vm317_vm13, %v5634_v57, %v5523_v16  ;;  %v5580_v23 = vsel %vm5579_vm8, %v5578_v43, %v5347_v31 }
 0x6bc   :  { %v5581_v38 = vsel %vm4648_vm7, %v5580_v23, %v5351_v20 }
 0x6bd   :  { %v5527_v45 = vpop.permute.xlu1 %5526  ;;  %v10767_v32 = vpop.permute.xlu0 %5450 }
 0x6be   :  { %v10770_v50 = vsel %vm5579_vm8, %v5635_v25, %v5527_v45 }
 0x6c1   :  { %v10772_v22 = vpop.permute.xlu1 %5550  ;;  %v5459_v34 = vpop.permute.xlu0 %5458 }
 0x6c2   :  { %v5619_v9 = vsel %vm2861_vm2, %v10644_v56, %v5459_v34 }
 0x6c3   :  { %v5620_v48 = vsel %vm317_vm13, %v5619_v9, %v10725_v49 }
 0x6c5   :  { %v10776_v30 = vpop.permute.xlu1 %5558  ;;  %v5467_v60 = vpop.permute.xlu0 %5466 }
 0x6c9   :  { %v5491_v37 = vpop.permute.xlu0 %5490  ;;  %v5355_v39 = vpop.permute.xlu1 %5354 }
 0x6ca   :  { %v5583_v13 = vsel %vm5582_vm9, %v5581_v38, %v5355_v39 }
 0x6cb   :  { %v5585_v8 = vsel %vm5584_vm10, %v5583_v13, %v5359_v27 }
 0x6cd   :  { %v5499_v12 = vpop.permute.xlu0 %5498  ;;  %v5363_v40 = vpop.permute.xlu1 %5362 }
 0x6ce   :  { %v5587_v29 = vsel %vm5586_vm11, %v5585_v8, %v5363_v40 }
 0x6cf   :  { %v5589_v42 = vsel %vm5588_vm12, %v5587_v29, %v5367_v59 }
 0x6d0   :  { %v5591_v2 = vsel %vm5590_vm14, %v5589_v42, %v5371_v7 }
 0x6d1   :  { %v5531_v51 = vpop.permute.xlu0 %5530  ;;  %v5593_v52 = vsel %vm5592_vm15, %v5591_v2, %v5375_v6  ;;  %v5387_v17 = vpop.permute.xlu1 %5386  ;;  %v5605_v6 = vsel %vm317_vm13, %v5604_v18, %v10740_v26  ;;  %v5621_v26 = vsel %vm5579_vm8, %v5620_v48, %v5467_v60 }
 0x6d2   :  { %v5595_v61 = vsel %vm5594_vm0, %v5593_v52, %v5379_v55  ;;  %v5606_v55 = vsel %vm5579_vm8, %v5605_v6, %v5407_v4  ;;  %v5622_v56 = vsel %vm4648_vm7, %v5621_v26, %v10754_v5 }
 0x6d3   :  { %v5597_v62 = vsel %vm5596_vm1, %v5595_v61, %v5383_v35  ;;  %v5607_v20 = vsel %vm4648_vm7, %v5606_v55, %v5411_v36 }
 0x6d4   :  { %v5599_v59 = vsel %vm5598_vm3, %v5597_v62, %v5387_v17 }
 0x6d5   :  { %v5539_v19 = vpop.permute.xlu0 %5538  ;;  %v5601_v31 = vsel %vm5600_vm4, %v5599_v59, %v5391_v1  ;;  %v5395_v7 = vpop.permute.xlu1 %5394 }
 0x6d6   :  { %v10794_v16 = vsel %vm5602_vm5, %v5601_v31, %v5395_v7  ;;  %v5677_v7 = vld [vmem:[#allocation2 + $0x80] sm:$0xff] }
 0x6d9   :  { %v5563_v27 = vpop.permute.xlu0 %5562  ;;  %v5415_v35 = vpop.permute.xlu1 %5414 }
 0x6da   :  { %v5608_v54 = vsel %vm5582_vm9, %v5607_v20, %v5415_v35  ;;  %v5685_v20 = vld [vmem:[#allocation2 + $0xc0] sm:$0xff]  ;;  %v5678_v35 = vld [vmem:[#allocation2 + $0x88] sm:$0xff] }
 0x6db   :  { %v5609_v1 = vsel %vm5584_vm10, %v5608_v54, %v5419_v11  ;;  %v5687_v54 = vld [vmem:[#allocation2 + $0xd0] sm:$0xff] }
 0x6dd   :  { %v5571_v57 = vpop.permute.xlu0 %5570  ;;  %v5423_v25 = vpop.permute.xlu1 %5422 }
 0x6de   :  { %v5610_v4 = vsel %vm5586_vm11, %v5609_v1, %v5423_v25  ;;  %v5689_v1 = vld [vmem:[#allocation2 + $0xe0] sm:$0xff] }
 0x6df   :  { %v5611_v36 = vsel %vm5588_vm12, %v5610_v4, %v10742_v41 }
 0x6e0   :  { %v5612_v45 = vsel %vm5590_vm14, %v5611_v36, %v10750_v3 }
 0x6e1   :  { %v5475_v34 = vpop.permute.xlu0 %5474  ;;  %v5613_v11 = vsel %vm5592_vm15, %v5612_v45, %v10744_v33  ;;  %v5447_v49 = vpop.permute.xlu1 %5446 }
 0x6e2   :  { %v5623_v21 = vsel %vm5582_vm9, %v5622_v56, %v5475_v34  ;;  %v5614_v60 = vsel %vm5594_vm0, %v5613_v11, %v10752_v0  ;;  %v5688_v56 = vld [vmem:[#allocation2 + $0xd8] sm:$0xff] }
 0x6e3   :  { %v5615_v43 = vsel %vm5596_vm1, %v5614_v60, %v10762_v47  ;;  %v5624_v3 = vsel %vm5584_vm10, %v5623_v21, %v10756_v46  ;;  %v5637_v46 = vsel %vm4648_vm7, %v10770_v50, %v5531_v51 }
 0x6e4   :  { %v5616_v41 = vsel %vm5598_vm3, %v5615_v43, %v5447_v49 }
 0x6e5   :  { %v5483_v23 = vpop.permute.xlu0 %5482  ;;  %v5617_v5 = vsel %vm5600_vm4, %v5616_v41, %v10767_v32  ;;  %v5455_v38 = vpop.permute.xlu1 %5454 }
 0x6e6   :  { %v5625_v33 = vsel %vm5586_vm11, %v5624_v3, %v5483_v23  ;;  %v10828_v39 = vsel %vm5602_vm5, %v5617_v5, %v5455_v38  ;;  %v5680_v3 = vld [vmem:[#allocation2 + $0x98] sm:$0xff] }
 0x6e7   :  { %v5626_v0 = vsel %vm5588_vm12, %v5625_v33, %v10732_v44  ;;  %v5653_v47 = vcombine.low %v10794_v16, %v10828_v39 }
 0x6e8   :  { %v5627_v13 = vsel %vm5590_vm14, %v5626_v0, %v5491_v37 }
 0x6e9   :  { %v5628_v32 = vsel %vm5592_vm15, %v5627_v13, %v10736_v63  ;;  %v5507_v8 = vpop.permute.xlu0 %5506  ;;  %v5535_v40 = vpop.permute.xlu1 %5534  ;;  %v5692_v13 = vld [vmem:[#allocation2 + $0xf8] sm:$0xff] }
 0x6ea   :  { %v5629_v29 = vsel %vm5594_vm0, %v5628_v32, %v5499_v12  ;;  %v5638_v42 = vsel %vm5582_vm9, %v5637_v46, %v5535_v40  ;;  %v5691_v46 = vld [vmem:[#allocation2 + $0xf0] sm:$0xff] }
 0x6eb   :  { %v5630_v44 = vsel %vm5596_vm1, %v5629_v29, %v10758_v15  ;;  %v5639_v52 = vsel %vm5584_vm10, %v5638_v42, %v5539_v19 }
 0x6ec   :  { %v5631_v2 = vsel %vm5598_vm3, %v5630_v44, %v5507_v8 }
 0x6ed   :  { %v5632_v37 = vsel %vm5600_vm4, %v5631_v2, %v10760_v24  ;;  %v5543_v50 = vpop.permute.xlu1 %5542  ;;  %v5515_v51 = vpop.permute.xlu0 %5514 }
 0x6ee   :  { %v5640_v63 = vsel %vm5586_vm11, %v5639_v52, %v5543_v50  ;;  %v5683_v50 = vld [vmem:[#allocation2 + $0xb0] sm:$0xff] }
 0x6ef   :  { %v5641_v17 = vsel %vm5588_vm12, %v5640_v63, %v10746_v58  ;;  %v10862_v58 = vsel %vm5602_vm5, %v5632_v37, %v5515_v51  ;;  %v5684_v37 = vld [vmem:[#allocation2 + $0xb8] sm:$0xff] }
 0x6f0   :  { %v5642_v12 = vsel %vm5590_vm14, %v5641_v17, %v10772_v22  ;;  %v5690_v17 = vld [vmem:[#allocation2 + $0xe8] sm:$0xff] }
 0x6f1   :  { %v5643_v15 = vsel %vm5592_vm15, %v5642_v12, %v10748_v53  ;;  %v5567_v61 = vpop.permute.xlu1 %5566  ;;  %v10857_v18 = vpop.permute.xlu0 %5724  ;;  %v5679_v53 = vld [vmem:[#allocation2 + $0x90] sm:$0xff] }
 0x6f2   :  { %v5644_v62 = vsel %vm5594_vm0, %v5643_v15, %v10776_v30  ;;  %v10870_v6 = vmul.f32 %v10857_v18, %v5679_v53  ;;  %v10873_v55 = vmul.f32 %v10857_v18, %v5677_v7  ;;  %v10879_v25 = vmul.f32 %v10857_v18, %v5678_v35  ;;  %v5682_v53 = vld [vmem:[#allocation2 + $0xa8] sm:$0xff] }
 0x6f3   :  { %v5645_v24 = vsel %vm5596_vm1, %v5644_v62, %v5563_v27  ;;  %v5681_v27 = vld [vmem:[#allocation2 + $0xa0] sm:$0xff]  ;;  %v10911_v23 = vmul.f32 %v10857_v18, %v5680_v3  ;;  %v10938_v52 = vmul.f32 %v10857_v18, %v5684_v37  ;;  %v10947_v63 = vmul.f32 %v10857_v18, %v5683_v50 }
 0x6f4   :  { %v5646_v59 = vsel %vm5598_vm3, %v5645_v24, %v5567_v61  ;;  %v10876_v48 = vmul.f32 %v10857_v18, %v5681_v27  ;;  %v10889_v34 = vrot.slane %v10870_v6, %v10380_v10  ;;  %v10893_v11 = vrot.slane %v10873_v55, %v10380_v10 }
 0x6f5   :  { %v5647_v19 = vsel %vm5600_vm4, %v5646_v59, %v5571_v57  ;;  %v5575_v31 = vpop.permute.xlu1 %5574  ;;  %v5686_v57 = vld [vmem:[#allocation2 + $0xc8] sm:$0xff]  ;;  %v5819_v0 = vrot.slane %v10879_v25, %v10380_v10  ;;  %v5951_v51 = vrot.slane %v10911_v23, %v10380_v10  ;;  %v10968_v7 = vrot.slane %v10947_v63, %v10380_v10 }
 0x6f6   :  { %v10865_v22 = vsel %vm5602_vm5, %v5647_v19, %v5575_v31  ;;  %v10919_v33 = vrot.slane %v10876_v48, %v10380_v10  ;;  %v6215_v31 = vrot.slane %v10938_v52, %v10380_v10  ;;  %v5878_v16 = vcombine.high %v10870_v6, %v7537_v14 }
 0x6f7   :  { %v5654_v30 = vcombine.low %v10862_v58, %v10865_v22 }
 0x6f9   :  { %v5727_v9 = vpop.permute.xlu1 %5726 }
 0x6fa   :  { %v10881_v26 = vmul.f32 %v5727_v9, %v5687_v54  ;;  %v5738_v4 = vmul.f32 %v5727_v9, %v5685_v20  ;;  %v10883_v36 = vmul.f32 %v5727_v9, %v5689_v1  ;;  %v10885_v45 = vmul.f32 %v5727_v9, %v5686_v57 }
 0x6fb   :  { %v10895_v49 = vmul.f32 %v5727_v9, %v5688_v56  ;;  %v10925_v8 = vmul.f32 %v5727_v9, %v5692_v13  ;;  %v10927_v40 = vmul.f32 %v5727_v9, %v5691_v46  ;;  %v10955_v61 = vmul.f32 %v5727_v9, %v5690_v17 }
 0x6fc   :  { %v10899_v21 = vrot.slane %v10881_v26, %v10380_v10  ;;  %v10902_v60 = vrot.slane %v5738_v4, %v10380_v10  ;;  %v10906_v43 = vrot.slane %v10883_v36, %v10380_v10  ;;  %v5834_v41 = vrot.slane %v10885_v45, %v10380_v10 }
 0x6fd   :  { %v5966_v32 = vrot.slane %v10895_v49, %v10380_v10  ;;  %v6230_v12 = vrot.slane %v10925_v8, %v10380_v10  ;;  %v10953_v15 = vrot.slane %v10927_v40, %v10380_v10  ;;  %v10971_v20 = vmul.f32 %v10857_v18, %v5682_v53 }
 0x6fe   :  { %v5909_v5 = vcombine.high %v10889_v34, %v10899_v21  ;;  %v5777_v38 = vcombine.high %v10893_v11, %v10902_v60  ;;  %v6041_v44 = vcombine.high %v10919_v33, %v10906_v43  ;;  %v5842_v2 = vcombine.low %v5819_v0, %v5834_v41 }
 0x6ff   :  { %v5974_v59 = vcombine.low %v5951_v51, %v5966_v32  ;;  %v5843_v19 = vcombine.high %v5819_v0, %v5834_v41  ;;  %v6238_v27 = vcombine.low %v6215_v31, %v6230_v12  ;;  %v6173_v54 = vcombine.high %v10968_v7, %v10953_v15 }
 0x700   :  { %v10930_v29 = vrot.slane %v5909_v5, %v10403_v28  ;;  %v10933_v42 = vrot.slane %v5777_v38, %v10403_v28  ;;  %v10958_v62 = vrot.slane %v6041_v44, %v10403_v28  ;;  %v5850_v24 = vrot.slane %v5842_v2, %v10403_v28 }
 0x701   :  { %v10974_v35 = vrot.slane %v5974_v59, %v10403_v28  ;;  %v5857_v9 = vrot.slane %v5843_v19, %v10403_v28  ;;  %v6098_v1 = vrot.slane %v10955_v61, %v10380_v10  ;;  %v6083_v18 = vrot.slane %v10971_v20, %v10380_v10 }
 0x702   :  { %6339 = vrot.lane.b32.xlu0 %v10930_v29, %s7530_s12  ;;  %6279 = vrot.lane.b32.xlu1 %v10933_v42, %s7530_s12  ;;  %v10987_v57 = vrot.slane %v6238_v27, %v10403_v28  ;;  %v10990_v56 = vrot.slane %v6173_v54, %v10403_v28  ;;  %v5975_v41 = vcombine.high %v5951_v51, %v5966_v32 }
 0x703   :  { %v6106_v3 = vcombine.low %v6083_v18, %v6098_v1  ;;  %v5761_v5 = vcombine.high %v5738_v4, %v7537_v14  ;;  %v5746_v38 = vcombine.high %v10873_v55, %v7537_v14  ;;  %v6239_v0 = vcombine.high %v6215_v31, %v6230_v12 }
 0x704   :  { %v6107_v13 = vcombine.high %v6083_v18, %v6098_v1  ;;  %v11000_v46 = vrot.slane %v5975_v41, %v10403_v28  ;;  %v5776_v4 = vcombine.low %v10893_v11, %v10902_v60  ;;  %v5827_v60 = vcombine.high %v10885_v45, %v7537_v14 }
 0x705   :  { %v11003_v44 = vrot.slane %v6106_v3, %v10403_v28  ;;  %v5775_v32 = vrot.slane %v5761_v5, %v10380_v10  ;;  %v5760_v55 = vrot.slane %v5746_v38, %v10380_v10  ;;  %v11014_v2 = vrot.slane %v6239_v0, %v10403_v28 }
 0x706   :  { %6399 = vrot.lane.b32.xlu0 %v10958_v62, %s7530_s12  ;;  %6303 = vrot.lane.b32.xlu1 %v5850_v24, %s7529_s23  ;;  %v11017_v37 = vrot.slane %v6107_v13, %v10403_v28  ;;  %v11020_v50 = vrot.slane %v5776_v4, %v10403_v28  ;;  %v5812_v51 = vcombine.high %v10879_v25, %v7537_v14 }
 0x707   :  { %v5792_v11 = vcombine.low %v5760_v55, %v5775_v32  ;;  %v5793_v59 = vcombine.high %v5760_v55, %v5775_v32  ;;  %v5841_v19 = vrot.slane %v5827_v60, %v10380_v10  ;;  %v5668_v45 = vrot.slane %v5654_v30, %v10380_v10 }
 0x708   :  { %v5808_v17 = vcombine.high %v11020_v50, %v7537_v14  ;;  %v5826_v25 = vrot.slane %v5812_v51, %v10380_v10  ;;  %v5661_v31 = vrot.slane %v5653_v47, %v10380_v10  ;;  %v5809_v53 = vcombine.high %v10933_v42, %v7537_v14 }
 0x709   :  { %v11033_v12 = vrot.slane %v5792_v11, %v10403_v28  ;;  %v11051_v27 = vrot.slane %v5793_v59, %v10403_v28  ;;  %v5893_v22 = vcombine.high %v10881_v26, %v7537_v14  ;;  %v5908_v39 = vcombine.low %v10889_v34, %v10899_v21 }
 0x70a   :  { %6363 = vrot.lane.b32.xlu0 %v10974_v35, %s7529_s23  ;;  %6311 = vrot.lane.b32.xlu1 %v5857_v9, %s7534_s30  ;;  %v5858_v58 = vcombine.low %v5826_v25, %v5841_v19  ;;  %v5669_v30 = vcombine.low %v5661_v31, %v5668_v45  ;;  %v5874_v47 = vcombine.high %v5850_v24, %v7537_v14 }
 0x70b   :  { %v5859_v54 = vcombine.high %v5826_v25, %v5841_v19  ;;  %v5907_v26 = vrot.slane %v5893_v22, %v10380_v10  ;;  %v5892_v1 = vrot.slane %v5878_v16, %v10380_v10  ;;  %v11072_v6 = vrot.slane %v5908_v39, %v10403_v28 }
 0x70c   :  { %5671 = vst [vmem:[#allocation4] sm:$0xff] %v5669_v30  ;;  %v11064_v42 = vrot.slane %v5858_v58, %v10403_v28  ;;  %v5875_v34 = vcombine.high %v5857_v9, %v7537_v14  ;;  %v6040_v18 = vcombine.low %v10919_v33, %v10906_v43  ;;  %v6172_v5 = vcombine.low %v10968_v7, %v10953_v15 }
 0x70d   :  { %v11076_v21 = vrot.slane %v5859_v54, %v10403_v28  ;;  %v5924_v24 = vcombine.low %v5892_v1, %v5907_v26  ;;  %v5940_v41 = vcombine.high %v11072_v6, %v7537_v14  ;;  %v6025_v43 = vcombine.high %v10883_v36, %v7537_v14 }
 0x70e   :  { %6483 = vrot.lane.b32.xlu0 %v10987_v57, %s7529_s23  ;;  %6459 = vrot.lane.b32.xlu1 %v10990_v56, %s7530_s12  ;;  %v11089_v9 = vrot.slane %v6040_v18, %v10403_v28  ;;  %v6010_v33 = vcombine.high %v10876_v48, %v7537_v14  ;;  %v5941_v38 = vcombine.high %v10930_v29, %v7537_v14 }
 0x70f   :  { %v11086_v3 = vrot.slane %v5924_v24, %v10403_v28  ;;  %v11105_v13 = vrot.slane %v6172_v5, %v10403_v28  ;;  %v6039_v15 = vrot.slane %v6025_v43, %v10380_v10  ;;  %v6157_v36 = vcombine.high %v10927_v40, %v7537_v14 }
 0x710   :  { %v6072_v0 = vcombine.high %v11089_v9, %v7537_v14  ;;  %v6024_v48 = vrot.slane %v6010_v33, %v10380_v10  ;;  %v6142_v29 = vcombine.high %v10947_v63, %v7537_v14  ;;  %v6073_v7 = vcombine.high %v10958_v62, %v7537_v14 }
 0x711   :  { %v6204_v4 = vcombine.high %v11105_v13, %v7537_v14  ;;  %v6171_v55 = vrot.slane %v6157_v36, %v10380_v10  ;;  %v6205_v63 = vcombine.high %v10990_v56, %v7537_v14  ;;  %v5925_v60 = vcombine.high %v5892_v1, %v5907_v26 }
 0x712   :  { %6371 = vrot.lane.b32.xlu0 %v11000_v46, %s7534_s30  ;;  %6423 = vrot.lane.b32.xlu1 %v11003_v44, %s7529_s23  ;;  %v6056_v32 = vcombine.low %v6024_v48, %v6039_v15  ;;  %v6156_v40 = vrot.slane %v6142_v29, %v10380_v10  ;;  %v6057_v19 = vcombine.high %v6024_v48, %v6039_v15  ;;  %s7551_s23 = smov [#allocation4]  }
 0x713   :  { %v5939_v51 = vrot.slane %v5925_v60, %v10403_v28  ;;  %v5959_v25 = vcombine.high %v10895_v49, %v7537_v14  ;;  %v5944_v31 = vcombine.high %v10911_v23, %v7537_v14  ;;  %v6006_v58 = vcombine.high %v10974_v35, %v7537_v14  ;;  %s6603_s12 = sshll.u32 %s7551_s23, 4  ;;  %s6604_s12 = int_to_ptr.vmem [resolvable:$true] %s6603_s12 }
 0x714   :  { %v11124_v11 = vrot.slane %v6056_v32, %v10403_v28  ;;  %v6188_v62 = vcombine.low %v6156_v40, %v6171_v55  ;;  %v6189_v59 = vcombine.high %v6156_v40, %v6171_v55  ;;  %v11137_v56 = vrot.slane %v6057_v19, %v10403_v28  ;;  %p7510_p1 = scmp.lt.s32.totalorder %s6604_s12, %s6604_s12 }
 0x715   :  { %v5973_v22 = vrot.slane %v5959_v25, %v10380_v10  ;;  %v6223_v30 = vcombine.high %v10925_v8, %v7537_v14  ;;  %v5958_v49 = vrot.slane %v5944_v31, %v10380_v10  ;;  %v6208_v23 = vcombine.high %v10938_v52, %v7537_v14 }
 0x716   :  { %6491 = vrot.lane.b32.xlu0 %v11014_v2, %s7534_s30  ;;  %6431 = vrot.lane.b32.xlu1 %v11017_v37, %s7534_s30  ;;  %v6203_v45 = vrot.slane %v6189_v59, %v10403_v28  ;;  %v6270_v35 = vcombine.high %v10987_v57, %v7537_v14  ;;  %v6091_v8 = vcombine.high %v10955_v61, %v7537_v14 }
 0x717   :  { %v5990_v16 = vcombine.low %v5958_v49, %v5973_v22  ;;  %v6237_v39 = vrot.slane %v6223_v30, %v10380_v10  ;;  %v6076_v52 = vcombine.high %v10971_v20, %v7537_v14  ;;  %v6007_v57 = vcombine.high %v11000_v46, %v7537_v14 }
 0x718   :  { %v6105_v26 = vrot.slane %v6091_v8, %v10380_v10  ;;  %v5991_v20 = vcombine.high %v5958_v49, %v5973_v22  ;;  %v5942_v33 = vcombine.high %v11086_v3, %v7537_v14  ;;  %v5811_v15 = vcombine.high %v11051_v27, %v7537_v14 }
 0x719   :  { %v6090_v61 = vrot.slane %v6076_v52, %v10380_v10  ;;  %v5877_v36 = vcombine.high %v11076_v21, %v7537_v14  ;;  %v6074_v48 = vcombine.high %v11124_v11, %v7537_v14  ;;  %v6075_v29 = vcombine.high %v11137_v56, %v7537_v14 }
 0x71a   :  { %6275 = vrot.lane.b32.xlu0 %v5808_v17, %s7541_s1  ;;  %6287 = vrot.lane.b32.xlu1 %v11033_v12, %s7532_s9  ;;  %v6196_v17 = vrot.slane %v6188_v62, %v10403_v28  ;;  %v6005_v46 = vrot.slane %v5991_v20, %v10403_v28 }
 0x71b   :  { %v6122_v24 = vcombine.low %v6090_v61, %v6105_v26  ;;  %v6123_v5 = vcombine.high %v6090_v61, %v6105_v26 }
 0x71d   :  { %v6130_v18 = vrot.slane %v6122_v24, %v10403_v28 }
 0x71e   :  { %6283 = vrot.lane.b32.xlu0 %v5809_v53, %s7545_s4  ;;  %6295 = vrot.lane.b32.xlu1 %v11051_v27, %s7533_s22  ;;  %v6138_v53 = vcombine.high %v11003_v44, %v7537_v14  ;;  %v6139_v44 = vcombine.high %v11017_v37, %v7537_v14  ;;  %v5998_v37 = vrot.slane %v5990_v16, %v10403_v28 }
 0x720   :  { %v6008_v27 = vcombine.high %v5998_v37, %v7537_v14 }
 0x722   :  { %6307 = vrot.lane.b32.xlu0 %v5874_v47, %s7546_s11  ;;  %6319 = vrot.lane.b32.xlu1 %v11064_v42, %s7535_s26  ;;  %v6222_v47 = vrot.slane %v6208_v23, %v10380_v10 }
 0x724   :  { %v6254_v54 = vcombine.low %v6222_v47, %v6237_v39 }
 0x726   :  { %6315 = vrot.lane.b32.xlu0 %v5875_v34, %s7547_s13  ;;  %6327 = vrot.lane.b32.xlu1 %v11076_v21, %s7531_s21  ;;  %v6262_v1 = vrot.slane %v6254_v54, %v10403_v28  ;;  %v6271_v34 = vcombine.high %v11014_v2, %v7537_v14  ;;  %v6137_v2 = vrot.slane %v6123_v5, %v10403_v28 }
 0x727   :  { %v6009_v21 = vcombine.high %v6005_v46, %v7537_v14 }
 0x728   :  { %v6141_v40 = vcombine.high %v6137_v2, %v7537_v14 }
 0x72a   :  { %6347 = vrot.lane.b32.xlu0 %v11086_v3, %s7532_s9  ;;  %6335 = vrot.lane.b32.xlu1 %v5940_v41, %s7541_s1  ;;  %v6255_v41 = vcombine.high %v6222_v47, %v6237_v39  ;;  %v5876_v3 = vcombine.high %v11064_v42, %v7537_v14  ;;  %v6272_v42 = vcombine.high %v6262_v1, %v7537_v14 }
 0x72c   :  { %v6269_v43 = vrot.slane %v6255_v41, %v10403_v28  ;;  %v5943_v28 = vcombine.high %v5939_v51, %v7537_v14 }
 0x72e   :  { %6395 = vrot.lane.b32.xlu0 %v6072_v0, %s7541_s1  ;;  %6343 = vrot.lane.b32.xlu1 %v5941_v38, %s7545_s4  ;;  %v5810_v38 = vcombine.high %v11033_v12, %v7537_v14  ;;  %v6206_v0 = vcombine.high %v6196_v17, %v7537_v14  ;;  %v6207_v12 = vcombine.high %v6203_v45, %v7537_v14 }
 0x72f   :  { %v6273_v55 = vcombine.high %v6269_v43, %v7537_v14 }
 0x732   :  { %6403 = vrot.lane.b32.xlu0 %v6073_v7, %s7545_s4  ;;  %6455 = vrot.lane.b32.xlu1 %v6204_v4, %s7541_s1  ;;  %v6140_v7 = vcombine.high %v6130_v18, %v7537_v14 }
 0x736   :  { %6407 = vrot.lane.b32.xlu0 %v11124_v11, %s7532_s9  ;;  %6463 = vrot.lane.b32.xlu1 %v6205_v63, %s7545_s4 }
 0x73a   :  { %6355 = vrot.lane.b32.xlu0 %v5939_v51, %s7533_s22  ;;  %6467 = vrot.lane.b32.xlu1 %v6196_v17, %s7532_s9 }
 0x73e   :  { %6475 = vrot.lane.b32.xlu0 %v6203_v45, %s7533_s22  ;;  %6415 = vrot.lane.b32.xlu1 %v11137_v56, %s7533_s22 }
 0x742   :  { %6427 = vrot.lane.b32.xlu0 %v6138_v53, %s7546_s11  ;;  %6367 = vrot.lane.b32.xlu1 %v6006_v58, %s7546_s11 }
 0x746   :  { %6435 = vrot.lane.b32.xlu0 %v6139_v44, %s7547_s13  ;;  %6487 = vrot.lane.b32.xlu1 %v6270_v35, %s7546_s11 }
 0x74a   :  { %6379 = vrot.lane.b32.xlu0 %v5998_v37, %s7535_s26  ;;  %6375 = vrot.lane.b32.xlu1 %v6007_v57, %s7547_s13 }
 0x74e   :  { %6499 = vrot.lane.b32.xlu0 %v6262_v1, %s7535_s26  ;;  %6495 = vrot.lane.b32.xlu1 %v6271_v34, %s7547_s13 }
 0x752   :  { %6387 = vrot.lane.b32.xlu0 %v6005_v46, %s7531_s21  ;;  %6439 = vrot.lane.b32.xlu1 %v6130_v18, %s7535_s26 }
 0x756   :  { %6507 = vrot.lane.b32.xlu0 %v6269_v43, %s7531_s21  ;;  %6447 = vrot.lane.b32.xlu1 %v6137_v2, %s7531_s21  ;;  %s7505_s21 = scalar_lea.vmem %s6604_s12, 256 }
 0x757   :  { %p7506_p0 = scmp.ne.s32.totalorder %s6604_s12, %s7505_s21  ;;  %p7511_p2 = scmp.lt.s32.totalorder %s7505_s21, %s7505_s21 }
 0x759   :  { %p7512_p3 = por %p7511_p2, %p7510_p1 }
 0x75a   :  { %6351 = vrot.lane.b32.xlu1 %v5942_v33, %s7548_s14  ;;  %6291 = vrot.lane.b32.xlu0 %v5810_v38, %s7548_s14 }
 0x75b   :  { %p7513_p4 = pnand %p7512_p3, %p7506_p0 }
 0x75e   :  { %6471 = vrot.lane.b32.xlu1 %v6206_v0, %s7548_s14  ;;  %6299 = vrot.lane.b32.xlu0 %v5811_v15, %s7549_s15 }
 0x762   :  { %6359 = vrot.lane.b32.xlu1 %v5943_v28, %s7549_s15  ;;  %6323 = vrot.lane.b32.xlu0 %v5876_v3, %s7550_s16 }
 0x766   :  { %6479 = vrot.lane.b32.xlu1 %v6207_v12, %s7549_s15  ;;  %6331 = vrot.lane.b32.xlu0 %v5877_v36, %s7540_s10 }
 0x76a   :  { %6383 = vrot.lane.b32.xlu1 %v6008_v27, %s7550_s16  ;;  %6411 = vrot.lane.b32.xlu0 %v6074_v48, %s7548_s14 }
 0x76e   :  { %6503 = vrot.lane.b32.xlu1 %v6272_v42, %s7550_s16  ;;  %6419 = vrot.lane.b32.xlu0 %v6075_v29, %s7549_s15 }
 0x772   :  { %6391 = vrot.lane.b32.xlu1 %v6009_v21, %s7540_s10  ;;  %6443 = vrot.lane.b32.xlu0 %v6140_v7, %s7550_s16 }
 0x774   :  { %v6340_v4 = vpop.permute.xlu0 %6339  ;;  %v6280_v32 = vpop.permute.xlu1 %6279 }
 0x776   :  { %6511 = vrot.lane.b32.xlu1 %v6273_v55, %s7540_s10  ;;  %6451 = vrot.lane.b32.xlu0 %v6141_v40, %s7540_s10 }
 0x778   :  { %v11229_v11 = vpop.permute.xlu0 %6399  ;;  %v6304_v63 = vpop.permute.xlu1 %6303 }
 0x77c   :  { %v11231_v60 = vpop.permute.xlu0 %6363  ;;  %v11233_v62 = vpop.permute.xlu1 %6311 }
 0x780   :  { %v11235_v51 = vpop.permute.xlu0 %6483  ;;  %v6460_v17 = vpop.permute.xlu1 %6459 }
 0x784   :  { %v11237_v59 = vpop.permute.xlu0 %6371  ;;  %v11239_v19 = vpop.permute.xlu1 %6423 }
 0x788   :  { %v11241_v45 = vpop.permute.xlu0 %6491  ;;  %v11243_v14 = vpop.permute.xlu1 %6431 }
 0x78c   :  { %v6276_v56 = vpop.permute.xlu0 %6275  ;;  %v6288_v25 = vpop.permute.xlu1 %6287 }
 0x78d   :  { %v6514_v31 = vsel %vm2861_vm2, %v11020_v50, %v6276_v56 }
 0x78e   :  { %v6515_v53 = vsel %vm317_vm13, %v6514_v31, %v6280_v32 }
 0x790   :  { %v6284_v58 = vpop.permute.xlu0 %6283  ;;  %v6296_v22 = vpop.permute.xlu1 %6295 }
 0x791   :  { %v6516_v30 = vsel %vm5579_vm8, %v6515_v53, %v6284_v58 }
 0x792   :  { %v6517_v49 = vsel %vm4648_vm7, %v6516_v30, %v6288_v25 }
 0x794   :  { %v6308_v23 = vpop.permute.xlu0 %6307  ;;  %v6320_v44 = vpop.permute.xlu1 %6319 }
 0x798   :  { %v6316_v35 = vpop.permute.xlu0 %6315  ;;  %v6328_v16 = vpop.permute.xlu1 %6327 }
 0x79c   :  { %v6348_v39 = vpop.permute.xlu0 %6347  ;;  %v6336_v8 = vpop.permute.xlu1 %6335 }
 0x79d   :  { %v6529_v47 = vsel %vm2861_vm2, %v11072_v6, %v6336_v8 }
 0x79e   :  { %v6530_v50 = vsel %vm317_vm13, %v6529_v47, %v6340_v4 }
 0x7a0   :  { %v6396_v52 = vpop.permute.xlu0 %6395  ;;  %v6344_v37 = vpop.permute.xlu1 %6343 }
 0x7a1   :  { %v6531_v57 = vsel %vm5579_vm8, %v6530_v50, %v6344_v37 }
 0x7a2   :  { %v6532_v54 = vsel %vm4648_vm7, %v6531_v57, %v6348_v39  ;;  %v6544_v39 = vsel %vm2861_vm2, %v11089_v9, %v6396_v52 }
 0x7a4   :  { %v6404_v26 = vpop.permute.xlu0 %6403  ;;  %v6456_v61 = vpop.permute.xlu1 %6455 }
 0x7a5   :  { %v6559_v29 = vsel %vm2861_vm2, %v11105_v13, %v6456_v61 }
 0x7a6   :  { %v6560_v55 = vsel %vm317_vm13, %v6559_v29, %v6460_v17 }
 0x7a8   :  { %v6408_v1 = vpop.permute.xlu0 %6407  ;;  %v6464_v34 = vpop.permute.xlu1 %6463 }
 0x7a9   :  { %v6561_v56 = vsel %vm5579_vm8, %v6560_v55, %v6464_v34 }
 0x7ac   :  { %v6356_v20 = vpop.permute.xlu0 %6355  ;;  %v6468_v24 = vpop.permute.xlu1 %6467 }
 0x7ad   :  { %v6562_v31 = vsel %vm4648_vm7, %v6561_v56, %v6468_v24 }
 0x7b0   :  { %v6476_v46 = vpop.permute.xlu0 %6475  ;;  %v6416_v18 = vpop.permute.xlu1 %6415 }
 0x7b4   :  { %v11255_v41 = vpop.permute.xlu0 %6427  ;;  %v6368_v5 = vpop.permute.xlu1 %6367 }
 0x7b8   :  { %v11257_v6 = vpop.permute.xlu0 %6435  ;;  %v6488_v43 = vpop.permute.xlu1 %6487 }
 0x7bc   :  { %v6380_v2 = vpop.permute.xlu0 %6379  ;;  %v6376_v33 = vpop.permute.xlu1 %6375 }
 0x7c0   :  { %v6500_v38 = vpop.permute.xlu0 %6499  ;;  %v6496_v0 = vpop.permute.xlu1 %6495 }
 0x7c4   :  { %v6388_v15 = vpop.permute.xlu0 %6387  ;;  %v11259_v28 = vpop.permute.xlu1 %6439 }
 0x7c8   :  { %v11261_v3 = vpop.permute.xlu0 %6507  ;;  %v11263_v12 = vpop.permute.xlu1 %6447 }
 0x7cc   :  { %v6352_v36 = vpop.permute.xlu1 %6351  ;;  %v6292_v27 = vpop.permute.xlu0 %6291 }
 0x7cd   :  { %v6518_v48 = vsel %vm5582_vm9, %v6517_v49, %v6292_v27  ;;  %v6533_v4 = vsel %vm5582_vm9, %v6532_v54, %v6352_v36 }
 0x7ce   :  { %v6519_v42 = vsel %vm5584_vm10, %v6518_v48, %v6296_v22  ;;  %v6534_v53 = vsel %vm5584_vm10, %v6533_v4, %v6356_v20 }
 0x7d0   :  { %v6472_v21 = vpop.permute.xlu1 %6471  ;;  %v6300_v7 = vpop.permute.xlu0 %6299 }
 0x7d1   :  { %v6520_v32 = vsel %vm5586_vm11, %v6519_v42, %v6300_v7  ;;  %v6563_v30 = vsel %vm5582_vm9, %v6562_v31, %v6472_v21 }
 0x7d2   :  { %v6521_v40 = vsel %vm5588_vm12, %v6520_v32, %v6304_v63 }
 0x7d3   :  { %v6522_v25 = vsel %vm5590_vm14, %v6521_v40, %v6308_v23 }
 0x7d4   :  { %v6360_v58 = vpop.permute.xlu1 %6359  ;;  %v6523_v13 = vsel %vm5592_vm15, %v6522_v25, %v11233_v62  ;;  %v6324_v22 = vpop.permute.xlu0 %6323  ;;  %v6564_v62 = vsel %vm5584_vm10, %v6563_v30, %v6476_v46 }
 0x7d5   :  { %v6535_v49 = vsel %vm5586_vm11, %v6534_v53, %v6360_v58  ;;  %v6524_v17 = vsel %vm5594_vm0, %v6523_v13, %v6316_v35 }
 0x7d6   :  { %v6536_v63 = vsel %vm5588_vm12, %v6535_v49, %v11231_v60  ;;  %v6525_v23 = vsel %vm5596_vm1, %v6524_v17, %v6320_v44  ;;  %v6545_v60 = vsel %vm317_vm13, %v6544_v39, %v11229_v11 }
 0x7d7   :  { %v6537_v8 = vsel %vm5590_vm14, %v6536_v63, %v6368_v5  ;;  %v6526_v47 = vsel %vm5598_vm3, %v6525_v23, %v6324_v22  ;;  %v6546_v52 = vsel %vm5579_vm8, %v6545_v60, %v6404_v26 }
 0x7d8   :  { %v6480_v50 = vpop.permute.xlu1 %6479  ;;  %v6527_v37 = vsel %vm5600_vm4, %v6526_v47, %v6328_v16  ;;  %v6332_v57 = vpop.permute.xlu0 %6331  ;;  %v6538_v9 = vsel %vm5592_vm15, %v6537_v8, %v11237_v59  ;;  %v6547_v61 = vsel %vm4648_vm7, %v6546_v52, %v6408_v1 }
 0x7d9   :  { %v6565_v35 = vsel %vm5586_vm11, %v6564_v62, %v6480_v50  ;;  %v6539_v20 = vsel %vm5594_vm0, %v6538_v9, %v6376_v33  ;;  %v6528_v42 = vsel %vm5602_vm5, %v6527_v37, %v6332_v57 }
 0x7da   :  { %v6566_v44 = vsel %vm5588_vm12, %v6565_v35, %v11235_v51  ;;  %v6540_v51 = vsel %vm5596_vm1, %v6539_v20, %v6380_v2 }
 0x7db   :  { %v6567_v54 = vsel %vm5590_vm14, %v6566_v44, %v6488_v43 }
 0x7dc   :  { %v6384_v34 = vpop.permute.xlu1 %6383  ;;  %v6412_v16 = vpop.permute.xlu0 %6411  ;;  %v6568_v11 = vsel %vm5592_vm15, %v6567_v54, %v11241_v45 }
 0x7dd   :  { %v6548_v24 = vsel %vm5582_vm9, %v6547_v61, %v6412_v16  ;;  %v6541_v26 = vsel %vm5598_vm3, %v6540_v51, %v6384_v34  ;;  %v6569_v43 = vsel %vm5594_vm0, %v6568_v11, %v6496_v0 }
 0x7de   :  { %v6549_v59 = vsel %vm5584_vm10, %v6548_v24, %v6416_v18  ;;  %v6570_v45 = vsel %vm5596_vm1, %v6569_v43, %v6500_v38  ;;  %v6542_v2 = vsel %vm5600_vm4, %v6541_v26, %v6388_v15 }
 0x7e0   :  { %v6504_v46 = vpop.permute.xlu1 %6503  ;;  %v6420_v5 = vpop.permute.xlu0 %6419 }
 0x7e1   :  { %v6550_v1 = vsel %vm5586_vm11, %v6549_v59, %v6420_v5  ;;  %v6571_v0 = vsel %vm5598_vm3, %v6570_v45, %v6504_v46 }
 0x7e2   :  { %v6551_v33 = vsel %vm5588_vm12, %v6550_v1, %v11239_v19  ;;  %v6572_v15 = vsel %vm5600_vm4, %v6571_v0, %v11261_v3 }
 0x7e3   :  { %v6552_v36 = vsel %vm5590_vm14, %v6551_v33, %v11255_v41 }
 0x7e4   :  { %v6392_v27 = vpop.permute.xlu1 %6391  ;;  %v6553_v18 = vsel %vm5592_vm15, %v6552_v36, %v11243_v14  ;;  %v6444_v48 = vpop.permute.xlu0 %6443 }
 0x7e5   :  { %v6543_v29 = vsel %vm5602_vm5, %v6542_v2, %v6392_v27  ;;  %v6554_v19 = vsel %vm5594_vm0, %v6553_v18, %v11257_v6 }
 0x7e6   :  { %v6578_v21 = vcombine.low %v6528_v42, %v6543_v29  ;;  %v6555_v41 = vsel %vm5596_vm1, %v6554_v19, %v11259_v28 }
 0x7e7   :  { %v6556_v38 = vsel %vm5598_vm3, %v6555_v41, %v6444_v48 }
 0x7e8   :  { %v6512_v14 = vpop.permute.xlu1 %6511  ;;  %v6557_v7 = vsel %vm5600_vm4, %v6556_v38, %v11263_v12  ;;  %v6452_v4 = vpop.permute.xlu0 %6451  ;;  %v6586_v6 = vrot.slane %v6578_v21, %v10380_v10 }
 0x7e9   :  { %v6573_v32 = vsel %vm5602_vm5, %v6572_v15, %v6512_v14  ;;  %v6558_v55 = vsel %vm5602_vm5, %v6557_v7, %v6452_v4 }
 0x7ea   :  { %v6579_v40 = vcombine.low %v6558_v55, %v6573_v32 }
 0x7ec   :  { %v6593_v28 = vrot.slane %v6579_v40, %v10380_v10 }
 0x7ee   :  { %v6594_v56 = vcombine.low %v6586_v6, %v6593_v28 }
 0x7f0   :  { %6596 = vst [vmem:[#allocation4 + $0x8] sm:$0xff] %v6594_v56 }
 0x7f1   :  { %7516 = shalt.err (!%p7513_p4)
}
 0x7f2   :  { %s7517_s30 = scalar_lea.hbm %s11352_s6, 256 }
 0x7f3   :  { %p7518_p5 = scmp.ne.s32.totalorder %s11352_s6, %s7517_s30  ;;  %p7521_p6 = scmp.lt.u32.totalorder %s7517_s30, %s11352_s6 }
 0x7f5   :  { %p7523_p7 = pnand %p7521_p6, %p7518_p5 }
 0x7f7   :  { %7526 = shalt.err (!%p7523_p7)
}
 0x7f8   :  { %6606 = dma.vmem_to_hbm [thread:$0]  %s6604_s12, 256, %s11352_s6, [#allocation5]  }
 0x7f9   :  { %7527 = dma.done.wait [#allocation5], 256  }
 0x7fa   :  { %7528 = vsyncadd [#allocation5], 4294967040 }
 0x7fb   :  { %6610 = vsyncpa [#allocation5], 1 }

</bundles_post_ra>
